<compile_context>
chip_gen: v6e
topology: v6e:2x2x1
jax: 0.10.0
libtpu: 0.0.40
codegen_flags: <defaults>
</compile_context>

<pallas_src>
import functools
import math

import jax
import jax.numpy as jnp
from jax import lax
from jax.experimental import pallas as pl
from jax.experimental.pallas import tpu as pltpu

EPS = 1e-5  # PyTorch LayerNorm default


# ---------------------------------------------------------------------------
# in-kernel helpers
# ---------------------------------------------------------------------------
def _layernorm(x, gamma, beta):
    # x: (M, D), gamma/beta: (1, D); biased variance like torch.nn.LayerNorm
    mean = jnp.mean(x, axis=-1, keepdims=True)
    var = jnp.mean((x - mean) ** 2, axis=-1, keepdims=True)
    return (x - mean) * lax.rsqrt(var + EPS) * gamma + beta


# ---------------------------------------------------------------------------
# fused kernel: input Linear+LN, then num_layers x (MHA+res+LN, FFN+res+LN)
# one grid step == Bt batch elements; all weights live in VMEM as full blocks
# ---------------------------------------------------------------------------
def _fused_kernel(n_wins_ref,                                   # scalar-prefetch (SMEM)
                  src_ref,
                  in_wt_ref, in_b_ref, in_g_ref, in_beta_ref,
                  wq_ref, wk_ref, wv_ref, bq_ref, bk_ref, bv_ref,
                  wo_ref, bo_ref, ln1_g_ref, ln1_b_ref,
                  w1_ref, fb1_ref, w2_ref, fb2_ref, ln2_g_ref, ln2_b_ref,
                  out_ref, *, nhead, num_layers, batch_tile):
    bi = pl.program_id(0)
    Bt = batch_tile
    src = src_ref[...]                                          # (Bt, S, F)
    S = src.shape[1]
    M = Bt * S
    x = src.reshape(M, src.shape[2])                            # flattened rows

    # ---- input Linear + LayerNorm (self.linear, self.norm1) ----
    x = jnp.dot(x, in_wt_ref[...], preferred_element_type=jnp.float32) + in_b_ref[...]
    x = _layernorm(x, in_g_ref[...], in_beta_ref[...])          # (M, D)
    D = x.shape[-1]
    hd = D // nhead
    N = nhead * Bt

    # key-padding mask, key-index only, shared by all layers: (Bt, 1, S), True = valid
    iota_k = lax.broadcasted_iota(jnp.int32, (1, 1, S), 2)
    valid_rows = [iota_k < n_wins_ref[bi * Bt + t] for t in range(Bt)]
    valid = valid_rows[0] if Bt == 1 else jnp.concatenate(valid_rows, axis=0)
    neg_inf = jnp.float32(-1e30)

    for l in range(num_layers):                                 # static unroll (L small)
        # ---------------- multi-head self-attention ----------------
        # head-batched view of x; weights are head-major (nhead, D, hd) so the
        # projections come out (nhead, M, hd) with no lane slicing / stacking.
        xh = jnp.broadcast_to(x[None], (nhead, M, D))
        q = jnp.einsum("hmd,hdj->hmj", xh, wq_ref[l],
                       preferred_element_type=jnp.float32) + bq_ref[l]
        k = jnp.einsum("hmd,hdj->hmj", xh, wk_ref[l],
                       preferred_element_type=jnp.float32) + bk_ref[l]
        v = jnp.einsum("hmd,hdj->hmj", xh, wv_ref[l],
                       preferred_element_type=jnp.float32) + bv_ref[l]
        # (nhead, Bt*S, hd) -> (nhead*Bt, S, hd): leading-dim regroup only
        q = q.reshape(N, S, hd)
        k = k.reshape(N, S, hd)
        v = v.reshape(N, S, hd)

        # 1/sqrt(hd) is already folded into wq/bq host-side
        s = jnp.einsum("nqj,nkj->nqk", q, k,
                       preferred_element_type=jnp.float32)       # (N, S, S)
        s = s.reshape(nhead, Bt, S, S)
        s = jnp.where(valid[None], s, neg_inf)                   # broadcast (1,Bt,1,S)
        m = jnp.max(s, axis=-1, keepdims=True)
        p = jnp.exp(s - m)
        p = p * pl.reciprocal(jnp.sum(p, axis=-1, keepdims=True), approx=True)
        ctx = jnp.einsum("nqk,nkj->nqj", p.reshape(N, S, S), v,
                         preferred_element_type=jnp.float32)     # (N, S, hd)

        # head merge folded into the output projection: sum_h ctx_h @ wo_h
        ctx = ctx.reshape(nhead, M, hd)
        attn = jnp.einsum("hmj,hjd->hmd", ctx, wo_ref[l],
                          preferred_element_type=jnp.float32).sum(axis=0) + bo_ref[l]

        # dropout1 is identity at inference
        x = _layernorm(x + attn, ln1_g_ref[l], ln1_b_ref[l])

        # ---------------- FFN: linear1 -> relu -> linear2 ----------------
        h1 = jnp.maximum(
            jnp.dot(x, w1_ref[l], preferred_element_type=jnp.float32) + fb1_ref[l], 0.0)
        y = jnp.dot(h1, w2_ref[l], preferred_element_type=jnp.float32) + fb2_ref[l]
        # dropout / dropout2 are identity at inference
        x = _layernorm(x + y, ln2_g_ref[l], ln2_b_ref[l])

    out_ref[...] = x.reshape(Bt, S, D)


# ---------------------------------------------------------------------------
# host-side parameter relayout (free at init): transpose to (in, out), split heads,
# fold the 1/sqrt(hd) softmax scale into the q projection.
# ---------------------------------------------------------------------------
def prepare_params(params, *, nhead):
    D = params["in_w"].shape[0]
    L = params["wqkv"].shape[0]
    hd = D // nhead
    scale = 1.0 / math.sqrt(hd)

    wqkv = params["wqkv"]                       # (L, 3D, D) torch (out, in)
    bqkv = params["bqkv"]                       # (L, 1, 3D)
    wq, wk, wv = wqkv[:, :D], wqkv[:, D:2 * D], wqkv[:, 2 * D:]
    bq, bk, bv = bqkv[:, 0, :D], bqkv[:, 0, D:2 * D], bqkv[:, 0, 2 * D:]

    def head_w(w):                              # (L, D, D) -> (L, nhead, D_in, hd)
        return jnp.transpose(w.reshape(L, nhead, hd, D), (0, 1, 3, 2))

    def head_b(b):                              # (L, D) -> (L, nhead, 1, hd)
        return b.reshape(L, nhead, 1, hd)

    return {
        "in_wt": params["in_w"].T,              # (F, D)
        "in_b": params["in_b"], "in_g": params["in_g"], "in_beta": params["in_beta"],
        "wq_h": head_w(wq) * scale, "wk_h": head_w(wk), "wv_h": head_w(wv),
        "bq_h": head_b(bq) * scale, "bk_h": head_b(bk), "bv_h": head_b(bv),
        "wo_h": jnp.transpose(params["wo"], (0, 2, 1)).reshape(L, nhead, hd, D),
        "bo": params["bo"],
        "g1": params["g1"], "beta1": params["beta1"],
        "w1_t": jnp.transpose(params["w1"], (0, 2, 1)),   # (L, D, H)
        "b1": params["b1"],
        "w2_t": jnp.transpose(params["w2"], (0, 2, 1)),   # (L, H, D)
        "b2": params["b2"],
        "g2": params["g2"], "beta2": params["beta2"],
    }


# ---------------------------------------------------------------------------
# wrapper: single fused pallas_call
# ---------------------------------------------------------------------------
def self_attention_forward(src, n_wins, params, *, nhead):
    n_wins_in = n_wins
    B, S, F = src.shape
    D = params["in_w"].shape[0]
    L, H = params["w1"].shape[0], params["w1"].shape[1]
    hd = D // nhead
    kp = prepare_params(params, nhead=nhead)

    # batch fold: fill the MXU M-dim (Bt*S >= 128 when possible) but keep >= 2 grid
    # steps when the batch allows it so both v7x TensorCores get work.
    Bt = max(1, min(B, pl.cdiv(128, S)))
    if pl.cdiv(B, Bt) < 2 and B >= 2:
        Bt = pl.cdiv(B, 2)
    steps = pl.cdiv(B, Bt)
    Bp = steps * Bt
    if Bp != B:  # pad (fully-valid windows on zero rows; dropped from the output)
        src = jnp.concatenate([src, jnp.zeros((Bp - B, S, F), src.dtype)], axis=0)
        n_wins = jnp.concatenate(
            [n_wins, jnp.full((Bp - B,), S, n_wins.dtype)], axis=0)

    kernel = functools.partial(_fused_kernel, nhead=nhead, num_layers=L,
                               batch_tile=Bt)

    def run(single_buffer_weights):
        pm = pl.Buffered(1) if single_buffer_weights else None

        def full(shape):
            nd = len(shape)
            idx = lambda bi, nw, _n=nd: (0,) * _n
            if pm is None:
                return pl.BlockSpec(shape, idx)
            return pl.BlockSpec(shape, idx, pipeline_mode=pm)

        grid_spec = pltpu.PrefetchScalarGridSpec(
            num_scalar_prefetch=1,            # n_wins -> SMEM once, reused by all layers
            grid=(steps,),
            in_specs=[
                pl.BlockSpec((Bt, S, F), lambda bi, nw: (bi, 0, 0)),   # src slab
                full((F, D)), full((1, D)), full((1, D)), full((1, D)),
                full((L, nhead, D, hd)), full((L, nhead, D, hd)), full((L, nhead, D, hd)),
                full((L, nhead, 1, hd)), full((L, nhead, 1, hd)), full((L, nhead, 1, hd)),
                full((L, nhead, hd, D)), full((L, 1, D)),
                full((L, 1, D)), full((L, 1, D)),
                full((L, D, H)), full((L, 1, H)),
                full((L, H, D)), full((L, 1, D)),
                full((L, 1, D)), full((L, 1, D)),
            ],
            out_specs=pl.BlockSpec((Bt, S, D), lambda bi, nw: (bi, 0, 0)),
        )
        out = pl.pallas_call(
            kernel,
            out_shape=jax.ShapeDtypeStruct((Bp, S, D), jnp.float32),
            grid_spec=grid_spec,
            compiler_params=pltpu.CompilerParams(
                dimension_semantics=("parallel",)),   # batch axis -> 2 TCs on v7x
        )(n_wins, src,
          kp["in_wt"], kp["in_b"], kp["in_g"], kp["in_beta"],
          kp["wq_h"], kp["wk_h"], kp["wv_h"],
          kp["bq_h"], kp["bk_h"], kp["bv_h"],
          kp["wo_h"], kp["bo"], kp["g1"], kp["beta1"],
          kp["w1_t"], kp["b1"], kp["w2_t"], kp["b2"],
          kp["g2"], kp["beta2"])
        return jax.block_until_ready(out)

    try:
        out = run(single_buffer_weights=True)      # v7x VMEM headroom
    except Exception:                              # pipeline_mode unsupported -> default
        out = run(single_buffer_weights=False)

    return out[:B], n_wins_in


# ---------------------------------------------------------------------------
# deterministic parameter init (xavier_uniform for dim>1, like _reset_parameters);
# per-layer weights are stacked along a leading layer axis, PyTorch (out, in) layout.
# ---------------------------------------------------------------------------
def _xavier(key, shape):
    fan_out, fan_in = shape
    bound = math.sqrt(6.0 / (fan_in + fan_out))
    return jax.random.uniform(key, shape, jnp.float32, -bound, bound)


def make_params(key, *, in_feat, d_model, ffn_h, num_layers):
    D, H, L = d_model, ffn_h, num_layers
    keys = iter(jax.random.split(key, 2 + 6 * L))
    params = {
        "in_w": _xavier(next(keys), (D, in_feat)),
        "in_b": jax.random.normal(next(keys), (1, D), jnp.float32) * 0.02,
        "in_g": jnp.ones((1, D), jnp.float32),
        "in_beta": jnp.zeros((1, D), jnp.float32),
    }
    acc = {k: [] for k in ("wqkv", "bqkv", "wo", "bo", "g1", "beta1",
                           "w1", "b1", "w2", "b2", "g2", "beta2")}
    for _ in range(L):
        acc["wqkv"].append(_xavier(next(keys), (3 * D, D)))
        acc["bqkv"].append(jnp.zeros((1, 3 * D), jnp.float32))
        acc["wo"].append(_xavier(next(keys), (D, D)))
        acc["bo"].append(jnp.zeros((1, D), jnp.float32))
        acc["g1"].append(jnp.ones((1, D), jnp.float32))
        acc["beta1"].append(jnp.zeros((1, D), jnp.float32))
        acc["w1"].append(_xavier(next(keys), (H, D)))
        acc["b1"].append(jax.random.normal(next(keys), (1, H), jnp.float32) * 0.02)
        acc["w2"].append(_xavier(next(keys), (D, H)))
        acc["b2"].append(jax.random.normal(next(keys), (1, D), jnp.float32) * 0.02)
        acc["g2"].append(jnp.ones((1, D), jnp.float32))
        acc["beta2"].append(jnp.zeros((1, D), jnp.float32))
    for name, lst in acc.items():
        params[name] = jnp.stack(lst, axis=0)
    return params


# ---------------------------------------------------------------------------
# pure-JAX reference (mirrors the PyTorch eval-mode forward) for validation
# ---------------------------------------------------------------------------
def _ln_ref(x, g, b):
    mean = jnp.mean(x, axis=-1, keepdims=True)
    var = jnp.mean((x - mean) ** 2, axis=-1, keepdims=True)
    return (x - mean) / jnp.sqrt(var + EPS) * g + b


def reference_forward(src, n_wins, params, *, nhead):
    x = _ln_ref(src @ params["in_w"].T + params["in_b"],
                params["in_g"], params["in_beta"])
    B, S, D = x.shape
    hd = D // nhead
    L = params["wqkv"].shape[0]
    key_mask = jnp.arange(S)[None, :] < n_wins[:, None]            # (B, S) True = valid
    for l in range(L):
        qkv = x @ params["wqkv"][l].T + params["bqkv"][l]
        q = qkv[..., :D].reshape(B, S, nhead, hd)
        k = qkv[..., D:2 * D].reshape(B, S, nhead, hd)
        v = qkv[..., 2 * D:].reshape(B, S, nhead, hd)
        s = jnp.einsum("bqhd,bkhd->bhqk", q, k) / math.sqrt(hd)
        s = jnp.where(key_mask[:, None, None, :], s, -1e30)
        p = jax.nn.softmax(s, axis=-1)
        ctx = jnp.einsum("bhqk,bkhd->bqhd", p, v).reshape(B, S, D)
        attn = ctx @ params["wo"][l].T + params["bo"][l]
        x = _ln_ref(x + attn, params["g1"][l], params["beta1"][l])
        h = jnp.maximum(x @ params["w1"][l].T + params["b1"][l], 0.0)
        y = h @ params["w2"][l].T + params["b2"][l]
        x = _ln_ref(x + y, params["g2"][l], params["beta2"][l])
    return x


# ---------------------------------------------------------------------------
if __name__ == "__main__":
    # args: cnn_c_out_3=16, cnn_pool_3=(2, ...), td_sa_d_model=32, td_sa_nhead=4,
    #       td_sa_h=64, td_sa_num_layers=2, td_sa_dropout (identity at inference)
    B, S = 2, 8
    IN_FEAT = 16 * 2        # cnn_c_out_3 * cnn_pool_3[0]
    D_MODEL = 32
    NHEAD = 4
    FFN_H = 64
    NUM_LAYERS = 2

    root = jax.random.PRNGKey(0)
    k_src, k_par = jax.random.split(root)
    src = jax.random.normal(k_src, (B, S, IN_FEAT), jnp.float32)
    n_wins = jnp.array([S, 5], dtype=jnp.int32)     # valid window counts per batch

    params = make_params(k_par, in_feat=IN_FEAT, d_model=D_MODEL,
                         ffn_h=FFN_H, num_layers=NUM_LAYERS)

    out, n_out = self_attention_forward(src, n_wins, params, nhead=NHEAD)
    out = jax.block_until_ready(out)

    ref = reference_forward(src, n_wins, params, nhead=NHEAD)
    assert out.shape == (B, S, D_MODEL)
    assert jnp.allclose(out, ref, atol=5e-3, rtol=5e-3), "mismatch vs reference"

    # TODO(synk): dropout layers are no-ops here (eval-mode semantics); training-mode
    # stochastic dropout is not implemented.
    print("KERNEL_OK")
</pallas_src>

<mosaic_0001>
module attributes {stable_mosaic.version = 11 : i64} {
  func.func @_fused_kernel(%arg0: i32, %arg1: memref<2xi32, #tpu.memory_space<smem>>, %arg2: memref<1x8x32xf32, #tpu.memory_space<vmem>>, %arg3: memref<32x32xf32, #tpu.memory_space<vmem>>, %arg4: memref<1x32xf32, #tpu.memory_space<vmem>>, %arg5: memref<1x32xf32, #tpu.memory_space<vmem>>, %arg6: memref<1x32xf32, #tpu.memory_space<vmem>>, %arg7: memref<2x4x32x8xf32, #tpu.memory_space<vmem>>, %arg8: memref<2x4x32x8xf32, #tpu.memory_space<vmem>>, %arg9: memref<2x4x32x8xf32, #tpu.memory_space<vmem>>, %arg10: memref<2x4x1x8xf32, #tpu.memory_space<vmem>>, %arg11: memref<2x4x1x8xf32, #tpu.memory_space<vmem>>, %arg12: memref<2x4x1x8xf32, #tpu.memory_space<vmem>>, %arg13: memref<2x4x8x32xf32, #tpu.memory_space<vmem>>, %arg14: memref<2x1x32xf32, #tpu.memory_space<vmem>>, %arg15: memref<2x1x32xf32, #tpu.memory_space<vmem>>, %arg16: memref<2x1x32xf32, #tpu.memory_space<vmem>>, %arg17: memref<2x32x64xf32, #tpu.memory_space<vmem>>, %arg18: memref<2x1x64xf32, #tpu.memory_space<vmem>>, %arg19: memref<2x64x32xf32, #tpu.memory_space<vmem>>, %arg20: memref<2x1x32xf32, #tpu.memory_space<vmem>>, %arg21: memref<2x1x32xf32, #tpu.memory_space<vmem>>, %arg22: memref<2x1x32xf32, #tpu.memory_space<vmem>>, %arg23: memref<1x8x32xf32, #tpu.memory_space<vmem>>) attributes {dimension_semantics = [#tpu.dimension_semantics<parallel>], iteration_bounds = array<i64: 2>, scalar_prefetch = 1 : i64, scratch_operands = 0 : i64, tpu.core_type = #tpu.core_type<tc>, window_params = [{transform_indices = @transform_0, window_bounds = array<i64: 1, 8, 32>}, {pipeline_mode = #tpu.pipeline_mode<synchronous>, transform_indices = @transform_1, window_bounds = array<i64: 32, 32>}, {pipeline_mode = #tpu.pipeline_mode<synchronous>, transform_indices = @transform_2, window_bounds = array<i64: 1, 32>}, {pipeline_mode = #tpu.pipeline_mode<synchronous>, transform_indices = @transform_3, window_bounds = array<i64: 1, 32>}, {pipeline_mode = #tpu.pipeline_mode<synchronous>, transform_indices = @transform_4, window_bounds = array<i64: 1, 32>}, {pipeline_mode = #tpu.pipeline_mode<synchronous>, transform_indices = @transform_5, window_bounds = array<i64: 2, 4, 32, 8>}, {pipeline_mode = #tpu.pipeline_mode<synchronous>, transform_indices = @transform_6, window_bounds = array<i64: 2, 4, 32, 8>}, {pipeline_mode = #tpu.pipeline_mode<synchronous>, transform_indices = @transform_7, window_bounds = array<i64: 2, 4, 32, 8>}, {pipeline_mode = #tpu.pipeline_mode<synchronous>, transform_indices = @transform_8, window_bounds = array<i64: 2, 4, 1, 8>}, {pipeline_mode = #tpu.pipeline_mode<synchronous>, transform_indices = @transform_9, window_bounds = array<i64: 2, 4, 1, 8>}, {pipeline_mode = #tpu.pipeline_mode<synchronous>, transform_indices = @transform_10, window_bounds = array<i64: 2, 4, 1, 8>}, {pipeline_mode = #tpu.pipeline_mode<synchronous>, transform_indices = @transform_11, window_bounds = array<i64: 2, 4, 8, 32>}, {pipeline_mode = #tpu.pipeline_mode<synchronous>, transform_indices = @transform_12, window_bounds = array<i64: 2, 1, 32>}, {pipeline_mode = #tpu.pipeline_mode<synchronous>, transform_indices = @transform_13, window_bounds = array<i64: 2, 1, 32>}, {pipeline_mode = #tpu.pipeline_mode<synchronous>, transform_indices = @transform_14, window_bounds = array<i64: 2, 1, 32>}, {pipeline_mode = #tpu.pipeline_mode<synchronous>, transform_indices = @transform_15, window_bounds = array<i64: 2, 32, 64>}, {pipeline_mode = #tpu.pipeline_mode<synchronous>, transform_indices = @transform_16, window_bounds = array<i64: 2, 1, 64>}, {pipeline_mode = #tpu.pipeline_mode<synchronous>, transform_indices = @transform_17, window_bounds = array<i64: 2, 64, 32>}, {pipeline_mode = #tpu.pipeline_mode<synchronous>, transform_indices = @transform_18, window_bounds = array<i64: 2, 1, 32>}, {pipeline_mode = #tpu.pipeline_mode<synchronous>, transform_indices = @transform_19, window_bounds = array<i64: 2, 1, 32>}, {pipeline_mode = #tpu.pipeline_mode<synchronous>, transform_indices = @transform_20, window_bounds = array<i64: 2, 1, 32>}, {transform_indices = @transform_21, window_bounds = array<i64: 1, 8, 32>}]} {
    %c0 = arith.constant 0 : index
    %c0_0 = arith.constant 0 : index
    %c0_1 = arith.constant 0 : index
    %0 = vector.load %arg2[%c0, %c0_0, %c0_1] : memref<1x8x32xf32, #tpu.memory_space<vmem>>, vector<1x8x32xf32>
    %1 = vector.shape_cast %0 : vector<1x8x32xf32> to vector<8x32xf32>
    %c0_2 = arith.constant 0 : index
    %c0_3 = arith.constant 0 : index
    %2 = vector.load %arg3[%c0_2, %c0_3] : memref<32x32xf32, #tpu.memory_space<vmem>>, vector<32x32xf32>
    %cst = arith.constant dense<0.000000e+00> : vector<8x32xf32>
    %3 = tpu.matmul %1, %2, %cst {dimension_numbers = #tpu.dot_dimension_numbers<[1], [0], [0], [1], [0, 0, 1, 1], [], []>} : vector<8x32xf32>, vector<32x32xf32>, vector<8x32xf32> -> vector<8x32xf32>
    %c0_4 = arith.constant 0 : index
    %c0_5 = arith.constant 0 : index
    %4 = vector.load %arg4[%c0_4, %c0_5] : memref<1x32xf32, #tpu.memory_space<vmem>>, vector<1x32xf32>
    %5 = vector.broadcast %4 : vector<1x32xf32> to vector<8x32xf32>
    %6 = arith.addf %3, %5 : vector<8x32xf32>
    %c0_6 = arith.constant 0 : index
    %c0_7 = arith.constant 0 : index
    %7 = vector.load %arg5[%c0_6, %c0_7] : memref<1x32xf32, #tpu.memory_space<vmem>>, vector<1x32xf32>
    %c0_8 = arith.constant 0 : index
    %c0_9 = arith.constant 0 : index
    %8 = vector.load %arg6[%c0_8, %c0_9] : memref<1x32xf32, #tpu.memory_space<vmem>>, vector<1x32xf32>
    %cst_10 = arith.constant dense<0.000000e+00> : vector<8xf32>
    %9 = vector.multi_reduction <add>, %6, %cst_10 [1] : vector<8x32xf32> to vector<8xf32>
    %10 = vector.shape_cast %9 : vector<8xf32> to vector<8x1xf32>
    %cst_11 = arith.constant 3.200000e+01 : f32
    %11 = vector.broadcast %cst_11 : f32 to vector<8x1xf32>
    %12 = arith.divf %10, %11 : vector<8x1xf32>
    %13 = vector.broadcast %12 : vector<8x1xf32> to vector<8x32xf32>
    %14 = arith.subf %6, %13 : vector<8x32xf32>
    %15 = arith.mulf %14, %14 : vector<8x32xf32>
    %cst_12 = arith.constant dense<0.000000e+00> : vector<8xf32>
    %16 = vector.multi_reduction <add>, %15, %cst_12 [1] : vector<8x32xf32> to vector<8xf32>
    %17 = vector.shape_cast %16 : vector<8xf32> to vector<8x1xf32>
    %cst_13 = arith.constant 3.200000e+01 : f32
    %18 = vector.broadcast %cst_13 : f32 to vector<8x1xf32>
    %19 = arith.divf %17, %18 : vector<8x1xf32>
    %20 = vector.broadcast %12 : vector<8x1xf32> to vector<8x32xf32>
    %21 = arith.subf %6, %20 : vector<8x32xf32>
    %cst_14 = arith.constant 9.99999974E-6 : f32
    %22 = vector.broadcast %cst_14 : f32 to vector<8x1xf32>
    %23 = arith.addf %19, %22 : vector<8x1xf32>
    %24 = math.rsqrt %23 : vector<8x1xf32>
    %25 = vector.broadcast %24 : vector<8x1xf32> to vector<8x32xf32>
    %26 = arith.mulf %21, %25 : vector<8x32xf32>
    %27 = vector.broadcast %7 : vector<1x32xf32> to vector<8x32xf32>
    %28 = arith.mulf %26, %27 : vector<8x32xf32>
    %29 = vector.broadcast %8 : vector<1x32xf32> to vector<8x32xf32>
    %30 = arith.addf %28, %29 : vector<8x32xf32>
    %31 = tpu.iota {dimensions = array<i32: 2>} : vector<1x1x8xi32>
    %c1_i32 = arith.constant 1 : i32
    %32 = arith.muli %arg0, %c1_i32 : i32
    %c0_i32 = arith.constant 0 : i32
    %33 = arith.addi %32, %c0_i32 : i32
    %34 = arith.index_cast %33 : i32 to index
    %35 = memref.load %arg1[%34] : memref<2xi32, #tpu.memory_space<smem>>
    %36 = vector.broadcast %35 : i32 to vector<1x1x8xi32>
    %37 = arith.cmpi slt, %31, %36 : vector<1x1x8xi32>
    %38 = vector.shape_cast %30 : vector<8x32xf32> to vector<1x8x32xf32>
    %39 = vector.shape_cast %38 : vector<1x8x32xf32> to vector<1x8x32xf32>
    %40 = vector.broadcast %39 : vector<1x8x32xf32> to vector<4x8x32xf32>
    %c0_15 = arith.constant 0 : index
    %c0_16 = arith.constant 0 : index
    %c0_17 = arith.constant 0 : index
    %c0_18 = arith.constant 0 : index
    %41 = vector.load %arg7[%c0_15, %c0_16, %c0_17, %c0_18] : memref<2x4x32x8xf32, #tpu.memory_space<vmem>>, vector<1x4x32x8xf32>
    %42 = vector.shape_cast %41 : vector<1x4x32x8xf32> to vector<4x32x8xf32>
    "tpu.trace_start"() <{level = 10 : i32, message = "hmd,hdj->hmj"}> : () -> ()
    %cst_19 = arith.constant dense<0.000000e+00> : vector<4x8x8xf32>
    %43 = tpu.matmul %40, %42, %cst_19 {dimension_numbers = #tpu.dot_dimension_numbers<[2], [1], [1], [2], [0, 0, 0, 1, 1, 2], [0], [0]>} : vector<4x8x32xf32>, vector<4x32x8xf32>, vector<4x8x8xf32> -> vector<4x8x8xf32>
    "tpu.trace_stop"() : () -> ()
    %c0_20 = arith.constant 0 : index
    %c0_21 = arith.constant 0 : index
    %c0_22 = arith.constant 0 : index
    %c0_23 = arith.constant 0 : index
    %44 = vector.load %arg10[%c0_20, %c0_21, %c0_22, %c0_23] : memref<2x4x1x8xf32, #tpu.memory_space<vmem>>, vector<1x4x1x8xf32>
    %45 = vector.shape_cast %44 : vector<1x4x1x8xf32> to vector<4x1x8xf32>
    %46 = vector.broadcast %45 : vector<4x1x8xf32> to vector<4x8x8xf32>
    %47 = arith.addf %43, %46 : vector<4x8x8xf32>
    %c0_24 = arith.constant 0 : index
    %c0_25 = arith.constant 0 : index
    %c0_26 = arith.constant 0 : index
    %c0_27 = arith.constant 0 : index
    %48 = vector.load %arg8[%c0_24, %c0_25, %c0_26, %c0_27] : memref<2x4x32x8xf32, #tpu.memory_space<vmem>>, vector<1x4x32x8xf32>
    %49 = vector.shape_cast %48 : vector<1x4x32x8xf32> to vector<4x32x8xf32>
    "tpu.trace_start"() <{level = 10 : i32, message = "hmd,hdj->hmj"}> : () -> ()
    %cst_28 = arith.constant dense<0.000000e+00> : vector<4x8x8xf32>
    %50 = tpu.matmul %40, %49, %cst_28 {dimension_numbers = #tpu.dot_dimension_numbers<[2], [1], [1], [2], [0, 0, 0, 1, 1, 2], [0], [0]>} : vector<4x8x32xf32>, vector<4x32x8xf32>, vector<4x8x8xf32> -> vector<4x8x8xf32>
    "tpu.trace_stop"() : () -> ()
    %c0_29 = arith.constant 0 : index
    %c0_30 = arith.constant 0 : index
    %c0_31 = arith.constant 0 : index
    %c0_32 = arith.constant 0 : index
    %51 = vector.load %arg11[%c0_29, %c0_30, %c0_31, %c0_32] : memref<2x4x1x8xf32, #tpu.memory_space<vmem>>, vector<1x4x1x8xf32>
    %52 = vector.shape_cast %51 : vector<1x4x1x8xf32> to vector<4x1x8xf32>
    %53 = vector.broadcast %52 : vector<4x1x8xf32> to vector<4x8x8xf32>
    %54 = arith.addf %50, %53 : vector<4x8x8xf32>
    %c0_33 = arith.constant 0 : index
    %c0_34 = arith.constant 0 : index
    %c0_35 = arith.constant 0 : index
    %c0_36 = arith.constant 0 : index
    %55 = vector.load %arg9[%c0_33, %c0_34, %c0_35, %c0_36] : memref<2x4x32x8xf32, #tpu.memory_space<vmem>>, vector<1x4x32x8xf32>
    %56 = vector.shape_cast %55 : vector<1x4x32x8xf32> to vector<4x32x8xf32>
    "tpu.trace_start"() <{level = 10 : i32, message = "hmd,hdj->hmj"}> : () -> ()
    %cst_37 = arith.constant dense<0.000000e+00> : vector<4x8x8xf32>
    %57 = tpu.matmul %40, %56, %cst_37 {dimension_numbers = #tpu.dot_dimension_numbers<[2], [1], [1], [2], [0, 0, 0, 1, 1, 2], [0], [0]>} : vector<4x8x32xf32>, vector<4x32x8xf32>, vector<4x8x8xf32> -> vector<4x8x8xf32>
    "tpu.trace_stop"() : () -> ()
    %c0_38 = arith.constant 0 : index
    %c0_39 = arith.constant 0 : index
    %c0_40 = arith.constant 0 : index
    %c0_41 = arith.constant 0 : index
    %58 = vector.load %arg12[%c0_38, %c0_39, %c0_40, %c0_41] : memref<2x4x1x8xf32, #tpu.memory_space<vmem>>, vector<1x4x1x8xf32>
    %59 = vector.shape_cast %58 : vector<1x4x1x8xf32> to vector<4x1x8xf32>
    %60 = vector.broadcast %59 : vector<4x1x8xf32> to vector<4x8x8xf32>
    %61 = arith.addf %57, %60 : vector<4x8x8xf32>
    "tpu.trace_start"() <{level = 10 : i32, message = "nqj,nkj->nqk"}> : () -> ()
    %cst_42 = arith.constant dense<0.000000e+00> : vector<4x8x8xf32>
    %62 = tpu.matmul %47, %54, %cst_42 {dimension_numbers = #tpu.dot_dimension_numbers<[2], [2], [1], [1], [0, 0, 0, 1, 1, 1], [0], [0]>} : vector<4x8x8xf32>, vector<4x8x8xf32>, vector<4x8x8xf32> -> vector<4x8x8xf32>
    "tpu.trace_stop"() : () -> ()
    %63 = vector.shape_cast %62 : vector<4x8x8xf32> to vector<4x1x8x8xf32>
    %64 = vector.shape_cast %37 : vector<1x1x8xi1> to vector<1x1x1x8xi1>
    %cst_43 = arith.constant -1.000000e+30 : f32
    %65 = vector.shape_cast %64 : vector<1x1x1x8xi1> to vector<1x1x1x8xi1>
    %66 = vector.broadcast %65 : vector<1x1x1x8xi1> to vector<4x1x8x8xi1>
    %67 = vector.broadcast %cst_43 : f32 to vector<4x1x8x8xf32>
    %68 = arith.select %66, %63, %67 : vector<4x1x8x8xi1>, vector<4x1x8x8xf32>
    %cst_44 = arith.constant dense<0xFF800000> : vector<4x1x8xf32>
    %69 = vector.multi_reduction <maximumf>, %68, %cst_44 [3] : vector<4x1x8x8xf32> to vector<4x1x8xf32>
    %70 = vector.shape_cast %69 : vector<4x1x8xf32> to vector<4x1x8x1xf32>
    %71 = vector.broadcast %70 : vector<4x1x8x1xf32> to vector<4x1x8x8xf32>
    %72 = arith.subf %68, %71 : vector<4x1x8x8xf32>
    %73 = math.exp %72 : vector<4x1x8x8xf32>
    %cst_45 = arith.constant dense<0.000000e+00> : vector<4x1x8xf32>
    %74 = vector.multi_reduction <add>, %73, %cst_45 [3] : vector<4x1x8x8xf32> to vector<4x1x8xf32>
    %75 = vector.shape_cast %74 : vector<4x1x8xf32> to vector<4x1x8x1xf32>
    %76 = tpu.reciprocal %75 {approx = true} : vector<4x1x8x1xf32> -> vector<4x1x8x1xf32>
    %77 = vector.broadcast %76 : vector<4x1x8x1xf32> to vector<4x1x8x8xf32>
    %78 = arith.mulf %73, %77 : vector<4x1x8x8xf32>
    %79 = vector.shape_cast %78 : vector<4x1x8x8xf32> to vector<4x8x8xf32>
    "tpu.trace_start"() <{level = 10 : i32, message = "nqk,nkj->nqj"}> : () -> ()
    %cst_46 = arith.constant dense<0.000000e+00> : vector<4x8x8xf32>
    %80 = tpu.matmul %79, %61, %cst_46 {dimension_numbers = #tpu.dot_dimension_numbers<[2], [1], [1], [2], [0, 0, 0, 1, 1, 2], [0], [0]>} : vector<4x8x8xf32>, vector<4x8x8xf32>, vector<4x8x8xf32> -> vector<4x8x8xf32>
    "tpu.trace_stop"() : () -> ()
    %c0_47 = arith.constant 0 : index
    %c0_48 = arith.constant 0 : index
    %c0_49 = arith.constant 0 : index
    %c0_50 = arith.constant 0 : index
    %81 = vector.load %arg13[%c0_47, %c0_48, %c0_49, %c0_50] : memref<2x4x8x32xf32, #tpu.memory_space<vmem>>, vector<1x4x8x32xf32>
    %82 = vector.shape_cast %81 : vector<1x4x8x32xf32> to vector<4x8x32xf32>
    "tpu.trace_start"() <{level = 10 : i32, message = "hmj,hjd->hmd"}> : () -> ()
    %cst_51 = arith.constant dense<0.000000e+00> : vector<4x8x32xf32>
    %83 = tpu.matmul %80, %82, %cst_51 {dimension_numbers = #tpu.dot_dimension_numbers<[2], [1], [1], [2], [0, 0, 0, 1, 1, 2], [0], [0]>} : vector<4x8x8xf32>, vector<4x8x32xf32>, vector<4x8x32xf32> -> vector<4x8x32xf32>
    "tpu.trace_stop"() : () -> ()
    %cst_52 = arith.constant dense<0.000000e+00> : vector<8x32xf32>
    %84 = vector.multi_reduction <add>, %83, %cst_52 [0] : vector<4x8x32xf32> to vector<8x32xf32>
    %c0_53 = arith.constant 0 : index
    %c0_54 = arith.constant 0 : index
    %c0_55 = arith.constant 0 : index
    %85 = vector.load %arg14[%c0_53, %c0_54, %c0_55] : memref<2x1x32xf32, #tpu.memory_space<vmem>>, vector<1x1x32xf32>
    %86 = vector.shape_cast %85 : vector<1x1x32xf32> to vector<1x32xf32>
    %87 = vector.broadcast %86 : vector<1x32xf32> to vector<8x32xf32>
    %88 = arith.addf %84, %87 : vector<8x32xf32>
    %89 = arith.addf %30, %88 : vector<8x32xf32>
    %c0_56 = arith.constant 0 : index
    %c0_57 = arith.constant 0 : index
    %c0_58 = arith.constant 0 : index
    %90 = vector.load %arg15[%c0_56, %c0_57, %c0_58] : memref<2x1x32xf32, #tpu.memory_space<vmem>>, vector<1x1x32xf32>
    %91 = vector.shape_cast %90 : vector<1x1x32xf32> to vector<1x32xf32>
    %c0_59 = arith.constant 0 : index
    %c0_60 = arith.constant 0 : index
    %c0_61 = arith.constant 0 : index
    %92 = vector.load %arg16[%c0_59, %c0_60, %c0_61] : memref<2x1x32xf32, #tpu.memory_space<vmem>>, vector<1x1x32xf32>
    %93 = vector.shape_cast %92 : vector<1x1x32xf32> to vector<1x32xf32>
    %cst_62 = arith.constant dense<0.000000e+00> : vector<8xf32>
    %94 = vector.multi_reduction <add>, %89, %cst_62 [1] : vector<8x32xf32> to vector<8xf32>
    %95 = vector.shape_cast %94 : vector<8xf32> to vector<8x1xf32>
    %cst_63 = arith.constant 3.200000e+01 : f32
    %96 = vector.broadcast %cst_63 : f32 to vector<8x1xf32>
    %97 = arith.divf %95, %96 : vector<8x1xf32>
    %98 = vector.broadcast %97 : vector<8x1xf32> to vector<8x32xf32>
    %99 = arith.subf %89, %98 : vector<8x32xf32>
    %100 = arith.mulf %99, %99 : vector<8x32xf32>
    %cst_64 = arith.constant dense<0.000000e+00> : vector<8xf32>
    %101 = vector.multi_reduction <add>, %100, %cst_64 [1] : vector<8x32xf32> to vector<8xf32>
    %102 = vector.shape_cast %101 : vector<8xf32> to vector<8x1xf32>
    %cst_65 = arith.constant 3.200000e+01 : f32
    %103 = vector.broadcast %cst_65 : f32 to vector<8x1xf32>
    %104 = arith.divf %102, %103 : vector<8x1xf32>
    %105 = vector.broadcast %97 : vector<8x1xf32> to vector<8x32xf32>
    %106 = arith.subf %89, %105 : vector<8x32xf32>
    %cst_66 = arith.constant 9.99999974E-6 : f32
    %107 = vector.broadcast %cst_66 : f32 to vector<8x1xf32>
    %108 = arith.addf %104, %107 : vector<8x1xf32>
    %109 = math.rsqrt %108 : vector<8x1xf32>
    %110 = vector.broadcast %109 : vector<8x1xf32> to vector<8x32xf32>
    %111 = arith.mulf %106, %110 : vector<8x32xf32>
    %112 = vector.broadcast %91 : vector<1x32xf32> to vector<8x32xf32>
    %113 = arith.mulf %111, %112 : vector<8x32xf32>
    %114 = vector.broadcast %93 : vector<1x32xf32> to vector<8x32xf32>
    %115 = arith.addf %113, %114 : vector<8x32xf32>
    %c0_67 = arith.constant 0 : index
    %c0_68 = arith.constant 0 : index
    %c0_69 = arith.constant 0 : index
    %116 = vector.load %arg17[%c0_67, %c0_68, %c0_69] : memref<2x32x64xf32, #tpu.memory_space<vmem>>, vector<1x32x64xf32>
    %117 = vector.shape_cast %116 : vector<1x32x64xf32> to vector<32x64xf32>
    %cst_70 = arith.constant dense<0.000000e+00> : vector<8x64xf32>
    %118 = tpu.matmul %115, %117, %cst_70 {dimension_numbers = #tpu.dot_dimension_numbers<[1], [0], [0], [1], [0, 0, 1, 1], [], []>} : vector<8x32xf32>, vector<32x64xf32>, vector<8x64xf32> -> vector<8x64xf32>
    %c0_71 = arith.constant 0 : index
    %c0_72 = arith.constant 0 : index
    %c0_73 = arith.constant 0 : index
    %119 = vector.load %arg18[%c0_71, %c0_72, %c0_73] : memref<2x1x64xf32, #tpu.memory_space<vmem>>, vector<1x1x64xf32>
    %120 = vector.shape_cast %119 : vector<1x1x64xf32> to vector<1x64xf32>
    %121 = vector.broadcast %120 : vector<1x64xf32> to vector<8x64xf32>
    %122 = arith.addf %118, %121 : vector<8x64xf32>
    %cst_74 = arith.constant 0.000000e+00 : f32
    %123 = vector.broadcast %cst_74 : f32 to vector<8x64xf32>
    %124 = arith.maximumf %122, %123 : vector<8x64xf32>
    %c0_75 = arith.constant 0 : index
    %c0_76 = arith.constant 0 : index
    %c0_77 = arith.constant 0 : index
    %125 = vector.load %arg19[%c0_75, %c0_76, %c0_77] : memref<2x64x32xf32, #tpu.memory_space<vmem>>, vector<1x64x32xf32>
    %126 = vector.shape_cast %125 : vector<1x64x32xf32> to vector<64x32xf32>
    %cst_78 = arith.constant dense<0.000000e+00> : vector<8x32xf32>
    %127 = tpu.matmul %124, %126, %cst_78 {dimension_numbers = #tpu.dot_dimension_numbers<[1], [0], [0], [1], [0, 0, 1, 1], [], []>} : vector<8x64xf32>, vector<64x32xf32>, vector<8x32xf32> -> vector<8x32xf32>
    %c0_79 = arith.constant 0 : index
    %c0_80 = arith.constant 0 : index
    %c0_81 = arith.constant 0 : index
    %128 = vector.load %arg20[%c0_79, %c0_80, %c0_81] : memref<2x1x32xf32, #tpu.memory_space<vmem>>, vector<1x1x32xf32>
    %129 = vector.shape_cast %128 : vector<1x1x32xf32> to vector<1x32xf32>
    %130 = vector.broadcast %129 : vector<1x32xf32> to vector<8x32xf32>
    %131 = arith.addf %127, %130 : vector<8x32xf32>
    %132 = arith.addf %115, %131 : vector<8x32xf32>
    %c0_82 = arith.constant 0 : index
    %c0_83 = arith.constant 0 : index
    %c0_84 = arith.constant 0 : index
    %133 = vector.load %arg21[%c0_82, %c0_83, %c0_84] : memref<2x1x32xf32, #tpu.memory_space<vmem>>, vector<1x1x32xf32>
    %134 = vector.shape_cast %133 : vector<1x1x32xf32> to vector<1x32xf32>
    %c0_85 = arith.constant 0 : index
    %c0_86 = arith.constant 0 : index
    %c0_87 = arith.constant 0 : index
    %135 = vector.load %arg22[%c0_85, %c0_86, %c0_87] : memref<2x1x32xf32, #tpu.memory_space<vmem>>, vector<1x1x32xf32>
    %136 = vector.shape_cast %135 : vector<1x1x32xf32> to vector<1x32xf32>
    %cst_88 = arith.constant dense<0.000000e+00> : vector<8xf32>
    %137 = vector.multi_reduction <add>, %132, %cst_88 [1] : vector<8x32xf32> to vector<8xf32>
    %138 = vector.shape_cast %137 : vector<8xf32> to vector<8x1xf32>
    %cst_89 = arith.constant 3.200000e+01 : f32
    %139 = vector.broadcast %cst_89 : f32 to vector<8x1xf32>
    %140 = arith.divf %138, %139 : vector<8x1xf32>
    %141 = vector.broadcast %140 : vector<8x1xf32> to vector<8x32xf32>
    %142 = arith.subf %132, %141 : vector<8x32xf32>
    %143 = arith.mulf %142, %142 : vector<8x32xf32>
    %cst_90 = arith.constant dense<0.000000e+00> : vector<8xf32>
    %144 = vector.multi_reduction <add>, %143, %cst_90 [1] : vector<8x32xf32> to vector<8xf32>
    %145 = vector.shape_cast %144 : vector<8xf32> to vector<8x1xf32>
    %cst_91 = arith.constant 3.200000e+01 : f32
    %146 = vector.broadcast %cst_91 : f32 to vector<8x1xf32>
    %147 = arith.divf %145, %146 : vector<8x1xf32>
    %148 = vector.broadcast %140 : vector<8x1xf32> to vector<8x32xf32>
    %149 = arith.subf %132, %148 : vector<8x32xf32>
    %cst_92 = arith.constant 9.99999974E-6 : f32
    %150 = vector.broadcast %cst_92 : f32 to vector<8x1xf32>
    %151 = arith.addf %147, %150 : vector<8x1xf32>
    %152 = math.rsqrt %151 : vector<8x1xf32>
    %153 = vector.broadcast %152 : vector<8x1xf32> to vector<8x32xf32>
    %154 = arith.mulf %149, %153 : vector<8x32xf32>
    %155 = vector.broadcast %134 : vector<1x32xf32> to vector<8x32xf32>
    %156 = arith.mulf %154, %155 : vector<8x32xf32>
    %157 = vector.broadcast %136 : vector<1x32xf32> to vector<8x32xf32>
    %158 = arith.addf %156, %157 : vector<8x32xf32>
    %159 = vector.shape_cast %158 : vector<8x32xf32> to vector<1x8x32xf32>
    %160 = vector.shape_cast %159 : vector<1x8x32xf32> to vector<1x8x32xf32>
    %161 = vector.broadcast %160 : vector<1x8x32xf32> to vector<4x8x32xf32>
    %c1 = arith.constant 1 : index
    %c0_93 = arith.constant 0 : index
    %c0_94 = arith.constant 0 : index
    %c0_95 = arith.constant 0 : index
    %162 = vector.load %arg7[%c1, %c0_93, %c0_94, %c0_95] : memref<2x4x32x8xf32, #tpu.memory_space<vmem>>, vector<1x4x32x8xf32>
    %163 = vector.shape_cast %162 : vector<1x4x32x8xf32> to vector<4x32x8xf32>
    "tpu.trace_start"() <{level = 10 : i32, message = "hmd,hdj->hmj"}> : () -> ()
    %cst_96 = arith.constant dense<0.000000e+00> : vector<4x8x8xf32>
    %164 = tpu.matmul %161, %163, %cst_96 {dimension_numbers = #tpu.dot_dimension_numbers<[2], [1], [1], [2], [0, 0, 0, 1, 1, 2], [0], [0]>} : vector<4x8x32xf32>, vector<4x32x8xf32>, vector<4x8x8xf32> -> vector<4x8x8xf32>
    "tpu.trace_stop"() : () -> ()
    %c1_97 = arith.constant 1 : index
    %c0_98 = arith.constant 0 : index
    %c0_99 = arith.constant 0 : index
    %c0_100 = arith.constant 0 : index
    %165 = vector.load %arg10[%c1_97, %c0_98, %c0_99, %c0_100] : memref<2x4x1x8xf32, #tpu.memory_space<vmem>>, vector<1x4x1x8xf32>
    %166 = vector.shape_cast %165 : vector<1x4x1x8xf32> to vector<4x1x8xf32>
    %167 = vector.broadcast %166 : vector<4x1x8xf32> to vector<4x8x8xf32>
    %168 = arith.addf %164, %167 : vector<4x8x8xf32>
    %c1_101 = arith.constant 1 : index
    %c0_102 = arith.constant 0 : index
    %c0_103 = arith.constant 0 : index
    %c0_104 = arith.constant 0 : index
    %169 = vector.load %arg8[%c1_101, %c0_102, %c0_103, %c0_104] : memref<2x4x32x8xf32, #tpu.memory_space<vmem>>, vector<1x4x32x8xf32>
    %170 = vector.shape_cast %169 : vector<1x4x32x8xf32> to vector<4x32x8xf32>
    "tpu.trace_start"() <{level = 10 : i32, message = "hmd,hdj->hmj"}> : () -> ()
    %cst_105 = arith.constant dense<0.000000e+00> : vector<4x8x8xf32>
    %171 = tpu.matmul %161, %170, %cst_105 {dimension_numbers = #tpu.dot_dimension_numbers<[2], [1], [1], [2], [0, 0, 0, 1, 1, 2], [0], [0]>} : vector<4x8x32xf32>, vector<4x32x8xf32>, vector<4x8x8xf32> -> vector<4x8x8xf32>
    "tpu.trace_stop"() : () -> ()
    %c1_106 = arith.constant 1 : index
    %c0_107 = arith.constant 0 : index
    %c0_108 = arith.constant 0 : index
    %c0_109 = arith.constant 0 : index
    %172 = vector.load %arg11[%c1_106, %c0_107, %c0_108, %c0_109] : memref<2x4x1x8xf32, #tpu.memory_space<vmem>>, vector<1x4x1x8xf32>
    %173 = vector.shape_cast %172 : vector<1x4x1x8xf32> to vector<4x1x8xf32>
    %174 = vector.broadcast %173 : vector<4x1x8xf32> to vector<4x8x8xf32>
    %175 = arith.addf %171, %174 : vector<4x8x8xf32>
    %c1_110 = arith.constant 1 : index
    %c0_111 = arith.constant 0 : index
    %c0_112 = arith.constant 0 : index
    %c0_113 = arith.constant 0 : index
    %176 = vector.load %arg9[%c1_110, %c0_111, %c0_112, %c0_113] : memref<2x4x32x8xf32, #tpu.memory_space<vmem>>, vector<1x4x32x8xf32>
    %177 = vector.shape_cast %176 : vector<1x4x32x8xf32> to vector<4x32x8xf32>
    "tpu.trace_start"() <{level = 10 : i32, message = "hmd,hdj->hmj"}> : () -> ()
    %cst_114 = arith.constant dense<0.000000e+00> : vector<4x8x8xf32>
    %178 = tpu.matmul %161, %177, %cst_114 {dimension_numbers = #tpu.dot_dimension_numbers<[2], [1], [1], [2], [0, 0, 0, 1, 1, 2], [0], [0]>} : vector<4x8x32xf32>, vector<4x32x8xf32>, vector<4x8x8xf32> -> vector<4x8x8xf32>
    "tpu.trace_stop"() : () -> ()
    %c1_115 = arith.constant 1 : index
    %c0_116 = arith.constant 0 : index
    %c0_117 = arith.constant 0 : index
    %c0_118 = arith.constant 0 : index
    %179 = vector.load %arg12[%c1_115, %c0_116, %c0_117, %c0_118] : memref<2x4x1x8xf32, #tpu.memory_space<vmem>>, vector<1x4x1x8xf32>
    %180 = vector.shape_cast %179 : vector<1x4x1x8xf32> to vector<4x1x8xf32>
    %181 = vector.broadcast %180 : vector<4x1x8xf32> to vector<4x8x8xf32>
    %182 = arith.addf %178, %181 : vector<4x8x8xf32>
    "tpu.trace_start"() <{level = 10 : i32, message = "nqj,nkj->nqk"}> : () -> ()
    %cst_119 = arith.constant dense<0.000000e+00> : vector<4x8x8xf32>
    %183 = tpu.matmul %168, %175, %cst_119 {dimension_numbers = #tpu.dot_dimension_numbers<[2], [2], [1], [1], [0, 0, 0, 1, 1, 1], [0], [0]>} : vector<4x8x8xf32>, vector<4x8x8xf32>, vector<4x8x8xf32> -> vector<4x8x8xf32>
    "tpu.trace_stop"() : () -> ()
    %184 = vector.shape_cast %183 : vector<4x8x8xf32> to vector<4x1x8x8xf32>
    %185 = vector.shape_cast %37 : vector<1x1x8xi1> to vector<1x1x1x8xi1>
    %cst_120 = arith.constant -1.000000e+30 : f32
    %186 = vector.shape_cast %185 : vector<1x1x1x8xi1> to vector<1x1x1x8xi1>
    %187 = vector.broadcast %186 : vector<1x1x1x8xi1> to vector<4x1x8x8xi1>
    %188 = vector.broadcast %cst_120 : f32 to vector<4x1x8x8xf32>
    %189 = arith.select %187, %184, %188 : vector<4x1x8x8xi1>, vector<4x1x8x8xf32>
    %cst_121 = arith.constant dense<0xFF800000> : vector<4x1x8xf32>
    %190 = vector.multi_reduction <maximumf>, %189, %cst_121 [3] : vector<4x1x8x8xf32> to vector<4x1x8xf32>
    %191 = vector.shape_cast %190 : vector<4x1x8xf32> to vector<4x1x8x1xf32>
    %192 = vector.broadcast %191 : vector<4x1x8x1xf32> to vector<4x1x8x8xf32>
    %193 = arith.subf %189, %192 : vector<4x1x8x8xf32>
    %194 = math.exp %193 : vector<4x1x8x8xf32>
    %cst_122 = arith.constant dense<0.000000e+00> : vector<4x1x8xf32>
    %195 = vector.multi_reduction <add>, %194, %cst_122 [3] : vector<4x1x8x8xf32> to vector<4x1x8xf32>
    %196 = vector.shape_cast %195 : vector<4x1x8xf32> to vector<4x1x8x1xf32>
    %197 = tpu.reciprocal %196 {approx = true} : vector<4x1x8x1xf32> -> vector<4x1x8x1xf32>
    %198 = vector.broadcast %197 : vector<4x1x8x1xf32> to vector<4x1x8x8xf32>
    %199 = arith.mulf %194, %198 : vector<4x1x8x8xf32>
    %200 = vector.shape_cast %199 : vector<4x1x8x8xf32> to vector<4x8x8xf32>
    "tpu.trace_start"() <{level = 10 : i32, message = "nqk,nkj->nqj"}> : () -> ()
    %cst_123 = arith.constant dense<0.000000e+00> : vector<4x8x8xf32>
    %201 = tpu.matmul %200, %182, %cst_123 {dimension_numbers = #tpu.dot_dimension_numbers<[2], [1], [1], [2], [0, 0, 0, 1, 1, 2], [0], [0]>} : vector<4x8x8xf32>, vector<4x8x8xf32>, vector<4x8x8xf32> -> vector<4x8x8xf32>
    "tpu.trace_stop"() : () -> ()
    %c1_124 = arith.constant 1 : index
    %c0_125 = arith.constant 0 : index
    %c0_126 = arith.constant 0 : index
    %c0_127 = arith.constant 0 : index
    %202 = vector.load %arg13[%c1_124, %c0_125, %c0_126, %c0_127] : memref<2x4x8x32xf32, #tpu.memory_space<vmem>>, vector<1x4x8x32xf32>
    %203 = vector.shape_cast %202 : vector<1x4x8x32xf32> to vector<4x8x32xf32>
    "tpu.trace_start"() <{level = 10 : i32, message = "hmj,hjd->hmd"}> : () -> ()
    %cst_128 = arith.constant dense<0.000000e+00> : vector<4x8x32xf32>
    %204 = tpu.matmul %201, %203, %cst_128 {dimension_numbers = #tpu.dot_dimension_numbers<[2], [1], [1], [2], [0, 0, 0, 1, 1, 2], [0], [0]>} : vector<4x8x8xf32>, vector<4x8x32xf32>, vector<4x8x32xf32> -> vector<4x8x32xf32>
    "tpu.trace_stop"() : () -> ()
    %cst_129 = arith.constant dense<0.000000e+00> : vector<8x32xf32>
    %205 = vector.multi_reduction <add>, %204, %cst_129 [0] : vector<4x8x32xf32> to vector<8x32xf32>
    %c1_130 = arith.constant 1 : index
    %c0_131 = arith.constant 0 : index
    %c0_132 = arith.constant 0 : index
    %206 = vector.load %arg14[%c1_130, %c0_131, %c0_132] : memref<2x1x32xf32, #tpu.memory_space<vmem>>, vector<1x1x32xf32>
    %207 = vector.shape_cast %206 : vector<1x1x32xf32> to vector<1x32xf32>
    %208 = vector.broadcast %207 : vector<1x32xf32> to vector<8x32xf32>
    %209 = arith.addf %205, %208 : vector<8x32xf32>
    %210 = arith.addf %158, %209 : vector<8x32xf32>
    %c1_133 = arith.constant 1 : index
    %c0_134 = arith.constant 0 : index
    %c0_135 = arith.constant 0 : index
    %211 = vector.load %arg15[%c1_133, %c0_134, %c0_135] : memref<2x1x32xf32, #tpu.memory_space<vmem>>, vector<1x1x32xf32>
    %212 = vector.shape_cast %211 : vector<1x1x32xf32> to vector<1x32xf32>
    %c1_136 = arith.constant 1 : index
    %c0_137 = arith.constant 0 : index
    %c0_138 = arith.constant 0 : index
    %213 = vector.load %arg16[%c1_136, %c0_137, %c0_138] : memref<2x1x32xf32, #tpu.memory_space<vmem>>, vector<1x1x32xf32>
    %214 = vector.shape_cast %213 : vector<1x1x32xf32> to vector<1x32xf32>
    %cst_139 = arith.constant dense<0.000000e+00> : vector<8xf32>
    %215 = vector.multi_reduction <add>, %210, %cst_139 [1] : vector<8x32xf32> to vector<8xf32>
    %216 = vector.shape_cast %215 : vector<8xf32> to vector<8x1xf32>
    %cst_140 = arith.constant 3.200000e+01 : f32
    %217 = vector.broadcast %cst_140 : f32 to vector<8x1xf32>
    %218 = arith.divf %216, %217 : vector<8x1xf32>
    %219 = vector.broadcast %218 : vector<8x1xf32> to vector<8x32xf32>
    %220 = arith.subf %210, %219 : vector<8x32xf32>
    %221 = arith.mulf %220, %220 : vector<8x32xf32>
    %cst_141 = arith.constant dense<0.000000e+00> : vector<8xf32>
    %222 = vector.multi_reduction <add>, %221, %cst_141 [1] : vector<8x32xf32> to vector<8xf32>
    %223 = vector.shape_cast %222 : vector<8xf32> to vector<8x1xf32>
    %cst_142 = arith.constant 3.200000e+01 : f32
    %224 = vector.broadcast %cst_142 : f32 to vector<8x1xf32>
    %225 = arith.divf %223, %224 : vector<8x1xf32>
    %226 = vector.broadcast %218 : vector<8x1xf32> to vector<8x32xf32>
    %227 = arith.subf %210, %226 : vector<8x32xf32>
    %cst_143 = arith.constant 9.99999974E-6 : f32
    %228 = vector.broadcast %cst_143 : f32 to vector<8x1xf32>
    %229 = arith.addf %225, %228 : vector<8x1xf32>
    %230 = math.rsqrt %229 : vector<8x1xf32>
    %231 = vector.broadcast %230 : vector<8x1xf32> to vector<8x32xf32>
    %232 = arith.mulf %227, %231 : vector<8x32xf32>
    %233 = vector.broadcast %212 : vector<1x32xf32> to vector<8x32xf32>
    %234 = arith.mulf %232, %233 : vector<8x32xf32>
    %235 = vector.broadcast %214 : vector<1x32xf32> to vector<8x32xf32>
    %236 = arith.addf %234, %235 : vector<8x32xf32>
    %c1_144 = arith.constant 1 : index
    %c0_145 = arith.constant 0 : index
    %c0_146 = arith.constant 0 : index
    %237 = vector.load %arg17[%c1_144, %c0_145, %c0_146] : memref<2x32x64xf32, #tpu.memory_space<vmem>>, vector<1x32x64xf32>
    %238 = vector.shape_cast %237 : vector<1x32x64xf32> to vector<32x64xf32>
    %cst_147 = arith.constant dense<0.000000e+00> : vector<8x64xf32>
    %239 = tpu.matmul %236, %238, %cst_147 {dimension_numbers = #tpu.dot_dimension_numbers<[1], [0], [0], [1], [0, 0, 1, 1], [], []>} : vector<8x32xf32>, vector<32x64xf32>, vector<8x64xf32> -> vector<8x64xf32>
    %c1_148 = arith.constant 1 : index
    %c0_149 = arith.constant 0 : index
    %c0_150 = arith.constant 0 : index
    %240 = vector.load %arg18[%c1_148, %c0_149, %c0_150] : memref<2x1x64xf32, #tpu.memory_space<vmem>>, vector<1x1x64xf32>
    %241 = vector.shape_cast %240 : vector<1x1x64xf32> to vector<1x64xf32>
    %242 = vector.broadcast %241 : vector<1x64xf32> to vector<8x64xf32>
    %243 = arith.addf %239, %242 : vector<8x64xf32>
    %cst_151 = arith.constant 0.000000e+00 : f32
    %244 = vector.broadcast %cst_151 : f32 to vector<8x64xf32>
    %245 = arith.maximumf %243, %244 : vector<8x64xf32>
    %c1_152 = arith.constant 1 : index
    %c0_153 = arith.constant 0 : index
    %c0_154 = arith.constant 0 : index
    %246 = vector.load %arg19[%c1_152, %c0_153, %c0_154] : memref<2x64x32xf32, #tpu.memory_space<vmem>>, vector<1x64x32xf32>
    %247 = vector.shape_cast %246 : vector<1x64x32xf32> to vector<64x32xf32>
    %cst_155 = arith.constant dense<0.000000e+00> : vector<8x32xf32>
    %248 = tpu.matmul %245, %247, %cst_155 {dimension_numbers = #tpu.dot_dimension_numbers<[1], [0], [0], [1], [0, 0, 1, 1], [], []>} : vector<8x64xf32>, vector<64x32xf32>, vector<8x32xf32> -> vector<8x32xf32>
    %c1_156 = arith.constant 1 : index
    %c0_157 = arith.constant 0 : index
    %c0_158 = arith.constant 0 : index
    %249 = vector.load %arg20[%c1_156, %c0_157, %c0_158] : memref<2x1x32xf32, #tpu.memory_space<vmem>>, vector<1x1x32xf32>
    %250 = vector.shape_cast %249 : vector<1x1x32xf32> to vector<1x32xf32>
    %251 = vector.broadcast %250 : vector<1x32xf32> to vector<8x32xf32>
    %252 = arith.addf %248, %251 : vector<8x32xf32>
    %253 = arith.addf %236, %252 : vector<8x32xf32>
    %c1_159 = arith.constant 1 : index
    %c0_160 = arith.constant 0 : index
    %c0_161 = arith.constant 0 : index
    %254 = vector.load %arg21[%c1_159, %c0_160, %c0_161] : memref<2x1x32xf32, #tpu.memory_space<vmem>>, vector<1x1x32xf32>
    %255 = vector.shape_cast %254 : vector<1x1x32xf32> to vector<1x32xf32>
    %c1_162 = arith.constant 1 : index
    %c0_163 = arith.constant 0 : index
    %c0_164 = arith.constant 0 : index
    %256 = vector.load %arg22[%c1_162, %c0_163, %c0_164] : memref<2x1x32xf32, #tpu.memory_space<vmem>>, vector<1x1x32xf32>
    %257 = vector.shape_cast %256 : vector<1x1x32xf32> to vector<1x32xf32>
    %cst_165 = arith.constant dense<0.000000e+00> : vector<8xf32>
    %258 = vector.multi_reduction <add>, %253, %cst_165 [1] : vector<8x32xf32> to vector<8xf32>
    %259 = vector.shape_cast %258 : vector<8xf32> to vector<8x1xf32>
    %cst_166 = arith.constant 3.200000e+01 : f32
    %260 = vector.broadcast %cst_166 : f32 to vector<8x1xf32>
    %261 = arith.divf %259, %260 : vector<8x1xf32>
    %262 = vector.broadcast %261 : vector<8x1xf32> to vector<8x32xf32>
    %263 = arith.subf %253, %262 : vector<8x32xf32>
    %264 = arith.mulf %263, %263 : vector<8x32xf32>
    %cst_167 = arith.constant dense<0.000000e+00> : vector<8xf32>
    %265 = vector.multi_reduction <add>, %264, %cst_167 [1] : vector<8x32xf32> to vector<8xf32>
    %266 = vector.shape_cast %265 : vector<8xf32> to vector<8x1xf32>
    %cst_168 = arith.constant 3.200000e+01 : f32
    %267 = vector.broadcast %cst_168 : f32 to vector<8x1xf32>
    %268 = arith.divf %266, %267 : vector<8x1xf32>
    %269 = vector.broadcast %261 : vector<8x1xf32> to vector<8x32xf32>
    %270 = arith.subf %253, %269 : vector<8x32xf32>
    %cst_169 = arith.constant 9.99999974E-6 : f32
    %271 = vector.broadcast %cst_169 : f32 to vector<8x1xf32>
    %272 = arith.addf %268, %271 : vector<8x1xf32>
    %273 = math.rsqrt %272 : vector<8x1xf32>
    %274 = vector.broadcast %273 : vector<8x1xf32> to vector<8x32xf32>
    %275 = arith.mulf %270, %274 : vector<8x32xf32>
    %276 = vector.broadcast %255 : vector<1x32xf32> to vector<8x32xf32>
    %277 = arith.mulf %275, %276 : vector<8x32xf32>
    %278 = vector.broadcast %257 : vector<1x32xf32> to vector<8x32xf32>
    %279 = arith.addf %277, %278 : vector<8x32xf32>
    %280 = vector.shape_cast %279 : vector<8x32xf32> to vector<1x8x32xf32>
    %c0_170 = arith.constant 0 : index
    %c0_171 = arith.constant 0 : index
    %c0_172 = arith.constant 0 : index
    %281 = vector.load %arg23[%c0_170, %c0_171, %c0_172] : memref<1x8x32xf32, #tpu.memory_space<vmem>>, vector<1x8x32xf32>
    tpu.vector_store %arg23[%c0_170, %c0_171, %c0_172], %280 {strides = array<i32>} : memref<1x8x32xf32, #tpu.memory_space<vmem>>, vector<1x8x32xf32>,
    return
  }
  func.func @transform_0(%arg0: i32, %arg1: memref<2xi32, #tpu.memory_space<smem>>) -> (i32, i32, i32) {
    %c0_i32 = arith.constant 0 : i32
    %c0_i32_0 = arith.constant 0 : i32
    %c0_i32_1 = arith.constant 0 : i32
    return %arg0, %c0_i32, %c0_i32_0 : i32, i32, i32
  }
  func.func @transform_1(%arg0: i32, %arg1: memref<2xi32, #tpu.memory_space<smem>>) -> (i32, i32) {
    %c0_i32 = arith.constant 0 : i32
    %c0_i32_0 = arith.constant 0 : i32
    %c0_i32_1 = arith.constant 0 : i32
    return %c0_i32, %c0_i32_0 : i32, i32
  }
  func.func @transform_2(%arg0: i32, %arg1: memref<2xi32, #tpu.memory_space<smem>>) -> (i32, i32) {
    %c0_i32 = arith.constant 0 : i32
    %c0_i32_0 = arith.constant 0 : i32
    %c0_i32_1 = arith.constant 0 : i32
    return %c0_i32, %c0_i32_0 : i32, i32
  }
  func.func @transform_3(%arg0: i32, %arg1: memref<2xi32, #tpu.memory_space<smem>>) -> (i32, i32) {
    %c0_i32 = arith.constant 0 : i32
    %c0_i32_0 = arith.constant 0 : i32
    %c0_i32_1 = arith.constant 0 : i32
    return %c0_i32, %c0_i32_0 : i32, i32
  }
  func.func @transform_4(%arg0: i32, %arg1: memref<2xi32, #tpu.memory_space<smem>>) -> (i32, i32) {
    %c0_i32 = arith.constant 0 : i32
    %c0_i32_0 = arith.constant 0 : i32
    %c0_i32_1 = arith.constant 0 : i32
    return %c0_i32, %c0_i32_0 : i32, i32
  }
  func.func @transform_5(%arg0: i32, %arg1: memref<2xi32, #tpu.memory_space<smem>>) -> (i32, i32, i32, i32) {
    %c0_i32 = arith.constant 0 : i32
    %c0_i32_0 = arith.constant 0 : i32
    %c0_i32_1 = arith.constant 0 : i32
    %c0_i32_2 = arith.constant 0 : i32
    %c0_i32_3 = arith.constant 0 : i32
    return %c0_i32, %c0_i32_0, %c0_i32_1, %c0_i32_2 : i32, i32, i32, i32
  }
  func.func @transform_6(%arg0: i32, %arg1: memref<2xi32, #tpu.memory_space<smem>>) -> (i32, i32, i32, i32) {
    %c0_i32 = arith.constant 0 : i32
    %c0_i32_0 = arith.constant 0 : i32
    %c0_i32_1 = arith.constant 0 : i32
    %c0_i32_2 = arith.constant 0 : i32
    %c0_i32_3 = arith.constant 0 : i32
    return %c0_i32, %c0_i32_0, %c0_i32_1, %c0_i32_2 : i32, i32, i32, i32
  }
  func.func @transform_7(%arg0: i32, %arg1: memref<2xi32, #tpu.memory_space<smem>>) -> (i32, i32, i32, i32) {
    %c0_i32 = arith.constant 0 : i32
    %c0_i32_0 = arith.constant 0 : i32
    %c0_i32_1 = arith.constant 0 : i32
    %c0_i32_2 = arith.constant 0 : i32
    %c0_i32_3 = arith.constant 0 : i32
    return %c0_i32, %c0_i32_0, %c0_i32_1, %c0_i32_2 : i32, i32, i32, i32
  }
  func.func @transform_8(%arg0: i32, %arg1: memref<2xi32, #tpu.memory_space<smem>>) -> (i32, i32, i32, i32) {
    %c0_i32 = arith.constant 0 : i32
    %c0_i32_0 = arith.constant 0 : i32
    %c0_i32_1 = arith.constant 0 : i32
    %c0_i32_2 = arith.constant 0 : i32
    %c0_i32_3 = arith.constant 0 : i32
    return %c0_i32, %c0_i32_0, %c0_i32_1, %c0_i32_2 : i32, i32, i32, i32
  }
  func.func @transform_9(%arg0: i32, %arg1: memref<2xi32, #tpu.memory_space<smem>>) -> (i32, i32, i32, i32) {
    %c0_i32 = arith.constant 0 : i32
    %c0_i32_0 = arith.constant 0 : i32
    %c0_i32_1 = arith.constant 0 : i32
    %c0_i32_2 = arith.constant 0 : i32
    %c0_i32_3 = arith.constant 0 : i32
    return %c0_i32, %c0_i32_0, %c0_i32_1, %c0_i32_2 : i32, i32, i32, i32
  }
  func.func @transform_10(%arg0: i32, %arg1: memref<2xi32, #tpu.memory_space<smem>>) -> (i32, i32, i32, i32) {
    %c0_i32 = arith.constant 0 : i32
    %c0_i32_0 = arith.constant 0 : i32
    %c0_i32_1 = arith.constant 0 : i32
    %c0_i32_2 = arith.constant 0 : i32
    %c0_i32_3 = arith.constant 0 : i32
    return %c0_i32, %c0_i32_0, %c0_i32_1, %c0_i32_2 : i32, i32, i32, i32
  }
  func.func @transform_11(%arg0: i32, %arg1: memref<2xi32, #tpu.memory_space<smem>>) -> (i32, i32, i32, i32) {
    %c0_i32 = arith.constant 0 : i32
    %c0_i32_0 = arith.constant 0 : i32
    %c0_i32_1 = arith.constant 0 : i32
    %c0_i32_2 = arith.constant 0 : i32
    %c0_i32_3 = arith.constant 0 : i32
    return %c0_i32, %c0_i32_0, %c0_i32_1, %c0_i32_2 : i32, i32, i32, i32
  }
  func.func @transform_12(%arg0: i32, %arg1: memref<2xi32, #tpu.memory_space<smem>>) -> (i32, i32, i32) {
    %c0_i32 = arith.constant 0 : i32
    %c0_i32_0 = arith.constant 0 : i32
    %c0_i32_1 = arith.constant 0 : i32
    %c0_i32_2 = arith.constant 0 : i32
    return %c0_i32, %c0_i32_0, %c0_i32_1 : i32, i32, i32
  }
  func.func @transform_13(%arg0: i32, %arg1: memref<2xi32, #tpu.memory_space<smem>>) -> (i32, i32, i32) {
    %c0_i32 = arith.constant 0 : i32
    %c0_i32_0 = arith.constant 0 : i32
    %c0_i32_1 = arith.constant 0 : i32
    %c0_i32_2 = arith.constant 0 : i32
    return %c0_i32, %c0_i32_0, %c0_i32_1 : i32, i32, i32
  }
  func.func @transform_14(%arg0: i32, %arg1: memref<2xi32, #tpu.memory_space<smem>>) -> (i32, i32, i32) {
    %c0_i32 = arith.constant 0 : i32
    %c0_i32_0 = arith.constant 0 : i32
    %c0_i32_1 = arith.constant 0 : i32
    %c0_i32_2 = arith.constant 0 : i32
    return %c0_i32, %c0_i32_0, %c0_i32_1 : i32, i32, i32
  }
  func.func @transform_15(%arg0: i32, %arg1: memref<2xi32, #tpu.memory_space<smem>>) -> (i32, i32, i32) {
    %c0_i32 = arith.constant 0 : i32
    %c0_i32_0 = arith.constant 0 : i32
    %c0_i32_1 = arith.constant 0 : i32
    %c0_i32_2 = arith.constant 0 : i32
    return %c0_i32, %c0_i32_0, %c0_i32_1 : i32, i32, i32
  }
  func.func @transform_16(%arg0: i32, %arg1: memref<2xi32, #tpu.memory_space<smem>>) -> (i32, i32, i32) {
    %c0_i32 = arith.constant 0 : i32
    %c0_i32_0 = arith.constant 0 : i32
    %c0_i32_1 = arith.constant 0 : i32
    %c0_i32_2 = arith.constant 0 : i32
    return %c0_i32, %c0_i32_0, %c0_i32_1 : i32, i32, i32
  }
  func.func @transform_17(%arg0: i32, %arg1: memref<2xi32, #tpu.memory_space<smem>>) -> (i32, i32, i32) {
    %c0_i32 = arith.constant 0 : i32
    %c0_i32_0 = arith.constant 0 : i32
    %c0_i32_1 = arith.constant 0 : i32
    %c0_i32_2 = arith.constant 0 : i32
    return %c0_i32, %c0_i32_0, %c0_i32_1 : i32, i32, i32
  }
  func.func @transform_18(%arg0: i32, %arg1: memref<2xi32, #tpu.memory_space<smem>>) -> (i32, i32, i32) {
    %c0_i32 = arith.constant 0 : i32
    %c0_i32_0 = arith.constant 0 : i32
    %c0_i32_1 = arith.constant 0 : i32
    %c0_i32_2 = arith.constant 0 : i32
    return %c0_i32, %c0_i32_0, %c0_i32_1 : i32, i32, i32
  }
  func.func @transform_19(%arg0: i32, %arg1: memref<2xi32, #tpu.memory_space<smem>>) -> (i32, i32, i32) {
    %c0_i32 = arith.constant 0 : i32
    %c0_i32_0 = arith.constant 0 : i32
    %c0_i32_1 = arith.constant 0 : i32
    %c0_i32_2 = arith.constant 0 : i32
    return %c0_i32, %c0_i32_0, %c0_i32_1 : i32, i32, i32
  }
  func.func @transform_20(%arg0: i32, %arg1: memref<2xi32, #tpu.memory_space<smem>>) -> (i32, i32, i32) {
    %c0_i32 = arith.constant 0 : i32
    %c0_i32_0 = arith.constant 0 : i32
    %c0_i32_1 = arith.constant 0 : i32
    %c0_i32_2 = arith.constant 0 : i32
    return %c0_i32, %c0_i32_0, %c0_i32_1 : i32, i32, i32
  }
  func.func @transform_21(%arg0: i32, %arg1: memref<2xi32, #tpu.memory_space<smem>>) -> (i32, i32, i32) {
    %c0_i32 = arith.constant 0 : i32
    %c0_i32_0 = arith.constant 0 : i32
    %c0_i32_1 = arith.constant 0 : i32
    return %arg0, %c0_i32, %c0_i32_0 : i32, i32, i32
  }
}

module attributes {stable_mosaic.version = 11 : i64} {
  func.func @_fused_kernel(%arg0: i32, %arg1: memref<2xi32, #tpu.memory_space<smem>>, %arg2: memref<1x8x32xf32, #tpu.memory_space<vmem>>, %arg3: memref<32x32xf32, #tpu.memory_space<vmem>>, %arg4: memref<1x32xf32, #tpu.memory_space<vmem>>, %arg5: memref<1x32xf32, #tpu.memory_space<vmem>>, %arg6: memref<1x32xf32, #tpu.memory_space<vmem>>, %arg7: memref<2x4x32x8xf32, #tpu.memory_space<vmem>>, %arg8: memref<2x4x32x8xf32, #tpu.memory_space<vmem>>, %arg9: memref<2x4x32x8xf32, #tpu.memory_space<vmem>>, %arg10: memref<2x4x1x8xf32, #tpu.memory_space<vmem>>, %arg11: memref<2x4x1x8xf32, #tpu.memory_space<vmem>>, %arg12: memref<2x4x1x8xf32, #tpu.memory_space<vmem>>, %arg13: memref<2x4x8x32xf32, #tpu.memory_space<vmem>>, %arg14: memref<2x1x32xf32, #tpu.memory_space<vmem>>, %arg15: memref<2x1x32xf32, #tpu.memory_space<vmem>>, %arg16: memref<2x1x32xf32, #tpu.memory_space<vmem>>, %arg17: memref<2x32x64xf32, #tpu.memory_space<vmem>>, %arg18: memref<2x1x64xf32, #tpu.memory_space<vmem>>, %arg19: memref<2x64x32xf32, #tpu.memory_space<vmem>>, %arg20: memref<2x1x32xf32, #tpu.memory_space<vmem>>, %arg21: memref<2x1x32xf32, #tpu.memory_space<vmem>>, %arg22: memref<2x1x32xf32, #tpu.memory_space<vmem>>, %arg23: memref<1x8x32xf32, #tpu.memory_space<vmem>>) attributes {dimension_semantics = [#tpu.dimension_semantics<parallel>], iteration_bounds = array<i64: 2>, scalar_prefetch = 1 : i64, scratch_operands = 0 : i64, tpu.core_type = #tpu.core_type<tc>, window_params = [{transform_indices = @transform_0, window_bounds = array<i64: 1, 8, 32>}, {pipeline_mode = #tpu.pipeline_mode<synchronous>, transform_indices = @transform_1, window_bounds = array<i64: 32, 32>}, {pipeline_mode = #tpu.pipeline_mode<synchronous>, transform_indices = @transform_2, window_bounds = array<i64: 1, 32>}, {pipeline_mode = #tpu.pipeline_mode<synchronous>, transform_indices = @transform_3, window_bounds = array<i64: 1, 32>}, {pipeline_mode = #tpu.pipeline_mode<synchronous>, transform_indices = @transform_4, window_bounds = array<i64: 1, 32>}, {pipeline_mode = #tpu.pipeline_mode<synchronous>, transform_indices = @transform_5, window_bounds = array<i64: 2, 4, 32, 8>}, {pipeline_mode = #tpu.pipeline_mode<synchronous>, transform_indices = @transform_6, window_bounds = array<i64: 2, 4, 32, 8>}, {pipeline_mode = #tpu.pipeline_mode<synchronous>, transform_indices = @transform_7, window_bounds = array<i64: 2, 4, 32, 8>}, {pipeline_mode = #tpu.pipeline_mode<synchronous>, transform_indices = @transform_8, window_bounds = array<i64: 2, 4, 1, 8>}, {pipeline_mode = #tpu.pipeline_mode<synchronous>, transform_indices = @transform_9, window_bounds = array<i64: 2, 4, 1, 8>}, {pipeline_mode = #tpu.pipeline_mode<synchronous>, transform_indices = @transform_10, window_bounds = array<i64: 2, 4, 1, 8>}, {pipeline_mode = #tpu.pipeline_mode<synchronous>, transform_indices = @transform_11, window_bounds = array<i64: 2, 4, 8, 32>}, {pipeline_mode = #tpu.pipeline_mode<synchronous>, transform_indices = @transform_12, window_bounds = array<i64: 2, 1, 32>}, {pipeline_mode = #tpu.pipeline_mode<synchronous>, transform_indices = @transform_13, window_bounds = array<i64: 2, 1, 32>}, {pipeline_mode = #tpu.pipeline_mode<synchronous>, transform_indices = @transform_14, window_bounds = array<i64: 2, 1, 32>}, {pipeline_mode = #tpu.pipeline_mode<synchronous>, transform_indices = @transform_15, window_bounds = array<i64: 2, 32, 64>}, {pipeline_mode = #tpu.pipeline_mode<synchronous>, transform_indices = @transform_16, window_bounds = array<i64: 2, 1, 64>}, {pipeline_mode = #tpu.pipeline_mode<synchronous>, transform_indices = @transform_17, window_bounds = array<i64: 2, 64, 32>}, {pipeline_mode = #tpu.pipeline_mode<synchronous>, transform_indices = @transform_18, window_bounds = array<i64: 2, 1, 32>}, {pipeline_mode = #tpu.pipeline_mode<synchronous>, transform_indices = @transform_19, window_bounds = array<i64: 2, 1, 32>}, {pipeline_mode = #tpu.pipeline_mode<synchronous>, transform_indices = @transform_20, window_bounds = array<i64: 2, 1, 32>}, {transform_indices = @transform_21, window_bounds = array<i64: 1, 8, 32>}]} {
    %c0 = arith.constant 0 : index
    %c0_0 = arith.constant 0 : index
    %c0_1 = arith.constant 0 : index
    %0 = vector.load %arg2[%c0, %c0_0, %c0_1] : memref<1x8x32xf32, #tpu.memory_space<vmem>>, vector<1x8x32xf32>
    %1 = vector.shape_cast %0 : vector<1x8x32xf32> to vector<8x32xf32>
    %c0_2 = arith.constant 0 : index
    %c0_3 = arith.constant 0 : index
    %2 = vector.load %arg3[%c0_2, %c0_3] : memref<32x32xf32, #tpu.memory_space<vmem>>, vector<32x32xf32>
    %cst = arith.constant dense<0.000000e+00> : vector<8x32xf32>
    %3 = tpu.matmul %1, %2, %cst {dimension_numbers = #tpu.dot_dimension_numbers<[1], [0], [0], [1], [0, 0, 1, 1], [], []>} : vector<8x32xf32>, vector<32x32xf32>, vector<8x32xf32> -> vector<8x32xf32>
    %c0_4 = arith.constant 0 : index
    %c0_5 = arith.constant 0 : index
    %4 = vector.load %arg4[%c0_4, %c0_5] : memref<1x32xf32, #tpu.memory_space<vmem>>, vector<1x32xf32>
    %5 = vector.broadcast %4 : vector<1x32xf32> to vector<8x32xf32>
    %6 = arith.addf %3, %5 : vector<8x32xf32>
    %c0_6 = arith.constant 0 : index
    %c0_7 = arith.constant 0 : index
    %7 = vector.load %arg5[%c0_6, %c0_7] : memref<1x32xf32, #tpu.memory_space<vmem>>, vector<1x32xf32>
    %c0_8 = arith.constant 0 : index
    %c0_9 = arith.constant 0 : index
    %8 = vector.load %arg6[%c0_8, %c0_9] : memref<1x32xf32, #tpu.memory_space<vmem>>, vector<1x32xf32>
    %cst_10 = arith.constant dense<0.000000e+00> : vector<8xf32>
    %9 = vector.multi_reduction <add>, %6, %cst_10 [1] : vector<8x32xf32> to vector<8xf32>
    %10 = vector.shape_cast %9 : vector<8xf32> to vector<8x1xf32>
    %cst_11 = arith.constant 3.200000e+01 : f32
    %11 = vector.broadcast %cst_11 : f32 to vector<8x1xf32>
    %12 = arith.divf %10, %11 : vector<8x1xf32>
    %13 = vector.broadcast %12 : vector<8x1xf32> to vector<8x32xf32>
    %14 = arith.subf %6, %13 : vector<8x32xf32>
    %15 = arith.mulf %14, %14 : vector<8x32xf32>
    %cst_12 = arith.constant dense<0.000000e+00> : vector<8xf32>
    %16 = vector.multi_reduction <add>, %15, %cst_12 [1] : vector<8x32xf32> to vector<8xf32>
    %17 = vector.shape_cast %16 : vector<8xf32> to vector<8x1xf32>
    %cst_13 = arith.constant 3.200000e+01 : f32
    %18 = vector.broadcast %cst_13 : f32 to vector<8x1xf32>
    %19 = arith.divf %17, %18 : vector<8x1xf32>
    %20 = vector.broadcast %12 : vector<8x1xf32> to vector<8x32xf32>
    %21 = arith.subf %6, %20 : vector<8x32xf32>
    %cst_14 = arith.constant 9.99999974E-6 : f32
    %22 = vector.broadcast %cst_14 : f32 to vector<8x1xf32>
    %23 = arith.addf %19, %22 : vector<8x1xf32>
    %24 = math.rsqrt %23 : vector<8x1xf32>
    %25 = vector.broadcast %24 : vector<8x1xf32> to vector<8x32xf32>
    %26 = arith.mulf %21, %25 : vector<8x32xf32>
    %27 = vector.broadcast %7 : vector<1x32xf32> to vector<8x32xf32>
    %28 = arith.mulf %26, %27 : vector<8x32xf32>
    %29 = vector.broadcast %8 : vector<1x32xf32> to vector<8x32xf32>
    %30 = arith.addf %28, %29 : vector<8x32xf32>
    %31 = tpu.iota {dimensions = array<i32: 2>} : vector<1x1x8xi32>
    %c1_i32 = arith.constant 1 : i32
    %32 = arith.muli %arg0, %c1_i32 : i32
    %c0_i32 = arith.constant 0 : i32
    %33 = arith.addi %32, %c0_i32 : i32
    %34 = arith.index_cast %33 : i32 to index
    %35 = memref.load %arg1[%34] : memref<2xi32, #tpu.memory_space<smem>>
    %36 = vector.broadcast %35 : i32 to vector<1x1x8xi32>
    %37 = arith.cmpi slt, %31, %36 : vector<1x1x8xi32>
    %38 = vector.shape_cast %30 : vector<8x32xf32> to vector<1x8x32xf32>
    %39 = vector.shape_cast %38 : vector<1x8x32xf32> to vector<1x8x32xf32>
    %40 = vector.broadcast %39 : vector<1x8x32xf32> to vector<4x8x32xf32>
    %c0_15 = arith.constant 0 : index
    %c0_16 = arith.constant 0 : index
    %c0_17 = arith.constant 0 : index
    %c0_18 = arith.constant 0 : index
    %41 = vector.load %arg7[%c0_15, %c0_16, %c0_17, %c0_18] : memref<2x4x32x8xf32, #tpu.memory_space<vmem>>, vector<1x4x32x8xf32>
    %42 = vector.shape_cast %41 : vector<1x4x32x8xf32> to vector<4x32x8xf32>
    "tpu.trace_start"() <{level = 10 : i32, message = "hmd,hdj->hmj"}> : () -> ()
    %cst_19 = arith.constant dense<0.000000e+00> : vector<4x8x8xf32>
    %43 = tpu.matmul %40, %42, %cst_19 {dimension_numbers = #tpu.dot_dimension_numbers<[2], [1], [1], [2], [0, 0, 0, 1, 1, 2], [0], [0]>} : vector<4x8x32xf32>, vector<4x32x8xf32>, vector<4x8x8xf32> -> vector<4x8x8xf32>
    "tpu.trace_stop"() : () -> ()
    %c0_20 = arith.constant 0 : index
    %c0_21 = arith.constant 0 : index
    %c0_22 = arith.constant 0 : index
    %c0_23 = arith.constant 0 : index
    %44 = vector.load %arg10[%c0_20, %c0_21, %c0_22, %c0_23] : memref<2x4x1x8xf32, #tpu.memory_space<vmem>>, vector<1x4x1x8xf32>
    %45 = vector.shape_cast %44 : vector<1x4x1x8xf32> to vector<4x1x8xf32>
    %46 = vector.broadcast %45 : vector<4x1x8xf32> to vector<4x8x8xf32>
    %47 = arith.addf %43, %46 : vector<4x8x8xf32>
    %c0_24 = arith.constant 0 : index
    %c0_25 = arith.constant 0 : index
    %c0_26 = arith.constant 0 : index
    %c0_27 = arith.constant 0 : index
    %48 = vector.load %arg8[%c0_24, %c0_25, %c0_26, %c0_27] : memref<2x4x32x8xf32, #tpu.memory_space<vmem>>, vector<1x4x32x8xf32>
    %49 = vector.shape_cast %48 : vector<1x4x32x8xf32> to vector<4x32x8xf32>
    "tpu.trace_start"() <{level = 10 : i32, message = "hmd,hdj->hmj"}> : () -> ()
    %cst_28 = arith.constant dense<0.000000e+00> : vector<4x8x8xf32>
    %50 = tpu.matmul %40, %49, %cst_28 {dimension_numbers = #tpu.dot_dimension_numbers<[2], [1], [1], [2], [0, 0, 0, 1, 1, 2], [0], [0]>} : vector<4x8x32xf32>, vector<4x32x8xf32>, vector<4x8x8xf32> -> vector<4x8x8xf32>
    "tpu.trace_stop"() : () -> ()
    %c0_29 = arith.constant 0 : index
    %c0_30 = arith.constant 0 : index
    %c0_31 = arith.constant 0 : index
    %c0_32 = arith.constant 0 : index
    %51 = vector.load %arg11[%c0_29, %c0_30, %c0_31, %c0_32] : memref<2x4x1x8xf32, #tpu.memory_space<vmem>>, vector<1x4x1x8xf32>
    %52 = vector.shape_cast %51 : vector<1x4x1x8xf32> to vector<4x1x8xf32>
    %53 = vector.broadcast %52 : vector<4x1x8xf32> to vector<4x8x8xf32>
    %54 = arith.addf %50, %53 : vector<4x8x8xf32>
    %c0_33 = arith.constant 0 : index
    %c0_34 = arith.constant 0 : index
    %c0_35 = arith.constant 0 : index
    %c0_36 = arith.constant 0 : index
    %55 = vector.load %arg9[%c0_33, %c0_34, %c0_35, %c0_36] : memref<2x4x32x8xf32, #tpu.memory_space<vmem>>, vector<1x4x32x8xf32>
    %56 = vector.shape_cast %55 : vector<1x4x32x8xf32> to vector<4x32x8xf32>
    "tpu.trace_start"() <{level = 10 : i32, message = "hmd,hdj->hmj"}> : () -> ()
    %cst_37 = arith.constant dense<0.000000e+00> : vector<4x8x8xf32>
    %57 = tpu.matmul %40, %56, %cst_37 {dimension_numbers = #tpu.dot_dimension_numbers<[2], [1], [1], [2], [0, 0, 0, 1, 1, 2], [0], [0]>} : vector<4x8x32xf32>, vector<4x32x8xf32>, vector<4x8x8xf32> -> vector<4x8x8xf32>
    "tpu.trace_stop"() : () -> ()
    %c0_38 = arith.constant 0 : index
    %c0_39 = arith.constant 0 : index
    %c0_40 = arith.constant 0 : index
    %c0_41 = arith.constant 0 : index
    %58 = vector.load %arg12[%c0_38, %c0_39, %c0_40, %c0_41] : memref<2x4x1x8xf32, #tpu.memory_space<vmem>>, vector<1x4x1x8xf32>
    %59 = vector.shape_cast %58 : vector<1x4x1x8xf32> to vector<4x1x8xf32>
    %60 = vector.broadcast %59 : vector<4x1x8xf32> to vector<4x8x8xf32>
    %61 = arith.addf %57, %60 : vector<4x8x8xf32>
    "tpu.trace_start"() <{level = 10 : i32, message = "nqj,nkj->nqk"}> : () -> ()
    %cst_42 = arith.constant dense<0.000000e+00> : vector<4x8x8xf32>
    %62 = tpu.matmul %47, %54, %cst_42 {dimension_numbers = #tpu.dot_dimension_numbers<[2], [2], [1], [1], [0, 0, 0, 1, 1, 1], [0], [0]>} : vector<4x8x8xf32>, vector<4x8x8xf32>, vector<4x8x8xf32> -> vector<4x8x8xf32>
    "tpu.trace_stop"() : () -> ()
    %63 = vector.shape_cast %62 : vector<4x8x8xf32> to vector<4x1x8x8xf32>
    %64 = vector.shape_cast %37 : vector<1x1x8xi1> to vector<1x1x1x8xi1>
    %cst_43 = arith.constant -1.000000e+30 : f32
    %65 = vector.shape_cast %64 : vector<1x1x1x8xi1> to vector<1x1x1x8xi1>
    %66 = vector.broadcast %65 : vector<1x1x1x8xi1> to vector<4x1x8x8xi1>
    %67 = vector.broadcast %cst_43 : f32 to vector<4x1x8x8xf32>
    %68 = arith.select %66, %63, %67 : vector<4x1x8x8xi1>, vector<4x1x8x8xf32>
    %cst_44 = arith.constant dense<0xFF800000> : vector<4x1x8xf32>
    %69 = vector.multi_reduction <maximumf>, %68, %cst_44 [3] : vector<4x1x8x8xf32> to vector<4x1x8xf32>
    %70 = vector.shape_cast %69 : vector<4x1x8xf32> to vector<4x1x8x1xf32>
    %71 = vector.broadcast %70 : vector<4x1x8x1xf32> to vector<4x1x8x8xf32>
    %72 = arith.subf %68, %71 : vector<4x1x8x8xf32>
    %73 = math.exp %72 : vector<4x1x8x8xf32>
    %cst_45 = arith.constant dense<0.000000e+00> : vector<4x1x8xf32>
    %74 = vector.multi_reduction <add>, %73, %cst_45 [3] : vector<4x1x8x8xf32> to vector<4x1x8xf32>
    %75 = vector.shape_cast %74 : vector<4x1x8xf32> to vector<4x1x8x1xf32>
    %76 = tpu.reciprocal %75 {approx = true} : vector<4x1x8x1xf32> -> vector<4x1x8x1xf32>
    %77 = vector.broadcast %76 : vector<4x1x8x1xf32> to vector<4x1x8x8xf32>
    %78 = arith.mulf %73, %77 : vector<4x1x8x8xf32>
    %79 = vector.shape_cast %78 : vector<4x1x8x8xf32> to vector<4x8x8xf32>
    "tpu.trace_start"() <{level = 10 : i32, message = "nqk,nkj->nqj"}> : () -> ()
    %cst_46 = arith.constant dense<0.000000e+00> : vector<4x8x8xf32>
    %80 = tpu.matmul %79, %61, %cst_46 {dimension_numbers = #tpu.dot_dimension_numbers<[2], [1], [1], [2], [0, 0, 0, 1, 1, 2], [0], [0]>} : vector<4x8x8xf32>, vector<4x8x8xf32>, vector<4x8x8xf32> -> vector<4x8x8xf32>
    "tpu.trace_stop"() : () -> ()
    %c0_47 = arith.constant 0 : index
    %c0_48 = arith.constant 0 : index
    %c0_49 = arith.constant 0 : index
    %c0_50 = arith.constant 0 : index
    %81 = vector.load %arg13[%c0_47, %c0_48, %c0_49, %c0_50] : memref<2x4x8x32xf32, #tpu.memory_space<vmem>>, vector<1x4x8x32xf32>
    %82 = vector.shape_cast %81 : vector<1x4x8x32xf32> to vector<4x8x32xf32>
    "tpu.trace_start"() <{level = 10 : i32, message = "hmj,hjd->hmd"}> : () -> ()
    %cst_51 = arith.constant dense<0.000000e+00> : vector<4x8x32xf32>
    %83 = tpu.matmul %80, %82, %cst_51 {dimension_numbers = #tpu.dot_dimension_numbers<[2], [1], [1], [2], [0, 0, 0, 1, 1, 2], [0], [0]>} : vector<4x8x8xf32>, vector<4x8x32xf32>, vector<4x8x32xf32> -> vector<4x8x32xf32>
    "tpu.trace_stop"() : () -> ()
    %cst_52 = arith.constant dense<0.000000e+00> : vector<8x32xf32>
    %84 = vector.multi_reduction <add>, %83, %cst_52 [0] : vector<4x8x32xf32> to vector<8x32xf32>
    %c0_53 = arith.constant 0 : index
    %c0_54 = arith.constant 0 : index
    %c0_55 = arith.constant 0 : index
    %85 = vector.load %arg14[%c0_53, %c0_54, %c0_55] : memref<2x1x32xf32, #tpu.memory_space<vmem>>, vector<1x1x32xf32>
    %86 = vector.shape_cast %85 : vector<1x1x32xf32> to vector<1x32xf32>
    %87 = vector.broadcast %86 : vector<1x32xf32> to vector<8x32xf32>
    %88 = arith.addf %84, %87 : vector<8x32xf32>
    %89 = arith.addf %30, %88 : vector<8x32xf32>
    %c0_56 = arith.constant 0 : index
    %c0_57 = arith.constant 0 : index
    %c0_58 = arith.constant 0 : index
    %90 = vector.load %arg15[%c0_56, %c0_57, %c0_58] : memref<2x1x32xf32, #tpu.memory_space<vmem>>, vector<1x1x32xf32>
    %91 = vector.shape_cast %90 : vector<1x1x32xf32> to vector<1x32xf32>
    %c0_59 = arith.constant 0 : index
    %c0_60 = arith.constant 0 : index
    %c0_61 = arith.constant 0 : index
    %92 = vector.load %arg16[%c0_59, %c0_60, %c0_61] : memref<2x1x32xf32, #tpu.memory_space<vmem>>, vector<1x1x32xf32>
    %93 = vector.shape_cast %92 : vector<1x1x32xf32> to vector<1x32xf32>
    %cst_62 = arith.constant dense<0.000000e+00> : vector<8xf32>
    %94 = vector.multi_reduction <add>, %89, %cst_62 [1] : vector<8x32xf32> to vector<8xf32>
    %95 = vector.shape_cast %94 : vector<8xf32> to vector<8x1xf32>
    %cst_63 = arith.constant 3.200000e+01 : f32
    %96 = vector.broadcast %cst_63 : f32 to vector<8x1xf32>
    %97 = arith.divf %95, %96 : vector<8x1xf32>
    %98 = vector.broadcast %97 : vector<8x1xf32> to vector<8x32xf32>
    %99 = arith.subf %89, %98 : vector<8x32xf32>
    %100 = arith.mulf %99, %99 : vector<8x32xf32>
    %cst_64 = arith.constant dense<0.000000e+00> : vector<8xf32>
    %101 = vector.multi_reduction <add>, %100, %cst_64 [1] : vector<8x32xf32> to vector<8xf32>
    %102 = vector.shape_cast %101 : vector<8xf32> to vector<8x1xf32>
    %cst_65 = arith.constant 3.200000e+01 : f32
    %103 = vector.broadcast %cst_65 : f32 to vector<8x1xf32>
    %104 = arith.divf %102, %103 : vector<8x1xf32>
    %105 = vector.broadcast %97 : vector<8x1xf32> to vector<8x32xf32>
    %106 = arith.subf %89, %105 : vector<8x32xf32>
    %cst_66 = arith.constant 9.99999974E-6 : f32
    %107 = vector.broadcast %cst_66 : f32 to vector<8x1xf32>
    %108 = arith.addf %104, %107 : vector<8x1xf32>
    %109 = math.rsqrt %108 : vector<8x1xf32>
    %110 = vector.broadcast %109 : vector<8x1xf32> to vector<8x32xf32>
    %111 = arith.mulf %106, %110 : vector<8x32xf32>
    %112 = vector.broadcast %91 : vector<1x32xf32> to vector<8x32xf32>
    %113 = arith.mulf %111, %112 : vector<8x32xf32>
    %114 = vector.broadcast %93 : vector<1x32xf32> to vector<8x32xf32>
    %115 = arith.addf %113, %114 : vector<8x32xf32>
    %c0_67 = arith.constant 0 : index
    %c0_68 = arith.constant 0 : index
    %c0_69 = arith.constant 0 : index
    %116 = vector.load %arg17[%c0_67, %c0_68, %c0_69] : memref<2x32x64xf32, #tpu.memory_space<vmem>>, vector<1x32x64xf32>
    %117 = vector.shape_cast %116 : vector<1x32x64xf32> to vector<32x64xf32>
    %cst_70 = arith.constant dense<0.000000e+00> : vector<8x64xf32>
    %118 = tpu.matmul %115, %117, %cst_70 {dimension_numbers = #tpu.dot_dimension_numbers<[1], [0], [0], [1], [0, 0, 1, 1], [], []>} : vector<8x32xf32>, vector<32x64xf32>, vector<8x64xf32> -> vector<8x64xf32>
    %c0_71 = arith.constant 0 : index
    %c0_72 = arith.constant 0 : index
    %c0_73 = arith.constant 0 : index
    %119 = vector.load %arg18[%c0_71, %c0_72, %c0_73] : memref<2x1x64xf32, #tpu.memory_space<vmem>>, vector<1x1x64xf32>
    %120 = vector.shape_cast %119 : vector<1x1x64xf32> to vector<1x64xf32>
    %121 = vector.broadcast %120 : vector<1x64xf32> to vector<8x64xf32>
    %122 = arith.addf %118, %121 : vector<8x64xf32>
    %cst_74 = arith.constant 0.000000e+00 : f32
    %123 = vector.broadcast %cst_74 : f32 to vector<8x64xf32>
    %124 = arith.maximumf %122, %123 : vector<8x64xf32>
    %c0_75 = arith.constant 0 : index
    %c0_76 = arith.constant 0 : index
    %c0_77 = arith.constant 0 : index
    %125 = vector.load %arg19[%c0_75, %c0_76, %c0_77] : memref<2x64x32xf32, #tpu.memory_space<vmem>>, vector<1x64x32xf32>
    %126 = vector.shape_cast %125 : vector<1x64x32xf32> to vector<64x32xf32>
    %cst_78 = arith.constant dense<0.000000e+00> : vector<8x32xf32>
    %127 = tpu.matmul %124, %126, %cst_78 {dimension_numbers = #tpu.dot_dimension_numbers<[1], [0], [0], [1], [0, 0, 1, 1], [], []>} : vector<8x64xf32>, vector<64x32xf32>, vector<8x32xf32> -> vector<8x32xf32>
    %c0_79 = arith.constant 0 : index
    %c0_80 = arith.constant 0 : index
    %c0_81 = arith.constant 0 : index
    %128 = vector.load %arg20[%c0_79, %c0_80, %c0_81] : memref<2x1x32xf32, #tpu.memory_space<vmem>>, vector<1x1x32xf32>
    %129 = vector.shape_cast %128 : vector<1x1x32xf32> to vector<1x32xf32>
    %130 = vector.broadcast %129 : vector<1x32xf32> to vector<8x32xf32>
    %131 = arith.addf %127, %130 : vector<8x32xf32>
    %132 = arith.addf %115, %131 : vector<8x32xf32>
    %c0_82 = arith.constant 0 : index
    %c0_83 = arith.constant 0 : index
    %c0_84 = arith.constant 0 : index
    %133 = vector.load %arg21[%c0_82, %c0_83, %c0_84] : memref<2x1x32xf32, #tpu.memory_space<vmem>>, vector<1x1x32xf32>
    %134 = vector.shape_cast %133 : vector<1x1x32xf32> to vector<1x32xf32>
    %c0_85 = arith.constant 0 : index
    %c0_86 = arith.constant 0 : index
    %c0_87 = arith.constant 0 : index
    %135 = vector.load %arg22[%c0_85, %c0_86, %c0_87] : memref<2x1x32xf32, #tpu.memory_space<vmem>>, vector<1x1x32xf32>
    %136 = vector.shape_cast %135 : vector<1x1x32xf32> to vector<1x32xf32>
    %cst_88 = arith.constant dense<0.000000e+00> : vector<8xf32>
    %137 = vector.multi_reduction <add>, %132, %cst_88 [1] : vector<8x32xf32> to vector<8xf32>
    %138 = vector.shape_cast %137 : vector<8xf32> to vector<8x1xf32>
    %cst_89 = arith.constant 3.200000e+01 : f32
    %139 = vector.broadcast %cst_89 : f32 to vector<8x1xf32>
    %140 = arith.divf %138, %139 : vector<8x1xf32>
    %141 = vector.broadcast %140 : vector<8x1xf32> to vector<8x32xf32>
    %142 = arith.subf %132, %141 : vector<8x32xf32>
    %143 = arith.mulf %142, %142 : vector<8x32xf32>
    %cst_90 = arith.constant dense<0.000000e+00> : vector<8xf32>
    %144 = vector.multi_reduction <add>, %143, %cst_90 [1] : vector<8x32xf32> to vector<8xf32>
    %145 = vector.shape_cast %144 : vector<8xf32> to vector<8x1xf32>
    %cst_91 = arith.constant 3.200000e+01 : f32
    %146 = vector.broadcast %cst_91 : f32 to vector<8x1xf32>
    %147 = arith.divf %145, %146 : vector<8x1xf32>
    %148 = vector.broadcast %140 : vector<8x1xf32> to vector<8x32xf32>
    %149 = arith.subf %132, %148 : vector<8x32xf32>
    %cst_92 = arith.constant 9.99999974E-6 : f32
    %150 = vector.broadcast %cst_92 : f32 to vector<8x1xf32>
    %151 = arith.addf %147, %150 : vector<8x1xf32>
    %152 = math.rsqrt %151 : vector<8x1xf32>
    %153 = vector.broadcast %152 : vector<8x1xf32> to vector<8x32xf32>
    %154 = arith.mulf %149, %153 : vector<8x32xf32>
    %155 = vector.broadcast %134 : vector<1x32xf32> to vector<8x32xf32>
    %156 = arith.mulf %154, %155 : vector<8x32xf32>
    %157 = vector.broadcast %136 : vector<1x32xf32> to vector<8x32xf32>
    %158 = arith.addf %156, %157 : vector<8x32xf32>
    %159 = vector.shape_cast %158 : vector<8x32xf32> to vector<1x8x32xf32>
    %160 = vector.shape_cast %159 : vector<1x8x32xf32> to vector<1x8x32xf32>
    %161 = vector.broadcast %160 : vector<1x8x32xf32> to vector<4x8x32xf32>
    %c1 = arith.constant 1 : index
    %c0_93 = arith.constant 0 : index
    %c0_94 = arith.constant 0 : index
    %c0_95 = arith.constant 0 : index
    %162 = vector.load %arg7[%c1, %c0_93, %c0_94, %c0_95] : memref<2x4x32x8xf32, #tpu.memory_space<vmem>>, vector<1x4x32x8xf32>
    %163 = vector.shape_cast %162 : vector<1x4x32x8xf32> to vector<4x32x8xf32>
    "tpu.trace_start"() <{level = 10 : i32, message = "hmd,hdj->hmj"}> : () -> ()
    %cst_96 = arith.constant dense<0.000000e+00> : vector<4x8x8xf32>
    %164 = tpu.matmul %161, %163, %cst_96 {dimension_numbers = #tpu.dot_dimension_numbers<[2], [1], [1], [2], [0, 0, 0, 1, 1, 2], [0], [0]>} : vector<4x8x32xf32>, vector<4x32x8xf32>, vector<4x8x8xf32> -> vector<4x8x8xf32>
    "tpu.trace_stop"() : () -> ()
    %c1_97 = arith.constant 1 : index
    %c0_98 = arith.constant 0 : index
    %c0_99 = arith.constant 0 : index
    %c0_100 = arith.constant 0 : index
    %165 = vector.load %arg10[%c1_97, %c0_98, %c0_99, %c0_100] : memref<2x4x1x8xf32, #tpu.memory_space<vmem>>, vector<1x4x1x8xf32>
    %166 = vector.shape_cast %165 : vector<1x4x1x8xf32> to vector<4x1x8xf32>
    %167 = vector.broadcast %166 : vector<4x1x8xf32> to vector<4x8x8xf32>
    %168 = arith.addf %164, %167 : vector<4x8x8xf32>
    %c1_101 = arith.constant 1 : index
    %c0_102 = arith.constant 0 : index
    %c0_103 = arith.constant 0 : index
    %c0_104 = arith.constant 0 : index
    %169 = vector.load %arg8[%c1_101, %c0_102, %c0_103, %c0_104] : memref<2x4x32x8xf32, #tpu.memory_space<vmem>>, vector<1x4x32x8xf32>
    %170 = vector.shape_cast %169 : vector<1x4x32x8xf32> to vector<4x32x8xf32>
    "tpu.trace_start"() <{level = 10 : i32, message = "hmd,hdj->hmj"}> : () -> ()
    %cst_105 = arith.constant dense<0.000000e+00> : vector<4x8x8xf32>
    %171 = tpu.matmul %161, %170, %cst_105 {dimension_numbers = #tpu.dot_dimension_numbers<[2], [1], [1], [2], [0, 0, 0, 1, 1, 2], [0], [0]>} : vector<4x8x32xf32>, vector<4x32x8xf32>, vector<4x8x8xf32> -> vector<4x8x8xf32>
    "tpu.trace_stop"() : () -> ()
    %c1_106 = arith.constant 1 : index
    %c0_107 = arith.constant 0 : index
    %c0_108 = arith.constant 0 : index
    %c0_109 = arith.constant 0 : index
    %172 = vector.load %arg11[%c1_106, %c0_107, %c0_108, %c0_109] : memref<2x4x1x8xf32, #tpu.memory_space<vmem>>, vector<1x4x1x8xf32>
    %173 = vector.shape_cast %172 : vector<1x4x1x8xf32> to vector<4x1x8xf32>
    %174 = vector.broadcast %173 : vector<4x1x8xf32> to vector<4x8x8xf32>
    %175 = arith.addf %171, %174 : vector<4x8x8xf32>
    %c1_110 = arith.constant 1 : index
    %c0_111 = arith.constant 0 : index
    %c0_112 = arith.constant 0 : index
    %c0_113 = arith.constant 0 : index
    %176 = vector.load %arg9[%c1_110, %c0_111, %c0_112, %c0_113] : memref<2x4x32x8xf32, #tpu.memory_space<vmem>>, vector<1x4x32x8xf32>
    %177 = vector.shape_cast %176 : vector<1x4x32x8xf32> to vector<4x32x8xf32>
    "tpu.trace_start"() <{level = 10 : i32, message = "hmd,hdj->hmj"}> : () -> ()
    %cst_114 = arith.constant dense<0.000000e+00> : vector<4x8x8xf32>
    %178 = tpu.matmul %161, %177, %cst_114 {dimension_numbers = #tpu.dot_dimension_numbers<[2], [1], [1], [2], [0, 0, 0, 1, 1, 2], [0], [0]>} : vector<4x8x32xf32>, vector<4x32x8xf32>, vector<4x8x8xf32> -> vector<4x8x8xf32>
    "tpu.trace_stop"() : () -> ()
    %c1_115 = arith.constant 1 : index
    %c0_116 = arith.constant 0 : index
    %c0_117 = arith.constant 0 : index
    %c0_118 = arith.constant 0 : index
    %179 = vector.load %arg12[%c1_115, %c0_116, %c0_117, %c0_118] : memref<2x4x1x8xf32, #tpu.memory_space<vmem>>, vector<1x4x1x8xf32>
    %180 = vector.shape_cast %179 : vector<1x4x1x8xf32> to vector<4x1x8xf32>
    %181 = vector.broadcast %180 : vector<4x1x8xf32> to vector<4x8x8xf32>
    %182 = arith.addf %178, %181 : vector<4x8x8xf32>
    "tpu.trace_start"() <{level = 10 : i32, message = "nqj,nkj->nqk"}> : () -> ()
    %cst_119 = arith.constant dense<0.000000e+00> : vector<4x8x8xf32>
    %183 = tpu.matmul %168, %175, %cst_119 {dimension_numbers = #tpu.dot_dimension_numbers<[2], [2], [1], [1], [0, 0, 0, 1, 1, 1], [0], [0]>} : vector<4x8x8xf32>, vector<4x8x8xf32>, vector<4x8x8xf32> -> vector<4x8x8xf32>
    "tpu.trace_stop"() : () -> ()
    %184 = vector.shape_cast %183 : vector<4x8x8xf32> to vector<4x1x8x8xf32>
    %185 = vector.shape_cast %37 : vector<1x1x8xi1> to vector<1x1x1x8xi1>
    %cst_120 = arith.constant -1.000000e+30 : f32
    %186 = vector.shape_cast %185 : vector<1x1x1x8xi1> to vector<1x1x1x8xi1>
    %187 = vector.broadcast %186 : vector<1x1x1x8xi1> to vector<4x1x8x8xi1>
    %188 = vector.broadcast %cst_120 : f32 to vector<4x1x8x8xf32>
    %189 = arith.select %187, %184, %188 : vector<4x1x8x8xi1>, vector<4x1x8x8xf32>
    %cst_121 = arith.constant dense<0xFF800000> : vector<4x1x8xf32>
    %190 = vector.multi_reduction <maximumf>, %189, %cst_121 [3] : vector<4x1x8x8xf32> to vector<4x1x8xf32>
    %191 = vector.shape_cast %190 : vector<4x1x8xf32> to vector<4x1x8x1xf32>
    %192 = vector.broadcast %191 : vector<4x1x8x1xf32> to vector<4x1x8x8xf32>
    %193 = arith.subf %189, %192 : vector<4x1x8x8xf32>
    %194 = math.exp %193 : vector<4x1x8x8xf32>
    %cst_122 = arith.constant dense<0.000000e+00> : vector<4x1x8xf32>
    %195 = vector.multi_reduction <add>, %194, %cst_122 [3] : vector<4x1x8x8xf32> to vector<4x1x8xf32>
    %196 = vector.shape_cast %195 : vector<4x1x8xf32> to vector<4x1x8x1xf32>
    %197 = tpu.reciprocal %196 {approx = true} : vector<4x1x8x1xf32> -> vector<4x1x8x1xf32>
    %198 = vector.broadcast %197 : vector<4x1x8x1xf32> to vector<4x1x8x8xf32>
    %199 = arith.mulf %194, %198 : vector<4x1x8x8xf32>
    %200 = vector.shape_cast %199 : vector<4x1x8x8xf32> to vector<4x8x8xf32>
    "tpu.trace_start"() <{level = 10 : i32, message = "nqk,nkj->nqj"}> : () -> ()
    %cst_123 = arith.constant dense<0.000000e+00> : vector<4x8x8xf32>
    %201 = tpu.matmul %200, %182, %cst_123 {dimension_numbers = #tpu.dot_dimension_numbers<[2], [1], [1], [2], [0, 0, 0, 1, 1, 2], [0], [0]>} : vector<4x8x8xf32>, vector<4x8x8xf32>, vector<4x8x8xf32> -> vector<4x8x8xf32>
    "tpu.trace_stop"() : () -> ()
    %c1_124 = arith.constant 1 : index
    %c0_125 = arith.constant 0 : index
    %c0_126 = arith.constant 0 : index
    %c0_127 = arith.constant 0 : index
    %202 = vector.load %arg13[%c1_124, %c0_125, %c0_126, %c0_127] : memref<2x4x8x32xf32, #tpu.memory_space<vmem>>, vector<1x4x8x32xf32>
    %203 = vector.shape_cast %202 : vector<1x4x8x32xf32> to vector<4x8x32xf32>
    "tpu.trace_start"() <{level = 10 : i32, message = "hmj,hjd->hmd"}> : () -> ()
    %cst_128 = arith.constant dense<0.000000e+00> : vector<4x8x32xf32>
    %204 = tpu.matmul %201, %203, %cst_128 {dimension_numbers = #tpu.dot_dimension_numbers<[2], [1], [1], [2], [0, 0, 0, 1, 1, 2], [0], [0]>} : vector<4x8x8xf32>, vector<4x8x32xf32>, vector<4x8x32xf32> -> vector<4x8x32xf32>
    "tpu.trace_stop"() : () -> ()
    %cst_129 = arith.constant dense<0.000000e+00> : vector<8x32xf32>
    %205 = vector.multi_reduction <add>, %204, %cst_129 [0] : vector<4x8x32xf32> to vector<8x32xf32>
    %c1_130 = arith.constant 1 : index
    %c0_131 = arith.constant 0 : index
    %c0_132 = arith.constant 0 : index
    %206 = vector.load %arg14[%c1_130, %c0_131, %c0_132] : memref<2x1x32xf32, #tpu.memory_space<vmem>>, vector<1x1x32xf32>
    %207 = vector.shape_cast %206 : vector<1x1x32xf32> to vector<1x32xf32>
    %208 = vector.broadcast %207 : vector<1x32xf32> to vector<8x32xf32>
    %209 = arith.addf %205, %208 : vector<8x32xf32>
    %210 = arith.addf %158, %209 : vector<8x32xf32>
    %c1_133 = arith.constant 1 : index
    %c0_134 = arith.constant 0 : index
    %c0_135 = arith.constant 0 : index
    %211 = vector.load %arg15[%c1_133, %c0_134, %c0_135] : memref<2x1x32xf32, #tpu.memory_space<vmem>>, vector<1x1x32xf32>
    %212 = vector.shape_cast %211 : vector<1x1x32xf32> to vector<1x32xf32>
    %c1_136 = arith.constant 1 : index
    %c0_137 = arith.constant 0 : index
    %c0_138 = arith.constant 0 : index
    %213 = vector.load %arg16[%c1_136, %c0_137, %c0_138] : memref<2x1x32xf32, #tpu.memory_space<vmem>>, vector<1x1x32xf32>
    %214 = vector.shape_cast %213 : vector<1x1x32xf32> to vector<1x32xf32>
    %cst_139 = arith.constant dense<0.000000e+00> : vector<8xf32>
    %215 = vector.multi_reduction <add>, %210, %cst_139 [1] : vector<8x32xf32> to vector<8xf32>
    %216 = vector.shape_cast %215 : vector<8xf32> to vector<8x1xf32>
    %cst_140 = arith.constant 3.200000e+01 : f32
    %217 = vector.broadcast %cst_140 : f32 to vector<8x1xf32>
    %218 = arith.divf %216, %217 : vector<8x1xf32>
    %219 = vector.broadcast %218 : vector<8x1xf32> to vector<8x32xf32>
    %220 = arith.subf %210, %219 : vector<8x32xf32>
    %221 = arith.mulf %220, %220 : vector<8x32xf32>
    %cst_141 = arith.constant dense<0.000000e+00> : vector<8xf32>
    %222 = vector.multi_reduction <add>, %221, %cst_141 [1] : vector<8x32xf32> to vector<8xf32>
    %223 = vector.shape_cast %222 : vector<8xf32> to vector<8x1xf32>
    %cst_142 = arith.constant 3.200000e+01 : f32
    %224 = vector.broadcast %cst_142 : f32 to vector<8x1xf32>
    %225 = arith.divf %223, %224 : vector<8x1xf32>
    %226 = vector.broadcast %218 : vector<8x1xf32> to vector<8x32xf32>
    %227 = arith.subf %210, %226 : vector<8x32xf32>
    %cst_143 = arith.constant 9.99999974E-6 : f32
    %228 = vector.broadcast %cst_143 : f32 to vector<8x1xf32>
    %229 = arith.addf %225, %228 : vector<8x1xf32>
    %230 = math.rsqrt %229 : vector<8x1xf32>
    %231 = vector.broadcast %230 : vector<8x1xf32> to vector<8x32xf32>
    %232 = arith.mulf %227, %231 : vector<8x32xf32>
    %233 = vector.broadcast %212 : vector<1x32xf32> to vector<8x32xf32>
    %234 = arith.mulf %232, %233 : vector<8x32xf32>
    %235 = vector.broadcast %214 : vector<1x32xf32> to vector<8x32xf32>
    %236 = arith.addf %234, %235 : vector<8x32xf32>
    %c1_144 = arith.constant 1 : index
    %c0_145 = arith.constant 0 : index
    %c0_146 = arith.constant 0 : index
    %237 = vector.load %arg17[%c1_144, %c0_145, %c0_146] : memref<2x32x64xf32, #tpu.memory_space<vmem>>, vector<1x32x64xf32>
    %238 = vector.shape_cast %237 : vector<1x32x64xf32> to vector<32x64xf32>
    %cst_147 = arith.constant dense<0.000000e+00> : vector<8x64xf32>
    %239 = tpu.matmul %236, %238, %cst_147 {dimension_numbers = #tpu.dot_dimension_numbers<[1], [0], [0], [1], [0, 0, 1, 1], [], []>} : vector<8x32xf32>, vector<32x64xf32>, vector<8x64xf32> -> vector<8x64xf32>
    %c1_148 = arith.constant 1 : index
    %c0_149 = arith.constant 0 : index
    %c0_150 = arith.constant 0 : index
    %240 = vector.load %arg18[%c1_148, %c0_149, %c0_150] : memref<2x1x64xf32, #tpu.memory_space<vmem>>, vector<1x1x64xf32>
    %241 = vector.shape_cast %240 : vector<1x1x64xf32> to vector<1x64xf32>
    %242 = vector.broadcast %241 : vector<1x64xf32> to vector<8x64xf32>
    %243 = arith.addf %239, %242 : vector<8x64xf32>
    %cst_151 = arith.constant 0.000000e+00 : f32
    %244 = vector.broadcast %cst_151 : f32 to vector<8x64xf32>
    %245 = arith.maximumf %243, %244 : vector<8x64xf32>
    %c1_152 = arith.constant 1 : index
    %c0_153 = arith.constant 0 : index
    %c0_154 = arith.constant 0 : index
    %246 = vector.load %arg19[%c1_152, %c0_153, %c0_154] : memref<2x64x32xf32, #tpu.memory_space<vmem>>, vector<1x64x32xf32>
    %247 = vector.shape_cast %246 : vector<1x64x32xf32> to vector<64x32xf32>
    %cst_155 = arith.constant dense<0.000000e+00> : vector<8x32xf32>
    %248 = tpu.matmul %245, %247, %cst_155 {dimension_numbers = #tpu.dot_dimension_numbers<[1], [0], [0], [1], [0, 0, 1, 1], [], []>} : vector<8x64xf32>, vector<64x32xf32>, vector<8x32xf32> -> vector<8x32xf32>
    %c1_156 = arith.constant 1 : index
    %c0_157 = arith.constant 0 : index
    %c0_158 = arith.constant 0 : index
    %249 = vector.load %arg20[%c1_156, %c0_157, %c0_158] : memref<2x1x32xf32, #tpu.memory_space<vmem>>, vector<1x1x32xf32>
    %250 = vector.shape_cast %249 : vector<1x1x32xf32> to vector<1x32xf32>
    %251 = vector.broadcast %250 : vector<1x32xf32> to vector<8x32xf32>
    %252 = arith.addf %248, %251 : vector<8x32xf32>
    %253 = arith.addf %236, %252 : vector<8x32xf32>
    %c1_159 = arith.constant 1 : index
    %c0_160 = arith.constant 0 : index
    %c0_161 = arith.constant 0 : index
    %254 = vector.load %arg21[%c1_159, %c0_160, %c0_161] : memref<2x1x32xf32, #tpu.memory_space<vmem>>, vector<1x1x32xf32>
    %255 = vector.shape_cast %254 : vector<1x1x32xf32> to vector<1x32xf32>
    %c1_162 = arith.constant 1 : index
    %c0_163 = arith.constant 0 : index
    %c0_164 = arith.constant 0 : index
    %256 = vector.load %arg22[%c1_162, %c0_163, %c0_164] : memref<2x1x32xf32, #tpu.memory_space<vmem>>, vector<1x1x32xf32>
    %257 = vector.shape_cast %256 : vector<1x1x32xf32> to vector<1x32xf32>
    %cst_165 = arith.constant dense<0.000000e+00> : vector<8xf32>
    %258 = vector.multi_reduction <add>, %253, %cst_165 [1] : vector<8x32xf32> to vector<8xf32>
    %259 = vector.shape_cast %258 : vector<8xf32> to vector<8x1xf32>
    %cst_166 = arith.constant 3.200000e+01 : f32
    %260 = vector.broadcast %cst_166 : f32 to vector<8x1xf32>
    %261 = arith.divf %259, %260 : vector<8x1xf32>
    %262 = vector.broadcast %261 : vector<8x1xf32> to vector<8x32xf32>
    %263 = arith.subf %253, %262 : vector<8x32xf32>
    %264 = arith.mulf %263, %263 : vector<8x32xf32>
    %cst_167 = arith.constant dense<0.000000e+00> : vector<8xf32>
    %265 = vector.multi_reduction <add>, %264, %cst_167 [1] : vector<8x32xf32> to vector<8xf32>
    %266 = vector.shape_cast %265 : vector<8xf32> to vector<8x1xf32>
    %cst_168 = arith.constant 3.200000e+01 : f32
    %267 = vector.broadcast %cst_168 : f32 to vector<8x1xf32>
    %268 = arith.divf %266, %267 : vector<8x1xf32>
    %269 = vector.broadcast %261 : vector<8x1xf32> to vector<8x32xf32>
    %270 = arith.subf %253, %269 : vector<8x32xf32>
    %cst_169 = arith.constant 9.99999974E-6 : f32
    %271 = vector.broadcast %cst_169 : f32 to vector<8x1xf32>
    %272 = arith.addf %268, %271 : vector<8x1xf32>
    %273 = math.rsqrt %272 : vector<8x1xf32>
    %274 = vector.broadcast %273 : vector<8x1xf32> to vector<8x32xf32>
    %275 = arith.mulf %270, %274 : vector<8x32xf32>
    %276 = vector.broadcast %255 : vector<1x32xf32> to vector<8x32xf32>
    %277 = arith.mulf %275, %276 : vector<8x32xf32>
    %278 = vector.broadcast %257 : vector<1x32xf32> to vector<8x32xf32>
    %279 = arith.addf %277, %278 : vector<8x32xf32>
    %280 = vector.shape_cast %279 : vector<8x32xf32> to vector<1x8x32xf32>
    %c0_170 = arith.constant 0 : index
    %c0_171 = arith.constant 0 : index
    %c0_172 = arith.constant 0 : index
    %281 = vector.load %arg23[%c0_170, %c0_171, %c0_172] : memref<1x8x32xf32, #tpu.memory_space<vmem>>, vector<1x8x32xf32>
    tpu.vector_store %arg23[%c0_170, %c0_171, %c0_172], %280 {strides = array<i32>} : memref<1x8x32xf32, #tpu.memory_space<vmem>>, vector<1x8x32xf32>,
    return
  }
  func.func @transform_0(%arg0: i32, %arg1: memref<2xi32, #tpu.memory_space<smem>>) -> (i32, i32, i32) {
    %c0_i32 = arith.constant 0 : i32
    %c0_i32_0 = arith.constant 0 : i32
    %c0_i32_1 = arith.constant 0 : i32
    return %arg0, %c0_i32, %c0_i32_0 : i32, i32, i32
  }
  func.func @transform_1(%arg0: i32, %arg1: memref<2xi32, #tpu.memory_space<smem>>) -> (i32, i32) {
    %c0_i32 = arith.constant 0 : i32
    %c0_i32_0 = arith.constant 0 : i32
    %c0_i32_1 = arith.constant 0 : i32
    return %c0_i32, %c0_i32_0 : i32, i32
  }
  func.func @transform_2(%arg0: i32, %arg1: memref<2xi32, #tpu.memory_space<smem>>) -> (i32, i32) {
    %c0_i32 = arith.constant 0 : i32
    %c0_i32_0 = arith.constant 0 : i32
    %c0_i32_1 = arith.constant 0 : i32
    return %c0_i32, %c0_i32_0 : i32, i32
  }
  func.func @transform_3(%arg0: i32, %arg1: memref<2xi32, #tpu.memory_space<smem>>) -> (i32, i32) {
    %c0_i32 = arith.constant 0 : i32
    %c0_i32_0 = arith.constant 0 : i32
    %c0_i32_1 = arith.constant 0 : i32
    return %c0_i32, %c0_i32_0 : i32, i32
  }
  func.func @transform_4(%arg0: i32, %arg1: memref<2xi32, #tpu.memory_space<smem>>) -> (i32, i32) {
    %c0_i32 = arith.constant 0 : i32
    %c0_i32_0 = arith.constant 0 : i32
    %c0_i32_1 = arith.constant 0 : i32
    return %c0_i32, %c0_i32_0 : i32, i32
  }
  func.func @transform_5(%arg0: i32, %arg1: memref<2xi32, #tpu.memory_space<smem>>) -> (i32, i32, i32, i32) {
    %c0_i32 = arith.constant 0 : i32
    %c0_i32_0 = arith.constant 0 : i32
    %c0_i32_1 = arith.constant 0 : i32
    %c0_i32_2 = arith.constant 0 : i32
    %c0_i32_3 = arith.constant 0 : i32
    return %c0_i32, %c0_i32_0, %c0_i32_1, %c0_i32_2 : i32, i32, i32, i32
  }
  func.func @transform_6(%arg0: i32, %arg1: memref<2xi32, #tpu.memory_space<smem>>) -> (i32, i32, i32, i32) {
    %c0_i32 = arith.constant 0 : i32
    %c0_i32_0 = arith.constant 0 : i32
    %c0_i32_1 = arith.constant 0 : i32
    %c0_i32_2 = arith.constant 0 : i32
    %c0_i32_3 = arith.constant 0 : i32
    return %c0_i32, %c0_i32_0, %c0_i32_1, %c0_i32_2 : i32, i32, i32, i32
  }
  func.func @transform_7(%arg0: i32, %arg1: memref<2xi32, #tpu.memory_space<smem>>) -> (i32, i32, i32, i32) {
    %c0_i32 = arith.constant 0 : i32
    %c0_i32_0 = arith.constant 0 : i32
    %c0_i32_1 = arith.constant 0 : i32
    %c0_i32_2 = arith.constant 0 : i32
    %c0_i32_3 = arith.constant 0 : i32
    return %c0_i32, %c0_i32_0, %c0_i32_1, %c0_i32_2 : i32, i32, i32, i32
  }
  func.func @transform_8(%arg0: i32, %arg1: memref<2xi32, #tpu.memory_space<smem>>) -> (i32, i32, i32, i32) {
    %c0_i32 = arith.constant 0 : i32
    %c0_i32_0 = arith.constant 0 : i32
    %c0_i32_1 = arith.constant 0 : i32
    %c0_i32_2 = arith.constant 0 : i32
    %c0_i32_3 = arith.constant 0 : i32
    return %c0_i32, %c0_i32_0, %c0_i32_1, %c0_i32_2 : i32, i32, i32, i32
  }
  func.func @transform_9(%arg0: i32, %arg1: memref<2xi32, #tpu.memory_space<smem>>) -> (i32, i32, i32, i32) {
    %c0_i32 = arith.constant 0 : i32
    %c0_i32_0 = arith.constant 0 : i32
    %c0_i32_1 = arith.constant 0 : i32
    %c0_i32_2 = arith.constant 0 : i32
    %c0_i32_3 = arith.constant 0 : i32
    return %c0_i32, %c0_i32_0, %c0_i32_1, %c0_i32_2 : i32, i32, i32, i32
  }
  func.func @transform_10(%arg0: i32, %arg1: memref<2xi32, #tpu.memory_space<smem>>) -> (i32, i32, i32, i32) {
    %c0_i32 = arith.constant 0 : i32
    %c0_i32_0 = arith.constant 0 : i32
    %c0_i32_1 = arith.constant 0 : i32
    %c0_i32_2 = arith.constant 0 : i32
    %c0_i32_3 = arith.constant 0 : i32
    return %c0_i32, %c0_i32_0, %c0_i32_1, %c0_i32_2 : i32, i32, i32, i32
  }
  func.func @transform_11(%arg0: i32, %arg1: memref<2xi32, #tpu.memory_space<smem>>) -> (i32, i32, i32, i32) {
    %c0_i32 = arith.constant 0 : i32
    %c0_i32_0 = arith.constant 0 : i32
    %c0_i32_1 = arith.constant 0 : i32
    %c0_i32_2 = arith.constant 0 : i32
    %c0_i32_3 = arith.constant 0 : i32
    return %c0_i32, %c0_i32_0, %c0_i32_1, %c0_i32_2 : i32, i32, i32, i32
  }
  func.func @transform_12(%arg0: i32, %arg1: memref<2xi32, #tpu.memory_space<smem>>) -> (i32, i32, i32) {
    %c0_i32 = arith.constant 0 : i32
    %c0_i32_0 = arith.constant 0 : i32
    %c0_i32_1 = arith.constant 0 : i32
    %c0_i32_2 = arith.constant 0 : i32
    return %c0_i32, %c0_i32_0, %c0_i32_1 : i32, i32, i32
  }
  func.func @transform_13(%arg0: i32, %arg1: memref<2xi32, #tpu.memory_space<smem>>) -> (i32, i32, i32) {
    %c0_i32 = arith.constant 0 : i32
    %c0_i32_0 = arith.constant 0 : i32
    %c0_i32_1 = arith.constant 0 : i32
    %c0_i32_2 = arith.constant 0 : i32
    return %c0_i32, %c0_i32_0, %c0_i32_1 : i32, i32, i32
  }
  func.func @transform_14(%arg0: i32, %arg1: memref<2xi32, #tpu.memory_space<smem>>) -> (i32, i32, i32) {
    %c0_i32 = arith.constant 0 : i32
    %c0_i32_0 = arith.constant 0 : i32
    %c0_i32_1 = arith.constant 0 : i32
    %c0_i32_2 = arith.constant 0 : i32
    return %c0_i32, %c0_i32_0, %c0_i32_1 : i32, i32, i32
  }
  func.func @transform_15(%arg0: i32, %arg1: memref<2xi32, #tpu.memory_space<smem>>) -> (i32, i32, i32) {
    %c0_i32 = arith.constant 0 : i32
    %c0_i32_0 = arith.constant 0 : i32
    %c0_i32_1 = arith.constant 0 : i32
    %c0_i32_2 = arith.constant 0 : i32
    return %c0_i32, %c0_i32_0, %c0_i32_1 : i32, i32, i32
  }
  func.func @transform_16(%arg0: i32, %arg1: memref<2xi32, #tpu.memory_space<smem>>) -> (i32, i32, i32) {
    %c0_i32 = arith.constant 0 : i32
    %c0_i32_0 = arith.constant 0 : i32
    %c0_i32_1 = arith.constant 0 : i32
    %c0_i32_2 = arith.constant 0 : i32
    return %c0_i32, %c0_i32_0, %c0_i32_1 : i32, i32, i32
  }
  func.func @transform_17(%arg0: i32, %arg1: memref<2xi32, #tpu.memory_space<smem>>) -> (i32, i32, i32) {
    %c0_i32 = arith.constant 0 : i32
    %c0_i32_0 = arith.constant 0 : i32
    %c0_i32_1 = arith.constant 0 : i32
    %c0_i32_2 = arith.constant 0 : i32
    return %c0_i32, %c0_i32_0, %c0_i32_1 : i32, i32, i32
  }
  func.func @transform_18(%arg0: i32, %arg1: memref<2xi32, #tpu.memory_space<smem>>) -> (i32, i32, i32) {
    %c0_i32 = arith.constant 0 : i32
    %c0_i32_0 = arith.constant 0 : i32
    %c0_i32_1 = arith.constant 0 : i32
    %c0_i32_2 = arith.constant 0 : i32
    return %c0_i32, %c0_i32_0, %c0_i32_1 : i32, i32, i32
  }
  func.func @transform_19(%arg0: i32, %arg1: memref<2xi32, #tpu.memory_space<smem>>) -> (i32, i32, i32) {
    %c0_i32 = arith.constant 0 : i32
    %c0_i32_0 = arith.constant 0 : i32
    %c0_i32_1 = arith.constant 0 : i32
    %c0_i32_2 = arith.constant 0 : i32
    return %c0_i32, %c0_i32_0, %c0_i32_1 : i32, i32, i32
  }
  func.func @transform_20(%arg0: i32, %arg1: memref<2xi32, #tpu.memory_space<smem>>) -> (i32, i32, i32) {
    %c0_i32 = arith.constant 0 : i32
    %c0_i32_0 = arith.constant 0 : i32
    %c0_i32_1 = arith.constant 0 : i32
    %c0_i32_2 = arith.constant 0 : i32
    return %c0_i32, %c0_i32_0, %c0_i32_1 : i32, i32, i32
  }
  func.func @transform_21(%arg0: i32, %arg1: memref<2xi32, #tpu.memory_space<smem>>) -> (i32, i32, i32) {
    %c0_i32 = arith.constant 0 : i32
    %c0_i32_0 = arith.constant 0 : i32
    %c0_i32_1 = arith.constant 0 : i32
    return %arg0, %c0_i32, %c0_i32_0 : i32, i32, i32
  }
}

</mosaic_0001>

<bundles_post_ra>
// kernel: tpu_custom_call.1
= control target key start
LH: loop header
LB: loop body
LE: loop exit
PB: predicated region body
PF: predicated region fallthrough
CT: control target
= control target key end

     0   :  { %s7352_s0 = inlined_call_operand.vmem [shape: s32[2], index: 0, kind: input, shape index: {}]   ;;  %s7353_s1 = inlined_call_operand.vmem [shape: f32[2,8,32], index: 1, kind: input, shape index: {}]   ;;  %s7354_s2 = inlined_call_operand.vmem [shape: f32[32,32], index: 2, kind: input, shape index: {}]   ;;  %s7355_s3 = inlined_call_operand.vmem [shape: f32[1,32], index: 3, kind: input, shape index: {}]   ;;  %s7356_s4 = inlined_call_operand.vmem [shape: f32[1,32], index: 4, kind: input, shape index: {}]   ;;  %s7357_s5 = inlined_call_operand.vmem [shape: f32[1,32], index: 5, kind: input, shape index: {}]   ;;  %s7358_s6 = inlined_call_operand.vmem [shape: f32[2,4,32,8], index: 6, kind: input, shape index: {}]   ;;  %s7359_s7 = inlined_call_operand.vmem [shape: f32[2,4,32,8], index: 7, kind: input, shape index: {}]   ;;  %s7360_s8 = inlined_call_operand.vmem [shape: f32[2,4,32,8], index: 8, kind: input, shape index: {}]   ;;  %s7361_s9 = inlined_call_operand.vmem [shape: f32[2,4,1,8], index: 9, kind: input, shape index: {}]   ;;  %s7362_s10 = inlined_call_operand.vmem [shape: f32[2,4,1,8], index: 10, kind: input, shape index: {}]   ;;  %s7363_s11 = inlined_call_operand.vmem [shape: f32[2,4,1,8], index: 11, kind: input, shape index: {}]   ;;  %s7364_s12 = inlined_call_operand.vmem [shape: f32[2,4,8,32], index: 12, kind: input, shape index: {}]   ;;  %s7365_s13 = inlined_call_operand.vmem [shape: f32[2,1,32], index: 13, kind: input, shape index: {}]   ;;  %s7366_s14 = inlined_call_operand.vmem [shape: f32[2,1,32], index: 14, kind: input, shape index: {}]   ;;  %s7367_s15 = inlined_call_operand.vmem [shape: f32[2,1,32], index: 15, kind: input, shape index: {}]   ;;  %s7368_s16 = inlined_call_operand.vmem [shape: f32[2,32,64], index: 16, kind: input, shape index: {}]   ;;  %s7369_s17 = inlined_call_operand.vmem [shape: f32[2,1,64], index: 17, kind: input, shape index: {}]   ;;  %s7370_s18 = inlined_call_operand.vmem [shape: f32[2,64,32], index: 18, kind: input, shape index: {}]   ;;  %s7371_s19 = inlined_call_operand.vmem [shape: f32[2,1,32], index: 19, kind: input, shape index: {}]   ;;  %s7372_s20 = inlined_call_operand.vmem [shape: f32[2,1,32], index: 20, kind: input, shape index: {}]   ;;  %s7373_s21 = inlined_call_operand.vmem [shape: f32[2,1,32], index: 21, kind: input, shape index: {}]   ;;  %s7374_s22 = inlined_call_operand.hbm [shape: f32[2,8,32], index: 22, kind: output, shape index: {}]  }
   0x1   :  { %7385 = sst [smem:[#allocation12_spill]] %s7352_s0 }
   0x2   :  { %7386 = sst [smem:[#allocation13_spill]] %s7353_s1 }
   0x3   :  { %7387 = sst [smem:[#allocation14_spill]] %s7354_s2 }
   0x4   :  { %7388 = sst [smem:[#allocation15_spill]] %s7355_s3 }
   0x5   :  { %7389 = sst [smem:[#allocation16_spill]] %s7356_s4 }
   0x6   :  { %7390 = sst [smem:[#allocation17_spill]] %s7357_s5 }
   0x7   :  { %7391 = sst [smem:[#allocation18_spill]] %s7358_s6 }
   0x8   :  { %7392 = sst [smem:[#allocation19_spill]] %s7359_s7 }
   0x9   :  { %7393 = sst [smem:[#allocation20_spill]] %s7360_s8 }
   0xa   :  { %7394 = sst [smem:[#allocation21_spill]] %s7367_s15 }
   0xb   :  { %s7395_s29 = sld [smem:[#allocation12_spill]] }
  0x11   :  { %s27_s15 = sshll.u32 %s7395_s29, 4  ;;  %s28_s15 = int_to_ptr.vmem [resolvable:$true] %s27_s15 }
  0x12   :  { %s6135_s30 = scalar_lea.vmem %s28_s15, 16  ;;  %p6140_p1 = scmp.lt.s32.totalorder %s28_s15, %s28_s15 }
  0x13   :  { %p6136_p0 = scmp.ne.s32.totalorder %s28_s15, %s6135_s30  ;;  %p6141_p2 = scmp.lt.s32.totalorder %s6135_s30, %s6135_s30 }
  0x15   :  { %p6142_p3 = por %p6141_p2, %p6140_p1 }
  0x17   :  { %p6143_p4 = pnand %p6142_p3, %p6136_p0 }
  0x19   :  { %6146 = shalt.err (!%p6143_p4)  }
  0x1a   :  { %s6211_s4 = smov [#allocation3]  }
  0x1b   :  { %30 = dma.vmem_to_smem %s28_s15, 16, %s6211_s4, [#allocation2] }
  0x1c   :  { %6189 = dma.done.wait [#allocation2], 16 }
  0x1d   :  { %6190 = vsyncadd [#allocation2], 4294967280 }
  0x1e   :  { %32 = sfence }
  0x1f   :  { %33 = vsyncpa [#allocation5], 0 }
  0x20   :  { %35 = vsyncpa [#allocation5 + $0x1], 0  ;;  %s6333_s0 = smov 0   ;;  %s6335_s23 = smov 0  }
  0x21   :  { %s6337_s1 = smov 0   ;;  %s6339_s5 = smov 0  }
  0x22 LB: > { %7396 = sst [smem:[#allocation8_spill]] %s6205_s1  ;;  %s6354_s15 = sadd.s32 4294967295, %s6209_s5   ;;  %s6209_s5 = sphi %s6339_s5, %s7414_s5   ;;  %s6205_s1 = sphi %s6337_s1, %s7416_s1   ;;  %s6201_s23 = sphi %s6335_s23, %s7418_s23   ;;  %s6197_s0 = sphi %s6333_s0, %s7417_s0  }
  0x23   : > { %s5200_s24 = sadd.s32 4294967294, %s6209_s5   ;;  %s6358_s6 = sadd.s32 1, %s6209_s5  }
  0x24   : > { %7397 = sst [smem:[#allocation9_spill]] %s6358_s6  ;;  %s494_s25 = sadd.s32 1, %s6205_s1 }
  0x25   : > { %s491_s26 = ssub.s32 %s6209_s5, %s6358_s6  ;;  %p504_p5 = scmp.ne.s32.totalorder %s6205_s1, %s6201_s23 }
  0x26   : > { %p492_p6 = scmp.eq.s32.totalorder %s491_s26, 0  ;;  %p505_p7 = scmp.eq.s32.totalorder %s6354_s15, 1 }
  0x27   : > { %p510_p8 = scmp.ne.s32.totalorder %s6201_s23, %s6197_s0  ;;  %p511_p9 = scmp.eq.s32.totalorder %s5200_s24, 1 }
  0x28   : > { %s6369_s2 = scalar_select %p492_p6, %s6205_s1, %s494_s25  }
  0x29   : > { %p6371_p10 = por %p505_p7, %p504_p5  ;;  %p6375_p11 = por %p511_p9, %p510_p8 }
  0x2a   : > { %7398 = sst [smem:[#allocation10_spill]] %s6369_s2  ;;  %p5203_p12 = scmp.ge.s32.totalorder %s6209_s5, 1 }
  0x2b   : > { %s7400_s3 = scalar_select %p6375_p11, 1, 0 }
  0x2c   : > { %p596_p13 = scmp.lt.s32.totalorder %s6209_s5, 3 }
  0x2d   : > { %7401 = sst [smem:[#allocation11_spill]] %s7400_s3 }
  0x2e   : > { %p597_p0 = pnand %p5203_p12, %p596_p13 }
  0x2f   : > { %s7402_s30 = sld [smem:[#allocation14_spill]] (!%p597_p0)  ;;  %p655_p1 = scmp.lt.s32.totalorder (!%p597_p0), %s6354_s15, 1 }
  0x30   : > { %600 = sbr.rel (%p597_p0) target bundleno = 4863 (0x12ff), region = 104  ;;  %s7403_s6 = sld [smem:[#allocation13_spill]] (!%p597_p0) }
  0x31   : > { %s7404_s28 = sld [smem:[#allocation15_spill]] (!%p597_p0) }
  0x32   : > { %s7405_s2 = sld [smem:[#allocation18_spill]] (!%p597_p0) }
  0x33   : > { %s7406_s1 = sld [smem:[#allocation16_spill]] (!%p597_p0) }
  0x34   : > { %s7408_s7 = sld [smem:[#allocation19_spill]] (!%p597_p0) }
  0x35   : > { %v663_v0 = vld [vmem:[%s7402_s30 + $0x18] sm:$0xff]  ;;  %v6212_v1 = vmov 0.0   ;;  %v662_v2 = vld [vmem:[%s7402_s30 + $0x10] sm:$0xff]  ;;  %vm6213_vm0 = vmmov 0   ;;  %s656_s25 = scalar_select %p655_p1, %s6354_s15, 1  ;;  %v661_v3 = vld [vmem:[%s7402_s30 + $0x8] sm:$0xff] }
  0x36   : > { %5596 = vmatprep.subr.mxu0 %v6212_v1  ;;  %5604 = vmatprep.mubr.msk.f32.mxu0 %vm6213_vm0, %v6212_v1  ;;  %v660_v4 = vld [vmem:[%s7402_s30] sm:$0xff]  ;;  %vm671_vm1 = vcmask 261120   ;;  %s7409_s8 = sld [smem:[#allocation20_spill]]  ;;  %vm1755_vm2 = vcmask 64512   ;;  %vm2843_vm4 = vcmask 523264  }
  0x37   : > { %5597 = vmatpush3.msra.mxu0 %v663_v0  ;;  %5607 = vmatprep.subr.mxu1 %v6212_v1  ;;  %s5205_s29 = sshll.u32 %s656_s25, 3  ;;  %v5206_v6 = vld [vmem:[%s7404_s28] ss:$0 sm:$0xff]  ;;  %s652_s25 = sand.u32 1, %s6201_s23  }
  0x38   : > { %5598 = vmatprep.subr.mxu0 %v6212_v1  ;;  %5615 = vmatprep.mubr.msk.f32.mxu1 %vm6213_vm0, %v6212_v1  ;;  %s658_s3 = scalar_lea.vmem %s7403_s6, %s5205_s29  ;;  %v783_v16 = vld [vmem:[%s7405_s2 + $0x18] sm:$0xff]  ;;  %v782_v18 = vld [vmem:[%s7405_s2 + $0x10] sm:$0xff]  ;;  %v781_v20 = vld [vmem:[%s7405_s2 + $0x8] sm:$0xff]  ;;  %s7407_s29 = sld [smem:[#allocation17_spill]] }
  0x39   : > { %5599 = vmatpush3.msra.mxu0 %v662_v2  ;;  %v659_v5 = vld [vmem:[%s658_s3] sm:$0xff]  ;;  %v787_v17 = vld [vmem:[%s7405_s2 + $0x38] sm:$0xff]  ;;  %5608 = vmatpush3.msra.mxu1 %v783_v16  ;;  %v786_v19 = vld [vmem:[%s7405_s2 + $0x30] sm:$0xff]  ;;  %s7412_s6 = sld [smem:[#allocation21_spill]]  ;;  %s5204_s26 = sshll.u32 %s652_s25, 3 }
  0x3a   : > { %5600 = vmatprep.subr.mxu0 %v6212_v1  ;;  %5609 = vmatprep.subr.mxu1 %v6212_v1  ;;  %v785_v21 = vld [vmem:[%s7405_s2 + $0x28] sm:$0xff]  ;;  %v780_v22 = vld [vmem:[%s7405_s2] sm:$0xff]  ;;  %v791_v33 = vld [vmem:[%s7405_s2 + $0x58] sm:$0xff]  ;;  %s654_s4 = scalar_lea.vmem [#allocation4], %s5204_s26 }
  0x3b   : > { %5601 = vmatpush3.msra.mxu0 %v661_v3  ;;  %5610 = vmatpush3.msra.mxu1 %v782_v18  ;;  %v784_v23 = vld [vmem:[%s7405_s2 + $0x20] sm:$0xff]  ;;  %v795_v34 = vld [vmem:[%s7405_s2 + $0x78] sm:$0xff]  ;;  %v790_v35 = vld [vmem:[%s7405_s2 + $0x50] sm:$0xff]  ;;  %s5141_s24 = sshll.u32 %s654_s4, 4  ;;  %s5142_s24 = int_to_ptr.vmem [resolvable:$true] %s5141_s24 }
  0x3c   : > { %5602 = vmatprep.subr.mxu0 %v6212_v1  ;;  %5611 = vmatprep.subr.mxu1 %v6212_v1  ;;  %v5208_v28 = vld [vmem:[%s7406_s1] ss:$0 sm:$0xff]  ;;  %v794_v36 = vld [vmem:[%s7405_s2 + $0x70] sm:$0xff]  ;;  %v789_v37 = vld [vmem:[%s7405_s2 + $0x48] sm:$0xff]  ;;  %s6147_s28 = scalar_lea.vmem %s5142_s24, 128  ;;  %s6214_s1 = smov [#allocation4]  }
  0x3d   : > { %5603 = vmatpush3.msra.mxu0 %v660_v4  ;;  %5612 = vmatpush3.msra.mxu1 %v781_v20  ;;  %v793_v38 = vld [vmem:[%s7405_s2 + $0x68] sm:$0xff]  ;;  %v788_v39 = vld [vmem:[%s7405_s2 + $0x40] sm:$0xff]  ;;  %v1110_v41 = vld [vmem:[%s7408_s7 + $0x18] sm:$0xff]  ;;  %p6148_p2 = scmp.ne.s32.totalorder %s5142_s24, %s6147_s28  ;;  %s6151_s30 = sshll.u32 %s6214_s1, 4  ;;  %s6152_s30 = int_to_ptr.vmem [resolvable:$false] %s6151_s30 }
  0x3e   : > { %5605 = vmatmul.mubr.msk.f32.vlgmr.msra.gmra.mxu0 %vm671_vm1, %v659_v5  ;;  %5618 = vmatprep.subr.mxu0 %v6212_v1  ;;  %v5209_v30 = vld [vmem:[%s7407_s29] ss:$0 sm:$0xff]  ;;  %v1114_v42 = vld [vmem:[%s7408_s7 + $0x38] sm:$0xff]  ;;  %v1109_v43 = vld [vmem:[%s7408_s7 + $0x10] sm:$0xff]  ;;  %s777_s29 = sld [smem:[#allocation3 + %s6354_s15]]  ;;  %p6154_p5 = scmp.lt.s32.totalorder %s5142_s24, %s6152_s30 }
  0x3f   : > { %5626 = vmatprep.mubr.msk.f32.mxu0 %vm6213_vm0, %v6212_v1  ;;  %5619 = vmatpush3.msra.mxu0 %v787_v17  ;;  %v792_v40 = vld [vmem:[%s7405_s2 + $0x60] sm:$0xff]  ;;  %v1113_v44 = vld [vmem:[%s7408_s7 + $0x30] sm:$0xff]  ;;  %v1108_v45 = vld [vmem:[%s7408_s7 + $0x8] sm:$0xff]  ;;  %p6149_p3 = pnand %p6148_p2, %p6371_p10 }
  0x40   : > { %5620 = vmatprep.subr.mxu0 %v6212_v1  ;;  %5613 = vmatprep.subr.mxu1 %v6212_v1  ;;  %v1112_v46 = vld [vmem:[%s7408_s7 + $0x28] sm:$0xff]  ;;  %v1107_v47 = vld [vmem:[%s7408_s7] sm:$0xff]  ;;  %v1118_v49 = vld [vmem:[%s7408_s7 + $0x58] sm:$0xff] }
  0x41   : > { %5621 = vmatpush3.msra.mxu0 %v786_v19  ;;  %5614 = vmatpush3.msra.mxu1 %v780_v22  ;;  %v1111_v48 = vld [vmem:[%s7408_s7 + $0x20] sm:$0xff]  ;;  %v1122_v50 = vld [vmem:[%s7408_s7 + $0x78] sm:$0xff]  ;;  %v1117_v51 = vld [vmem:[%s7408_s7 + $0x50] sm:$0xff]  ;;  %p6150_p4 = pneg %p6149_p3 }
  0x42   : > { %5622 = vmatprep.subr.mxu0 %v6212_v1  ;;  %5629 = vmatprep.subr.mxu1 %v6212_v1  ;;  %v1121_v52 = vld [vmem:[%s7408_s7 + $0x70] sm:$0xff]  ;;  %v1116_v53 = vld [vmem:[%s7408_s7 + $0x48] sm:$0xff]  ;;  %v1115_v55 = vld [vmem:[%s7408_s7 + $0x40] sm:$0xff] }
  0x43   : > { %5623 = vmatpush3.msra.mxu0 %v785_v21  ;;  %v1120_v54 = vld [vmem:[%s7408_s7 + $0x68] sm:$0xff]  ;;  %v1119_v56 = vld [vmem:[%s7408_s7 + $0x60] sm:$0xff]  ;;  %v1434_v57 = vld [vmem:[%s7409_s8 + $0x18] sm:$0xff] }
  0x44   : > { %5624 = vmatprep.subr.mxu0 %v6212_v1  ;;  %v1438_v58 = vld [vmem:[%s7409_s8 + $0x38] sm:$0xff]  ;;  %v1433_v59 = vld [vmem:[%s7409_s8 + $0x10] sm:$0xff]  ;;  %v1432_v61 = vld [vmem:[%s7409_s8 + $0x8] sm:$0xff] }
  0x45   : > { %5625 = vmatpush3.msra.mxu0 %v784_v23  ;;  %v1437_v60 = vld [vmem:[%s7409_s8 + $0x30] sm:$0xff]  ;;  %v1436_v62 = vld [vmem:[%s7409_s8 + $0x28] sm:$0xff]  ;;  %v1431_v63 = vld [vmem:[%s7409_s8] sm:$0xff] }
  0x46   : > { %5640 = vmatprep.subr.mxu0 %v6212_v1  ;;  %v1435_v0 = vld [vmem:[%s7409_s8 + $0x20] sm:$0xff]  ;;  %v1442_v2 = vld [vmem:[%s7409_s8 + $0x58] sm:$0xff]  ;;  %v1441_v4 = vld [vmem:[%s7409_s8 + $0x50] sm:$0xff] }
  0x47   : > { %v1446_v3 = vld [vmem:[%s7409_s8 + $0x78] sm:$0xff]  ;;  %v1445_v5 = vld [vmem:[%s7409_s8 + $0x70] sm:$0xff]  ;;  %v5218_v18 = vld [vmem:[%s7362_s10] ss:$0 sm:$0xff] }
  0x48   : > { %v5219_v19 = vld [vmem:[%s7362_s10 + $0x1] ss:$0 sm:$0xff]  ;;  %v5210_v22 = vld [vmem:[%s7361_s9] ss:$0 sm:$0xff] }
  0x49   : > { %v5211_v23 = vld [vmem:[%s7361_s9 + $0x1] ss:$0 sm:$0xff] }
  0xfe   : > { %v741_v7 = vpop.f32.mrf.mxu0 }
  0xff   : > { %v742_v8 = vadd.f32 %v5206_v6, %v741_v7  ;;  %v1440_v6 = vld [vmem:[%s7409_s8 + $0x48] sm:$0xff] }
 0x100   : > { %v5606_v9 = vpop.f32.mrf.mxu0  ;;  %v1444_v7 = vld [vmem:[%s7409_s8 + $0x68] sm:$0xff] }
 0x101   : > { %v747_v10 = vsel %vm671_vm1, %v742_v8, 0.0  ;;  %v1443_v9 = vld [vmem:[%s7409_s8 + $0x60] sm:$0xff] }
 0x102   : > { %748 = vadd.xlane.f32.xlu0 %v747_v10 }
 0x18b   : > { %v749_v11 = vpop.xlane.xlu0 %748 }
 0x18c   : > { %v751_v12 = vmul.f32 0.03125, %v749_v11 }
 0x18e   : > { %v752_v13 = vsub.f32 %v742_v8, %v751_v12  ;;  %v1439_v8 = vld [vmem:[%s7409_s8 + $0x40] sm:$0xff] }
 0x190   : > { %v753_v14 = vmul.f32 %v752_v13, %v752_v13 }
 0x192   : > { %v754_v15 = vsel %vm671_vm1, %v753_v14, 0.0 }
 0x193   : > { %755 = vadd.xlane.f32.xlu0 %v754_v15 }
 0x21c   : > { %v756_v24 = vpop.xlane.xlu0 %755 }
 0x21d   : > { %v757_v25 = vmul.f32 0.03125, %v756_v24 }
 0x21f   : > { %v758_v26 = vadd.f32 1e-05, %v757_v25 }
 0x221   : > { %6093 = vrsqrt.f32 %v758_v26 }
 0x22e   : > { %v6094_v27 = vpop.eup %6093 }
 0x22f   : > { %v760_v29 = vmul.f32 %v6094_v27, %v752_v13 }
 0x231   : > { %v767_v31 = vmul.f32 %v5208_v28, %v760_v29 }
 0x233   : > { %v6454_v32 = vadd.f32 %v5209_v30, %v767_v31  ;;  %v5220_v30 = vld [vmem:[%s7362_s10 + $0x2] ss:$0 sm:$0xff]  ;;  %v5221_v31 = vld [vmem:[%s7362_s10 + $0x3] ss:$0 sm:$0xff] }
 0x235   : > { %5616 = vmatmul.mubr.msk.f32.vlgmr.msra.gmra.mxu1 %vm671_vm1, %v6454_v32  ;;  %5627 = vmatmul.mubr.msk.f32.vlgmr.msra.gmra.mxu0 %vm671_vm1, %v6454_v32 }
 0x236   : > { %5630 = vmatpush3.msra.mxu1 %v791_v33  ;;  %5641 = vmatpush3.msra.mxu0 %v795_v34 }
 0x237   : > { %5631 = vmatprep.subr.mxu1 %v6212_v1  ;;  %5642 = vmatprep.subr.mxu0 %v6212_v1 }
 0x238   : > { %5632 = vmatpush3.msra.mxu1 %v790_v35  ;;  %5643 = vmatpush3.msra.mxu0 %v794_v36  ;;  %v5212_v35 = vld [vmem:[%s7361_s9 + $0x2] ss:$0 sm:$0xff]  ;;  %v5213_v36 = vld [vmem:[%s7361_s9 + $0x3] ss:$0 sm:$0xff] }
 0x239   : > { %5633 = vmatprep.subr.mxu1 %v6212_v1  ;;  %5644 = vmatprep.subr.mxu0 %v6212_v1 }
 0x23a   : > { %5634 = vmatpush3.msra.mxu1 %v789_v37  ;;  %5645 = vmatpush3.msra.mxu0 %v793_v38 }
 0x23b   : > { %5635 = vmatprep.subr.mxu1 %v6212_v1  ;;  %5646 = vmatprep.subr.mxu0 %v6212_v1 }
 0x23c   : > { %5636 = vmatpush3.msra.mxu1 %v788_v39  ;;  %5637 = vmatprep.mubr.msk.f32.mxu1 %vm6213_vm0, %v6212_v1 }
 0x23d   : > { %5647 = vmatpush3.msra.mxu0 %v792_v40  ;;  %5648 = vmatprep.mubr.msk.f32.mxu0 %vm6213_vm0, %v6212_v1 }
 0x23e   : > { %5638 = vmatmul.mubr.msk.f32.vlgmr.msra.gmra.mxu1 %vm671_vm1, %v6454_v32  ;;  %5649 = vmatmul.mubr.msk.f32.vlgmr.msra.gmra.mxu0 %vm671_vm1, %v6454_v32 }
 0x23f   : > { %5651 = vmatprep.subr.mxu1 %v6212_v1  ;;  %5662 = vmatprep.subr.mxu0 %v6212_v1 }
 0x240   : > { %5652 = vmatpush3.msra.mxu1 %v1110_v41  ;;  %5663 = vmatpush3.msra.mxu0 %v1114_v42 }
 0x241   : > { %5653 = vmatprep.subr.mxu1 %v6212_v1  ;;  %5664 = vmatprep.subr.mxu0 %v6212_v1 }
 0x242   : > { %5654 = vmatpush3.msra.mxu1 %v1109_v43  ;;  %5665 = vmatpush3.msra.mxu0 %v1113_v44  ;;  %v5226_v43 = vld [vmem:[%s7363_s11] ss:$0 sm:$0xff]  ;;  %v5227_v44 = vld [vmem:[%s7363_s11 + $0x1] ss:$0 sm:$0xff] }
 0x243   : > { %5655 = vmatprep.subr.mxu1 %v6212_v1  ;;  %5666 = vmatprep.subr.mxu0 %v6212_v1 }
 0x244   : > { %5656 = vmatpush3.msra.mxu1 %v1108_v45  ;;  %5667 = vmatpush3.msra.mxu0 %v1112_v46 }
 0x245   : > { %5657 = vmatprep.subr.mxu1 %v6212_v1  ;;  %5668 = vmatprep.subr.mxu0 %v6212_v1 }
 0x246   : > { %5658 = vmatpush3.msra.mxu1 %v1107_v47  ;;  %5659 = vmatprep.mubr.msk.f32.mxu1 %vm6213_vm0, %v6212_v1 }
 0x247   : > { %5669 = vmatpush3.msra.mxu0 %v1111_v48  ;;  %5670 = vmatprep.mubr.msk.f32.mxu0 %vm6213_vm0, %v6212_v1 }
 0x248   : > { %5660 = vmatmul.mubr.msk.f32.vlgmr.msra.gmra.mxu1 %vm671_vm1, %v6454_v32  ;;  %5671 = vmatmul.mubr.msk.f32.vlgmr.msra.gmra.mxu0 %vm671_vm1, %v6454_v32 }
 0x249   : > { %5673 = vmatprep.subr.mxu1 %v6212_v1  ;;  %5684 = vmatprep.subr.mxu0 %v6212_v1 }
 0x24a   : > { %5674 = vmatpush3.msra.mxu1 %v1118_v49  ;;  %5685 = vmatpush3.msra.mxu0 %v1122_v50 }
 0x24b   : > { %5675 = vmatprep.subr.mxu1 %v6212_v1  ;;  %5686 = vmatprep.subr.mxu0 %v6212_v1 }
 0x24c   : > { %5676 = vmatpush3.msra.mxu1 %v1117_v51  ;;  %5687 = vmatpush3.msra.mxu0 %v1121_v52 }
 0x24d   : > { %5677 = vmatprep.subr.mxu1 %v6212_v1  ;;  %5688 = vmatprep.subr.mxu0 %v6212_v1 }
 0x24e   : > { %5678 = vmatpush3.msra.mxu1 %v1116_v53  ;;  %5689 = vmatpush3.msra.mxu0 %v1120_v54 }
 0x24f   : > { %5679 = vmatprep.subr.mxu1 %v6212_v1  ;;  %5690 = vmatprep.subr.mxu0 %v6212_v1 }
 0x250   : > { %5680 = vmatpush3.msra.mxu1 %v1115_v55  ;;  %5681 = vmatprep.mubr.msk.f32.mxu1 %vm6213_vm0, %v6212_v1  ;;  %v775_v55 = vlaneseq }
 0x251   : > { %5691 = vmatpush3.msra.mxu0 %v1119_v56  ;;  %5692 = vmatprep.mubr.msk.f32.mxu0 %vm6213_vm0, %v6212_v1 }
 0x252   : > { %5682 = vmatmul.mubr.msk.f32.vlgmr.msra.gmra.mxu1 %vm671_vm1, %v6454_v32  ;;  %5693 = vmatmul.mubr.msk.f32.vlgmr.msra.gmra.mxu0 %vm671_vm1, %v6454_v32  ;;  %v776_v56 = vand.u32 127, %v775_v55 }
 0x253   : > { %5695 = vmatprep.subr.mxu1 %v6212_v1  ;;  %5706 = vmatprep.subr.mxu0 %v6212_v1 }
 0x254   : > { %5696 = vmatpush3.msra.mxu1 %v1434_v57  ;;  %5707 = vmatpush3.msra.mxu0 %v1438_v58  ;;  %v778_v57 = vstv %s777_s29  ;;  %s5392_s29 = sshll.u32 %s6354_s15, 7  ;;  %s6153_s15 = scalar_lea.vmem %s6152_s30, 256 }
 0x255   : > { %5697 = vmatprep.subr.mxu1 %v6212_v1  ;;  %5708 = vmatprep.subr.mxu0 %v6212_v1  ;;  %vm6721_vm3 = vcmp.lt.s32.totalorder %v776_v56, %v778_v57  ;;  %p6155_p6 = scmp.lt.s32.totalorder %s6153_s15, %s6147_s28 }
 0x256   : > { %5698 = vmatpush3.msra.mxu1 %v1433_v59  ;;  %5709 = vmatpush3.msra.mxu0 %v1437_v60 }
 0x257   : > { %5699 = vmatprep.subr.mxu1 %v6212_v1  ;;  %5710 = vmatprep.subr.mxu0 %v6212_v1  ;;  %p6156_p7 = por %p6155_p6, %p6154_p5 }
 0x258   : > { %5700 = vmatpush3.msra.mxu1 %v1432_v61  ;;  %5711 = vmatpush3.msra.mxu0 %v1436_v62 }
 0x259   : > { %5701 = vmatprep.subr.mxu1 %v6212_v1  ;;  %5712 = vmatprep.subr.mxu0 %v6212_v1  ;;  %p6157_p8 = pnand %p6156_p7, %p6150_p4 }
 0x25a   : > { %5702 = vmatpush3.msra.mxu1 %v1431_v63  ;;  %5703 = vmatprep.mubr.msk.f32.mxu1 %vm6213_vm0, %v6212_v1 }
 0x25b   : > { %5713 = vmatpush3.msra.mxu0 %v1435_v0  ;;  %5714 = vmatprep.mubr.msk.f32.mxu0 %vm6213_vm0, %v6212_v1 }
 0x25c   : > { %5704 = vmatmul.mubr.msk.f32.vlgmr.msra.gmra.mxu1 %vm671_vm1, %v6454_v32  ;;  %5715 = vmatmul.mubr.msk.f32.vlgmr.msra.gmra.mxu0 %vm671_vm1, %v6454_v32 }
 0x25d   : > { %5717 = vmatprep.subr.mxu1 %v6212_v1  ;;  %5728 = vmatprep.subr.mxu0 %v6212_v1 }
 0x25e   : > { %5718 = vmatpush3.msra.mxu1 %v1442_v2  ;;  %5729 = vmatpush3.msra.mxu0 %v1446_v3 }
 0x25f   : > { %5719 = vmatprep.subr.mxu1 %v6212_v1  ;;  %5730 = vmatprep.subr.mxu0 %v6212_v1 }
 0x260   : > { %5720 = vmatpush3.msra.mxu1 %v1441_v4  ;;  %5731 = vmatpush3.msra.mxu0 %v1445_v5 }
 0x261   : > { %5721 = vmatprep.subr.mxu1 %v6212_v1  ;;  %5732 = vmatprep.subr.mxu0 %v6212_v1 }
 0x262   : > { %5722 = vmatpush3.msra.mxu1 %v1440_v6  ;;  %5733 = vmatpush3.msra.mxu0 %v1444_v7 }
 0x263   : > { %5723 = vmatprep.subr.mxu1 %v6212_v1  ;;  %5734 = vmatprep.subr.mxu0 %v6212_v1 }
 0x264   : > { %5724 = vmatpush3.msra.mxu1 %v1439_v8  ;;  %5725 = vmatprep.mubr.msk.f32.mxu1 %vm6213_vm0, %v6212_v1 }
 0x265   : > { %5735 = vmatpush3.msra.mxu0 %v1443_v9  ;;  %5736 = vmatprep.mubr.msk.f32.mxu0 %vm6213_vm0, %v6212_v1 }
 0x266   : > { %5726 = vmatmul.mubr.msk.f32.vlgmr.msra.gmra.mxu1 %vm671_vm1, %v6454_v32  ;;  %5737 = vmatmul.mubr.msk.f32.vlgmr.msra.gmra.mxu0 %vm671_vm1, %v6454_v32 }
 0x267   : > { %5739 = vmatprep.subr.mxu0 %v6212_v1  ;;  %5744 = vmatprep.subr.mxu1 %v6212_v1 }
 0x268   : > { %5741 = vmatprep.mubr.msk.f32.mxu0 %vm6213_vm0, %v6212_v1  ;;  %5746 = vmatprep.mubr.msk.f32.mxu1 %vm6213_vm0, %v6212_v1 }
 0x2f5   : > { %v893_v10 = vpop.f32.mrf.mxu1  ;;  %v963_v11 = vpop.f32.mrf.mxu0 }
 0x2f6   : > { %v894_v28 = vadd.f32 %v5210_v22, %v893_v10  ;;  %v964_v29 = vadd.f32 %v5211_v23, %v963_v11 }
 0x2f7   : > { %v5617_v12 = vpop.f32.mrf.mxu1  ;;  %v5628_v13 = vpop.f32.mrf.mxu0 }
 0x2fe   : > { %v1033_v14 = vpop.f32.mrf.mxu1  ;;  %v1103_v15 = vpop.f32.mrf.mxu0 }
 0x2ff   : > { %v1034_v41 = vadd.f32 %v5212_v35, %v1033_v14  ;;  %v1104_v42 = vadd.f32 %v5213_v36, %v1103_v15 }
 0x300   : > { %v5639_v16 = vpop.f32.mrf.mxu1  ;;  %v5650_v17 = vpop.f32.mrf.mxu0 }
 0x308   : > { %v1217_v20 = vpop.f32.mrf.mxu1  ;;  %v1287_v21 = vpop.f32.mrf.mxu0 }
 0x309   : > { %v1218_v24 = vadd.f32 %v5218_v18, %v1217_v20  ;;  %v1288_v25 = vadd.f32 %v5219_v19, %v1287_v21 }
 0x30a   : > { %v5661_v26 = vpop.f32.mrf.mxu1  ;;  %v5672_v27 = vpop.f32.mrf.mxu0 }
 0x30b   : > { %5740 = vmatpush3.xpose.msk.msra.mxu0 %vm1755_vm2, %v1218_v24  ;;  %5745 = vmatpush3.xpose.msk.msra.mxu1 %vm1755_vm2, %v1288_v25 }
 0x30c   : > { %5749 = vmatprep.subr.mxu0 %v6212_v1  ;;  %5754 = vmatprep.subr.mxu1 %v6212_v1 }
 0x30e   : > { %5742 = vmatmul.mubr.msk.f32.vlgmr.msra.gmra.mxu0 %vm1755_vm2, %v894_v28  ;;  %5747 = vmatmul.mubr.msk.f32.vlgmr.msra.gmra.mxu1 %vm1755_vm2, %v964_v29 }
 0x30f   : > { %5751 = vmatprep.mubr.msk.f32.mxu0 %vm6213_vm0, %v6212_v1  ;;  %5756 = vmatprep.mubr.msk.f32.mxu1 %vm6213_vm0, %v6212_v1 }
 0x312   : > { %v1357_v33 = vpop.f32.mrf.mxu1  ;;  %v1427_v34 = vpop.f32.mrf.mxu0 }
 0x313   : > { %v1358_v37 = vadd.f32 %v5220_v30, %v1357_v33  ;;  %v1428_v38 = vadd.f32 %v5221_v31, %v1427_v34 }
 0x314   : > { %v5683_v39 = vpop.f32.mrf.mxu1  ;;  %v5694_v40 = vpop.f32.mrf.mxu0 }
 0x315   : > { %5750 = vmatpush3.xpose.msk.msra.mxu0 %vm1755_vm2, %v1358_v37  ;;  %5755 = vmatpush3.xpose.msk.msra.mxu1 %vm1755_vm2, %v1428_v38  ;;  %v5228_v37 = vld [vmem:[%s7363_s11 + $0x2] ss:$0 sm:$0xff] }
 0x316   : > { %5759 = vmatprep.subr.mxu0 %v6212_v1  ;;  %5764 = vmatprep.subr.mxu1 %v6212_v1 }
 0x318   : > { %5752 = vmatmul.mubr.msk.f32.vlgmr.msra.gmra.mxu0 %vm1755_vm2, %v1034_v41  ;;  %5757 = vmatmul.mubr.msk.f32.vlgmr.msra.gmra.mxu1 %vm1755_vm2, %v1104_v42  ;;  %v5229_v41 = vld [vmem:[%s7363_s11 + $0x3] ss:$0 sm:$0xff] }
 0x319   : > { %5761 = vmatprep.mubr.msk.f32.mxu0 %vm6213_vm0, %v6212_v1  ;;  %5766 = vmatprep.mubr.msk.f32.mxu1 %vm6213_vm0, %v6212_v1 }
 0x31c   : > { %v1541_v45 = vpop.f32.mrf.mxu1  ;;  %v1611_v46 = vpop.f32.mrf.mxu0 }
 0x31d   : > { %v1542_v47 = vadd.f32 %v5226_v43, %v1541_v45  ;;  %v1612_v48 = vadd.f32 %v5227_v44, %v1611_v46 }
 0x31e   : > { %v5705_v49 = vpop.f32.mrf.mxu1  ;;  %v5716_v50 = vpop.f32.mrf.mxu0 }
 0x31f   : > { %5760 = vmatpush3.msra.mxu0 %v1542_v47  ;;  %5765 = vmatpush3.msra.mxu1 %v1612_v48  ;;  %v2402_v49 = vld [vmem:[%s7364_s12] sm:$0xff]  ;;  %v2403_v50 = vld [vmem:[%s7364_s12 + $0x8] sm:$0xff] }
 0x320   : > { %5769 = vmatprep.subr.mxu0 %v6212_v1  ;;  %5774 = vmatprep.subr.mxu1 %v6212_v1 }
 0x326   : > { %v6716_v51 = vpop.f32.mrf.mxu1  ;;  %v6718_v52 = vpop.f32.mrf.mxu0 }
 0x327   : > { %v1682_v40 = vadd.f32 %v5228_v37, %v6716_v51  ;;  %v1752_v44 = vadd.f32 %v5229_v41, %v6718_v52  ;;  %v2404_v51 = vld [vmem:[%s7364_s12 + $0x10] sm:$0xff] }
 0x328   : > { %v5727_v53 = vpop.f32.mrf.mxu1  ;;  %v5738_v54 = vpop.f32.mrf.mxu0  ;;  %v2830_v41 = vld [vmem:[%s7370_s18 + $0x10] sm:$0xff] }
 0x329   : > { %v2405_v54 = vld [vmem:[%s7364_s12 + $0x18] sm:$0xff] }
 0x3ce   : > { %v1828_v59 = vpop.f32.mrf.mxu0  ;;  %v1904_v60 = vpop.f32.mrf.mxu1 }
 0x3cf   : > { %v2062_v61 = vsel %vm6721_vm3, %v1828_v59, -1e+30  ;;  %v2063_v2 = vsel %vm6721_vm3, %v1904_v60, -1e+30 }
 0x3d0   : > { %v5743_v62 = vpop.f32.mrf.mxu0  ;;  %v5748_v63 = vpop.f32.mrf.mxu1  ;;  %v2066_v0 = vsel %vm1755_vm2, %v2062_v61, -inf  ;;  %v2069_v3 = vsel %vm1755_vm2, %v2063_v2, -inf }
 0x3d1   : > { %2067 = vmax.xlane.f32.xlu1 %v2066_v0 }
 0x3d5   : > { %2070 = vmax.xlane.f32.xlu1 %v2069_v3 }
 0x3d8   : > { %v1980_v4 = vpop.f32.mrf.mxu0  ;;  %v2056_v5 = vpop.f32.mrf.mxu1 }
 0x3d9   : > { %v2064_v6 = vsel %vm6721_vm3, %v1980_v4, -1e+30  ;;  %v2065_v7 = vsel %vm6721_vm3, %v2056_v5, -1e+30 }
 0x3da   : > { %v5753_v8 = vpop.f32.mrf.mxu0  ;;  %v5758_v9 = vpop.f32.mrf.mxu1  ;;  %v2075_v10 = vsel %vm1755_vm2, %v2065_v7, -inf  ;;  %v2072_v11 = vsel %vm1755_vm2, %v2064_v6, -inf }
 0x3db   : > { %2076 = vmax.xlane.f32.xlu1 %v2075_v10  ;;  %2073 = vmax.xlane.f32.xlu0 %v2072_v11 }
 0x45a   : > { %v2068_v12 = vpop.xlane.xlu1 %2067 }
 0x45b   : > { %v2078_v13 = vsub.f32 %v2062_v61, %v2068_v12 }
 0x45d   : > { %v2082_v14 = vmul.f32 1.442695, %v2078_v13  ;;  %v5250_v13 = vld [vmem:[%s7365_s13] ss:$0 sm:$0xff] }
 0x45e   : > { %v2071_v15 = vpop.xlane.xlu1 %2070 }
 0x45f   : > { %6095 = vpow2.f32 %v2082_v14  ;;  %v2079_v16 = vsub.f32 %v2063_v2, %v2071_v15 }
 0x461   : > { %v2084_v17 = vmul.f32 1.442695, %v2079_v16 }
 0x463   : > { %6097 = vpow2.f32 %v2084_v17 }
 0x464   : > { %v2077_v18 = vpop.xlane.xlu1 %2076  ;;  %v2074_v19 = vpop.xlane.xlu0 %2073 }
 0x465   : > { %v2081_v20 = vsub.f32 %v2065_v7, %v2077_v18  ;;  %v2080_v21 = vsub.f32 %v2064_v6, %v2074_v19 }
 0x467   : > { %v2088_v22 = vmul.f32 1.442695, %v2081_v20  ;;  %v2086_v23 = vmul.f32 1.442695, %v2080_v21 }
 0x469   : > { %6099 = vpow2.f32 %v2088_v22 }
 0x46a   : > { %6101 = vpow2.f32 %v2086_v23  ;;  %v2746_v23 = vld [vmem:[%s7368_s16 + $0x18] sm:$0xff] }
 0x46c   : > { %v6096_v24 = vpop.eup %6095 }
 0x46d   : > { %v2090_v25 = vsel %vm1755_vm2, %v6096_v24, 0.0 }
 0x46e   : > { %2091 = vadd.xlane.f32.xlu0 %v2090_v25  ;;  %v2743_v25 = vld [vmem:[%s7368_s16] sm:$0xff] }
 0x470   : > { %v6098_v26 = vpop.eup %6097 }
 0x471   : > { %v2093_v27 = vsel %vm1755_vm2, %v6098_v26, 0.0 }
 0x472   : > { %2094 = vadd.xlane.f32.xlu1 %v2093_v27  ;;  %v2834_v27 = vld [vmem:[%s7370_s18 + $0x30] sm:$0xff] }
 0x476   : > { %v6100_v28 = vpop.eup %6099 }
 0x477   : > { %v6102_v29 = vpop.eup %6101  ;;  %v2099_v30 = vsel %vm1755_vm2, %v6100_v28, 0.0 }
 0x478   : > { %2100 = vadd.xlane.f32.xlu1 %v2099_v30  ;;  %v2096_v31 = vsel %vm1755_vm2, %v6102_v29, 0.0  ;;  %v2831_v30 = vld [vmem:[%s7370_s18 + $0x18] sm:$0xff] }
 0x479   : > { %2097 = vadd.xlane.f32.xlu0 %v2096_v31 }
 0x4f7   : > { %v2092_v33 = vpop.xlane.xlu0 %2091 }
 0x4f8   : > { %6103 = vrcp.f32 %v2092_v33 }
 0x4fb   : > { %v2095_v34 = vpop.xlane.xlu1 %2094 }
 0x4fc   : > { %6105 = vrcp.f32 %v2095_v34 }
 0x501   : > { %v2101_v35 = vpop.xlane.xlu1 %2100 }
 0x502   : > { %6107 = vrcp.f32 %v2101_v35  ;;  %v2098_v36 = vpop.xlane.xlu0 %2097 }
 0x503   : > { %6109 = vrcp.f32 %v2098_v36  ;;  %v5251_v36 = vld [vmem:[%s7366_s14] ss:$0 sm:$0xff] }
 0x505   : > { %v6104_v38 = vpop.eup %6103 }
 0x506   : > { %v2106_v39 = vmul.f32 %v6104_v38, %v6096_v24  ;;  %v2745_v24 = vld [vmem:[%s7368_s16 + $0x10] sm:$0xff]  ;;  %v5252_v38 = vld [vmem:[%s7412_s6] ss:$0 sm:$0xff] }
 0x508   : > { %5762 = vmatmul.mubr.msk.f32.vlgmr.msra.gmra.mxu0 %vm1755_vm2, %v2106_v39 }
 0x509   : > { %v6106_v42 = vpop.eup %6105  ;;  %5770 = vmatpush3.msra.mxu0 %v1682_v40  ;;  %5771 = vmatprep.mubr.msk.f32.mxu0 %vm6213_vm0, %v6212_v1 }
 0x50a   : > { %v2107_v43 = vmul.f32 %v6106_v42, %v6098_v26  ;;  %5779 = vmatprep.subr.mxu0 %v6212_v1  ;;  %v2835_v26 = vld [vmem:[%s7370_s18 + $0x38] sm:$0xff]  ;;  %v2829_v42 = vld [vmem:[%s7370_s18 + $0x8] sm:$0xff] }
 0x50c   : > { %5767 = vmatmul.mubr.msk.f32.vlgmr.msra.gmra.mxu1 %vm1755_vm2, %v2107_v43  ;;  %v2828_v43 = vld [vmem:[%s7370_s18] sm:$0xff] }
 0x50d   : > { %5775 = vmatpush3.msra.mxu1 %v1752_v44  ;;  %5776 = vmatprep.mubr.msk.f32.mxu1 %vm6213_vm0, %v6212_v1  ;;  %v5253_v44 = vld [vmem:[%s7369_s17] ss:$0 sm:$0xff] }
 0x50e   : > { %5784 = vmatprep.subr.mxu1 %v6212_v1 }
 0x50f   : > { %v6108_v45 = vpop.eup %6107 }
 0x510   : > { %v6110_v46 = vpop.eup %6109  ;;  %v2109_v47 = vmul.f32 %v6108_v45, %v6100_v28  ;;  %v2833_v28 = vld [vmem:[%s7370_s18 + $0x28] sm:$0xff] }
 0x511   : > { %v2108_v48 = vmul.f32 %v6110_v46, %v6102_v29  ;;  %v2832_v29 = vld [vmem:[%s7370_s18 + $0x20] sm:$0xff] }
 0x512   : > { %5777 = vmatmul.mubr.msk.f32.vlgmr.msra.gmra.mxu1 %vm1755_vm2, %v2109_v47 }
 0x513   : > { %5772 = vmatmul.mubr.msk.f32.vlgmr.msra.gmra.mxu0 %vm1755_vm2, %v2108_v48  ;;  %5786 = vmatprep.mubr.msk.f32.mxu1 %vm6213_vm0, %v6212_v1 }
 0x514   : > { %5781 = vmatprep.mubr.msk.f32.mxu0 %vm6213_vm0, %v6212_v1  ;;  %5780 = vmatpush3.msra.mxu0 %v2402_v49  ;;  %v5255_v49 = vld [vmem:[%s7371_s19] ss:$0 sm:$0xff] }
 0x515   : > { %5789 = vmatprep.subr.mxu0 %v6212_v1  ;;  %5785 = vmatpush3.msra.mxu1 %v2403_v50 }
 0x516   : > { %5794 = vmatprep.subr.mxu1 %v6212_v1 }
 0x5c8   : > { %v2179_v52 = vpop.f32.mrf.mxu0 }
 0x5c9   : > { %5782 = vmatmul.mubr.msk.f32.vlgmr.msra.gmra.mxu0 %vm1755_vm2, %v2179_v52 }
 0x5ca   : > { %v5763_v53 = vpop.f32.mrf.mxu0  ;;  %5790 = vmatpush3.msra.mxu0 %v2404_v51  ;;  %5791 = vmatprep.mubr.msk.f32.mxu0 %vm6213_vm0, %v6212_v1 }
 0x5cb   : > { %5799 = vmatprep.subr.mxu0 %v6212_v1 }
 0x5cc   : > { %v2252_v55 = vpop.f32.mrf.mxu1 }
 0x5cd   : > { %5787 = vmatmul.mubr.msk.f32.vlgmr.msra.gmra.mxu1 %vm1755_vm2, %v2252_v55 }
 0x5ce   : > { %v5768_v56 = vpop.f32.mrf.mxu1  ;;  %5795 = vmatpush3.msra.mxu1 %v2405_v54  ;;  %5796 = vmatprep.mubr.msk.f32.mxu1 %vm6213_vm0, %v6212_v1 }
 0x5cf   : > { %5810 = vmatprep.subr.mxu1 %v6212_v1 }
 0x5d2   : > { %v2398_v57 = vpop.f32.mrf.mxu1 }
 0x5d3   : > { %v2325_v59 = vpop.f32.mrf.mxu0  ;;  %5797 = vmatmul.mubr.msk.f32.vlgmr.msra.gmra.mxu1 %vm1755_vm2, %v2398_v57 }
 0x5d4   : > { %5792 = vmatmul.mubr.msk.f32.vlgmr.msra.gmra.mxu0 %vm1755_vm2, %v2325_v59  ;;  %v5778_v60 = vpop.f32.mrf.mxu1  ;;  %5826 = vmatprep.mubr.msk.f32.mxu1 %vm6213_vm0, %v6212_v1 }
 0x5d5   : > { %v5773_v61 = vpop.f32.mrf.mxu0  ;;  %5807 = vmatprep.mubr.msk.f32.mxu0 %vm6213_vm0, %v6212_v1  ;;  %5800 = vmatpush3.msra.mxu0 %v2746_v23  ;;  %v5274_v23 = vld [vmem:[%s7405_s2 + $0xf8] sm:$0xff] }
 0x5d6   : > { %5801 = vmatprep.subr.mxu0 %v6212_v1  ;;  %5811 = vmatpush3.msra.mxu1 %v2835_v26  ;;  %v5262_v61 = vld [vmem:[%s7405_s2 + $0x98] sm:$0xff]  ;;  %v5272_v26 = vld [vmem:[%s7405_s2 + $0xe8] sm:$0xff] }
 0x5d7   : > { %5802 = vmatpush3.msra.mxu0 %v2745_v24  ;;  %5812 = vmatprep.subr.mxu1 %v6212_v1  ;;  %v5298_v24 = vld [vmem:[%s7408_s7 + $0xd8] sm:$0xff] }
 0x5d8   : > { %5803 = vmatprep.subr.mxu0 %v6212_v1  ;;  %5813 = vmatpush3.msra.mxu1 %v2834_v27  ;;  %v5296_v27 = vld [vmem:[%s7408_s7 + $0xc8] sm:$0xff] }
 0x5d9   : > { %5814 = vmatprep.subr.mxu1 %v6212_v1 }
 0x5da   : > { %5815 = vmatpush3.msra.mxu1 %v2833_v28  ;;  %v5271_v28 = vld [vmem:[%s7405_s2 + $0xe0] sm:$0xff] }
 0x5db   : > { %5816 = vmatprep.subr.mxu1 %v6212_v1 }
 0x5dc   : > { %5817 = vmatpush3.msra.mxu1 %v2832_v29  ;;  %v5295_v29 = vld [vmem:[%s7408_s7 + $0xc0] sm:$0xff] }
 0x5dd   : > { %5818 = vmatprep.subr.mxu1 %v6212_v1 }
 0x5de   : > { %5819 = vmatpush3.msra.mxu1 %v2831_v30  ;;  %v5294_v30 = vld [vmem:[%s7408_s7 + $0xb8] sm:$0xff] }
 0x5df   : > { %5820 = vmatprep.subr.mxu1 %v6212_v1 }
 0x5e0   : > { %5821 = vmatpush3.msra.mxu1 %v2830_v41  ;;  %v5301_v41 = vld [vmem:[%s7408_s7 + $0xf0] sm:$0xff] }
 0x5e1   : > { %5822 = vmatprep.subr.mxu1 %v6212_v1 }
 0x5e2   : > { %5823 = vmatpush3.msra.mxu1 %v2829_v42  ;;  %v5325_v42 = vld [vmem:[%s7409_s8 + $0xd0] sm:$0xff] }
 0x5e3   : > { %5824 = vmatprep.subr.mxu1 %v6212_v1 }
 0x5e4   : > { %5825 = vmatpush3.msra.mxu1 %v2828_v43  ;;  %v5300_v43 = vld [vmem:[%s7408_s7 + $0xe8] sm:$0xff] }
 0x5e5   : > { %5851 = vmatprep.subr.mxu1 %v6212_v1 }
 0x689   : > { %v2475_v62 = vpop.f32.mrf.mxu0 }
 0x68a   : > { %v2698_v4 = vsel %vm671_vm1, %v2475_v62, 0.0  ;;  %v5270_v62 = vld [vmem:[%s7405_s2 + $0xd8] sm:$0xff] }
 0x68b   : > { %v5783_v63 = vpop.f32.mrf.mxu0 }
 0x68c   : > { %v5261_v63 = vld [vmem:[%s7405_s2 + $0x90] sm:$0xff] }
 0x68d   : > { %v2548_v0 = vpop.f32.mrf.mxu1 }
 0x68e   : > { %v2699_v3 = vsel %vm671_vm1, %v2548_v0, 0.0  ;;  %v5269_v0 = vld [vmem:[%s7405_s2 + $0xd0] sm:$0xff] }
 0x68f   : > { %v5788_v2 = vpop.f32.mrf.mxu1  ;;  %v2700_v6 = vadd.f32 %v2699_v3, %v2698_v4  ;;  %v5268_v3 = vld [vmem:[%s7405_s2 + $0xc8] sm:$0xff]  ;;  %v5259_v4 = vld [vmem:[%s7405_s2 + $0x80] sm:$0xff] }
 0x690   : > { %v5260_v2 = vld [vmem:[%s7405_s2 + $0x88] sm:$0xff] }
 0x693   : > { %v2694_v5 = vpop.f32.mrf.mxu1 }
 0x694   : > { %v2621_v7 = vpop.f32.mrf.mxu0  ;;  %v2703_v12 = vsel %vm671_vm1, %v2694_v5, 0.0  ;;  %v5267_v5 = vld [vmem:[%s7405_s2 + $0xc0] sm:$0xff] }
 0x695   : > { %v2701_v8 = vsel %vm671_vm1, %v2621_v7, 0.0  ;;  %v5798_v9 = vpop.f32.mrf.mxu1 }
 0x696   : > { %v2702_v10 = vadd.f32 %v2701_v8, %v2700_v6  ;;  %v5793_v11 = vpop.f32.mrf.mxu0 }
 0x698   : > { %v2704_v14 = vadd.f32 %v2703_v12, %v2702_v10  ;;  %v5257_v10 = vld [vmem:[%s7372_s20] ss:$0 sm:$0xff] }
 0x699   : > { %v5258_v12 = vld [vmem:[%s7373_s21] ss:$0 sm:$0xff] }
 0x69a   : > { %v2712_v15 = vadd.f32 %v5250_v13, %v2704_v14 }
 0x69c   : > { %v2713_v16 = vadd.f32 %v2712_v15, %v6454_v32  ;;  %v2744_v32 = vld [vmem:[%s7368_s16 + $0x8] sm:$0xff]  ;;  %v5266_v15 = vld [vmem:[%s7405_s2 + $0xb8] sm:$0xff] }
 0x69d   : > { %5804 = vmatpush3.msra.mxu0 %v2744_v32  ;;  %v5273_v32 = vld [vmem:[%s7405_s2 + $0xf0] sm:$0xff] }
 0x69e   : > { %v2716_v17 = vsel %vm671_vm1, %v2713_v16, 0.0  ;;  %5805 = vmatprep.subr.mxu0 %v6212_v1 }
 0x69f   : > { %2717 = vadd.xlane.f32.xlu0 %v2716_v17  ;;  %5806 = vmatpush3.msra.mxu0 %v2743_v25  ;;  %v5265_v17 = vld [vmem:[%s7405_s2 + $0xb0] sm:$0xff] }
 0x6a0   : > { %5829 = vmatprep.subr.mxu0 %v6212_v1  ;;  %v5297_v25 = vld [vmem:[%s7408_s7 + $0xd0] sm:$0xff] }
 0x728   : > { %v2718_v18 = vpop.xlane.xlu0 %2717 }
 0x729   : > { %v2719_v19 = vmul.f32 0.03125, %v2718_v18  ;;  %v5289_v18 = vld [vmem:[%s7408_s7 + $0x90] sm:$0xff] }
 0x72b   : > { %v2720_v20 = vsub.f32 %v2713_v16, %v2719_v19  ;;  %v5290_v16 = vld [vmem:[%s7408_s7 + $0x98] sm:$0xff]  ;;  %v5264_v19 = vld [vmem:[%s7405_s2 + $0xa8] sm:$0xff] }
 0x72d   : > { %v2721_v21 = vmul.f32 %v2720_v20, %v2720_v20 }
 0x72f   : > { %v2722_v22 = vsel %vm671_vm1, %v2721_v21, 0.0  ;;  %v5263_v21 = vld [vmem:[%s7405_s2 + $0xa0] sm:$0xff] }
 0x730   : > { %2723 = vadd.xlane.f32.xlu1 %v2722_v22  ;;  %v5287_v22 = vld [vmem:[%s7408_s7 + $0x80] sm:$0xff] }
 0x7b9   : > { %v2724_v31 = vpop.xlane.xlu1 %2723 }
 0x7ba   : > { %v2725_v33 = vmul.f32 0.03125, %v2724_v31  ;;  %v5318_v31 = vld [vmem:[%s7409_s8 + $0x98] sm:$0xff] }
 0x7bc   : > { %v2726_v34 = vadd.f32 1e-05, %v2725_v33  ;;  %v5293_v33 = vld [vmem:[%s7408_s7 + $0xb0] sm:$0xff] }
 0x7be   : > { %6111 = vrsqrt.f32 %v2726_v34  ;;  %v5317_v34 = vld [vmem:[%s7409_s8 + $0x90] sm:$0xff] }
 0x7cb   : > { %v6112_v35 = vpop.eup %6111 }
 0x7cc   : > { %v2728_v37 = vmul.f32 %v6112_v35, %v2720_v20  ;;  %v5288_v20 = vld [vmem:[%s7408_s7 + $0x88] sm:$0xff] }
 0x7cd   : > { %v5292_v35 = vld [vmem:[%s7408_s7 + $0xa8] sm:$0xff] }
 0x7ce   : > { %v2735_v39 = vmul.f32 %v5251_v36, %v2728_v37  ;;  %v5316_v36 = vld [vmem:[%s7409_s8 + $0x88] sm:$0xff]  ;;  %v5291_v37 = vld [vmem:[%s7408_s7 + $0xa0] sm:$0xff] }
 0x7d0   : > { %v2742_v40 = vadd.f32 %v5252_v38, %v2735_v39  ;;  %v5315_v38 = vld [vmem:[%s7409_s8 + $0x80] sm:$0xff]  ;;  %v5302_v39 = vld [vmem:[%s7408_s7 + $0xf8] sm:$0xff] }
 0x7d2   : > { %5808 = vmatmul.mubr.msk.f32.vlgmr.msra.gmra.mxu0 %vm671_vm1, %v2742_v40 }
 0x7d3   : > { %5837 = vmatprep.mubr.msk.f32.mxu0 %vm6213_vm0, %v6212_v1  ;;  %5830 = vmatpush3.msra.mxu0 %v5262_v61 }
 0x7d4   : > { %5831 = vmatprep.subr.mxu0 %v6212_v1 }
 0x7d5   : > { %5832 = vmatpush3.msra.mxu0 %v5261_v63  ;;  %v5279_v63 = vld [vmem:[%s7361_s9 + $0x4] ss:$0 sm:$0xff] }
 0x7d6   : > { %5833 = vmatprep.subr.mxu0 %v6212_v1 }
 0x7d7   : > { %5834 = vmatpush3.msra.mxu0 %v5260_v2 }
 0x7d8   : > { %5835 = vmatprep.subr.mxu0 %v6212_v1 }
 0x7d9   : > { %5836 = vmatpush3.msra.mxu0 %v5259_v4 }
 0x7da   : > { %5840 = vmatprep.subr.mxu0 %v6212_v1 }
 0x892   : > { %v2823_v45 = vpop.f32.mrf.mxu0 }
 0x893   : > { %v2824_v46 = vadd.f32 %v5253_v44, %v2823_v45  ;;  %v5324_v44 = vld [vmem:[%s7409_s8 + $0xc8] sm:$0xff]  ;;  %v5299_v45 = vld [vmem:[%s7408_s7 + $0xe0] sm:$0xff]  ;;  %s5139_s7 = scalar_lea.hbm %s7374_s22, %s5392_s29 }
 0x894   : > { %v5809_v47 = vpop.f32.mrf.mxu0 }
 0x895   : > { %v2827_v48 = vmax.f32 %v2824_v46, 0.0  ;;  %v5323_v46 = vld [vmem:[%s7409_s8 + $0xc0] sm:$0xff]  ;;  %v5322_v47 = vld [vmem:[%s7409_s8 + $0xb8] sm:$0xff] }
 0x897   : > { %5827 = vmatmul.mubr.msk.f32.vlgmr.msra.gmra.mxu1 %vm2843_vm4, %v2827_v48  ;;  %v5321_v48 = vld [vmem:[%s7409_s8 + $0xb0] sm:$0xff] }
 0x898   : > { %5859 = vmatprep.mubr.msk.f32.mxu1 %vm6213_vm0, %v6212_v1  ;;  %5852 = vmatpush3.msra.mxu1 %v5270_v62 }
 0x899   : > { %5853 = vmatprep.subr.mxu1 %v6212_v1 }
 0x89a   : > { %5854 = vmatpush3.msra.mxu1 %v5269_v0 }
 0x89b   : > { %5855 = vmatprep.subr.mxu1 %v6212_v1 }
 0x89c   : > { %5856 = vmatpush3.msra.mxu1 %v5268_v3 }
 0x89d   : > { %5857 = vmatprep.subr.mxu1 %v6212_v1 }
 0x89e   : > { %5858 = vmatpush3.msra.mxu1 %v5267_v5  ;;  %v5309_v5 = vld [vmem:[%s7362_s10 + $0x6] ss:$0 sm:$0xff] }
 0x89f   : > { %5873 = vmatprep.subr.mxu1 %v6212_v1 }
 0x957   : > { %v2913_v50 = vpop.f32.mrf.mxu1 }
 0x958   : > { %v2914_v51 = vadd.f32 %v5255_v49, %v2913_v50  ;;  %v5320_v49 = vld [vmem:[%s7409_s8 + $0xa8] sm:$0xff]  ;;  %v5319_v50 = vld [vmem:[%s7409_s8 + $0xa0] sm:$0xff] }
 0x959   : > { %v5828_v52 = vpop.f32.mrf.mxu1 }
 0x95a   : > { %v2917_v53 = vadd.f32 %v2914_v51, %v2742_v40  ;;  %v5326_v40 = vld [vmem:[%s7409_s8 + $0xd8] sm:$0xff]  ;;  %v5329_v52 = vld [vmem:[%s7409_s8 + $0xf0] sm:$0xff] }
 0x95b   : > { %v5330_v51 = vld [vmem:[%s7409_s8 + $0xf8] sm:$0xff] }
 0x95c   : > { %v2920_v54 = vsel %vm671_vm1, %v2917_v53, 0.0 }
 0x95d   : > { %2921 = vadd.xlane.f32.xlu0 %v2920_v54  ;;  %v5327_v54 = vld [vmem:[%s7409_s8 + $0xe0] sm:$0xff] }
 0x9e6   : > { %v2922_v55 = vpop.xlane.xlu0 %2921 }
 0x9e7   : > { %v2923_v56 = vmul.f32 0.03125, %v2922_v55 }
 0x9e9   : > { %v2924_v57 = vsub.f32 %v2917_v53, %v2923_v56  ;;  %v5328_v53 = vld [vmem:[%s7409_s8 + $0xe8] sm:$0xff]  ;;  %s5128_s8 = scalar_lea.sflag [#allocation5], %s652_s25 }
 0x9eb   : > { %v2925_v59 = vmul.f32 %v2924_v57, %v2924_v57 }
 0x9ed   : > { %v2926_v60 = vsel %vm671_vm1, %v2925_v59, 0.0 }
 0x9ee   : > { %2927 = vadd.xlane.f32.xlu1 %v2926_v60  ;;  %v5307_v60 = vld [vmem:[%s7362_s10 + $0x4] ss:$0 sm:$0xff] }
 0xa77   : > { %v2928_v6 = vpop.xlane.xlu1 %2927 }
 0xa78   : > { %v2929_v7 = vmul.f32 0.03125, %v2928_v6 }
 0xa7a   : > { %v2930_v8 = vadd.f32 1e-05, %v2929_v7 }
 0xa7c   : > { %6113 = vrsqrt.f32 %v2930_v8  ;;  %v5281_v8 = vld [vmem:[%s7361_s9 + $0x6] ss:$0 sm:$0xff] }
 0xa89   : > { %v6114_v9 = vpop.eup %6113 }
 0xa8a   : > { %v2932_v11 = vmul.f32 %v6114_v9, %v2924_v57 }
 0xa8c   : > { %v2939_v13 = vmul.f32 %v5257_v10, %v2932_v11 }
 0xa8e   : > { %v6907_v14 = vadd.f32 %v5258_v12, %v2939_v13  ;;  %v5308_v13 = vld [vmem:[%s7362_s10 + $0x5] ss:$0 sm:$0xff] }
 0xa90   : > { %5838 = vmatmul.mubr.msk.f32.vlgmr.msra.gmra.mxu0 %vm671_vm1, %v6907_v14  ;;  %5860 = vmatmul.mubr.msk.f32.vlgmr.msra.gmra.mxu1 %vm671_vm1, %v6907_v14 }
 0xa91   : > { %5841 = vmatpush3.msra.mxu0 %v5266_v15  ;;  %5874 = vmatpush3.msra.mxu1 %v5290_v16  ;;  %v5335_v15 = vld [vmem:[%s7363_s11 + $0x4] ss:$0 sm:$0xff] }
 0xa92   : > { %5842 = vmatprep.subr.mxu0 %v6212_v1  ;;  %5875 = vmatprep.subr.mxu1 %v6212_v1 }
 0xa93   : > { %5843 = vmatpush3.msra.mxu0 %v5265_v17  ;;  %5876 = vmatpush3.msra.mxu1 %v5289_v18  ;;  %v5280_v17 = vld [vmem:[%s7361_s9 + $0x5] ss:$0 sm:$0xff] }
 0xa94   : > { %5844 = vmatprep.subr.mxu0 %v6212_v1  ;;  %5877 = vmatprep.subr.mxu1 %v6212_v1 }
 0xa95   : > { %5845 = vmatpush3.msra.mxu0 %v5264_v19  ;;  %5878 = vmatpush3.msra.mxu1 %v5288_v20 }
 0xa96   : > { %5846 = vmatprep.subr.mxu0 %v6212_v1  ;;  %5879 = vmatprep.subr.mxu1 %v6212_v1 }
 0xa97   : > { %5847 = vmatpush3.msra.mxu0 %v5263_v21  ;;  %5848 = vmatprep.mubr.msk.f32.mxu0 %vm6213_vm0, %v6212_v1 }
 0xa98   : > { %5880 = vmatpush3.msra.mxu1 %v5287_v22  ;;  %5881 = vmatprep.mubr.msk.f32.mxu1 %vm6213_vm0, %v6212_v1 }
 0xa99   : > { %5849 = vmatmul.mubr.msk.f32.vlgmr.msra.gmra.mxu0 %vm671_vm1, %v6907_v14  ;;  %5862 = vmatprep.subr.mxu0 %v6212_v1 }
 0xa9a   : > { %5882 = vmatmul.mubr.msk.f32.vlgmr.msra.gmra.mxu1 %vm671_vm1, %v6907_v14  ;;  %5895 = vmatprep.subr.mxu1 %v6212_v1 }
 0xa9b   : > { %5863 = vmatpush3.msra.mxu0 %v5274_v23  ;;  %5896 = vmatpush3.msra.mxu1 %v5298_v24  ;;  %v5310_v24 = vld [vmem:[%s7362_s10 + $0x7] ss:$0 sm:$0xff] }
 0xa9c   : > { %5864 = vmatprep.subr.mxu0 %v6212_v1  ;;  %5897 = vmatprep.subr.mxu1 %v6212_v1 }
 0xa9d   : > { %5865 = vmatpush3.msra.mxu0 %v5273_v32  ;;  %5898 = vmatpush3.msra.mxu1 %v5297_v25  ;;  %v5282_v25 = vld [vmem:[%s7361_s9 + $0x7] ss:$0 sm:$0xff] }
 0xa9e   : > { %5866 = vmatprep.subr.mxu0 %v6212_v1  ;;  %5899 = vmatprep.subr.mxu1 %v6212_v1 }
 0xa9f   : > { %5867 = vmatpush3.msra.mxu0 %v5272_v26  ;;  %5900 = vmatpush3.msra.mxu1 %v5296_v27 }
 0xaa0   : > { %5868 = vmatprep.subr.mxu0 %v6212_v1  ;;  %5901 = vmatprep.subr.mxu1 %v6212_v1 }
 0xaa1   : > { %5869 = vmatpush3.msra.mxu0 %v5271_v28  ;;  %5870 = vmatprep.mubr.msk.f32.mxu0 %vm6213_vm0, %v6212_v1 }
 0xaa2   : > { %5902 = vmatpush3.msra.mxu1 %v5295_v29  ;;  %5903 = vmatprep.mubr.msk.f32.mxu1 %vm6213_vm0, %v6212_v1 }
 0xaa3   : > { %5871 = vmatmul.mubr.msk.f32.vlgmr.msra.gmra.mxu0 %vm671_vm1, %v6907_v14  ;;  %5884 = vmatprep.subr.mxu0 %v6212_v1 }
 0xaa4   : > { %5904 = vmatmul.mubr.msk.f32.vlgmr.msra.gmra.mxu1 %vm671_vm1, %v6907_v14  ;;  %5917 = vmatprep.subr.mxu1 %v6212_v1 }
 0xaa5   : > { %5885 = vmatpush3.msra.mxu0 %v5294_v30  ;;  %5918 = vmatpush3.msra.mxu1 %v5318_v31  ;;  %v5336_v31 = vld [vmem:[%s7363_s11 + $0x5] ss:$0 sm:$0xff] }
 0xaa6   : > { %5886 = vmatprep.subr.mxu0 %v6212_v1  ;;  %5919 = vmatprep.subr.mxu1 %v6212_v1 }
 0xaa7   : > { %5887 = vmatpush3.msra.mxu0 %v5293_v33  ;;  %5920 = vmatpush3.msra.mxu1 %v5317_v34 }
 0xaa8   : > { %5888 = vmatprep.subr.mxu0 %v6212_v1  ;;  %5921 = vmatprep.subr.mxu1 %v6212_v1 }
 0xaa9   : > { %5889 = vmatpush3.msra.mxu0 %v5292_v35  ;;  %5922 = vmatpush3.msra.mxu1 %v5316_v36 }
 0xaaa   : > { %5890 = vmatprep.subr.mxu0 %v6212_v1  ;;  %5923 = vmatprep.subr.mxu1 %v6212_v1 }
 0xaab   : > { %5891 = vmatpush3.msra.mxu0 %v5291_v37  ;;  %5892 = vmatprep.mubr.msk.f32.mxu0 %vm6213_vm0, %v6212_v1 }
 0xaac   : > { %5924 = vmatpush3.msra.mxu1 %v5315_v38  ;;  %5925 = vmatprep.mubr.msk.f32.mxu1 %vm6213_vm0, %v6212_v1 }
 0xaad   : > { %5893 = vmatmul.mubr.msk.f32.vlgmr.msra.gmra.mxu0 %vm671_vm1, %v6907_v14  ;;  %5906 = vmatprep.subr.mxu0 %v6212_v1 }
 0xaae   : > { %5926 = vmatmul.mubr.msk.f32.vlgmr.msra.gmra.mxu1 %vm671_vm1, %v6907_v14  ;;  %5939 = vmatprep.subr.mxu1 %v6212_v1 }
 0xaaf   : > { %5907 = vmatpush3.msra.mxu0 %v5302_v39  ;;  %5940 = vmatpush3.msra.mxu1 %v5326_v40 }
 0xab0   : > { %5908 = vmatprep.subr.mxu0 %v6212_v1  ;;  %5941 = vmatprep.subr.mxu1 %v6212_v1 }
 0xab1   : > { %5909 = vmatpush3.msra.mxu0 %v5301_v41  ;;  %5942 = vmatpush3.msra.mxu1 %v5325_v42 }
 0xab2   : > { %5910 = vmatprep.subr.mxu0 %v6212_v1  ;;  %5943 = vmatprep.subr.mxu1 %v6212_v1 }
 0xab3   : > { %5911 = vmatpush3.msra.mxu0 %v5300_v43  ;;  %5944 = vmatpush3.msra.mxu1 %v5324_v44 }
 0xab4   : > { %5912 = vmatprep.subr.mxu0 %v6212_v1  ;;  %5945 = vmatprep.subr.mxu1 %v6212_v1 }
 0xab5   : > { %5913 = vmatpush3.msra.mxu0 %v5299_v45  ;;  %5914 = vmatprep.mubr.msk.f32.mxu0 %vm6213_vm0, %v6212_v1 }
 0xab6   : > { %5946 = vmatpush3.msra.mxu1 %v5323_v46  ;;  %5947 = vmatprep.mubr.msk.f32.mxu1 %vm6213_vm0, %v6212_v1 }
 0xab7   : > { %5915 = vmatmul.mubr.msk.f32.vlgmr.msra.gmra.mxu0 %vm671_vm1, %v6907_v14  ;;  %5928 = vmatprep.subr.mxu0 %v6212_v1 }
 0xab8   : > { %5948 = vmatmul.mubr.msk.f32.vlgmr.msra.gmra.mxu1 %vm671_vm1, %v6907_v14  ;;  %5929 = vmatpush3.msra.mxu0 %v5322_v47 }
 0xab9   : > { %5930 = vmatprep.subr.mxu0 %v6212_v1  ;;  %5936 = vmatprep.mubr.msk.f32.mxu0 %vm6213_vm0, %v6212_v1 }
 0xaba   : > { %5931 = vmatpush3.msra.mxu0 %v5321_v48  ;;  %5961 = vmatprep.subr.mxu1 %v6212_v1 }
 0xabb   : > { %5932 = vmatprep.subr.mxu0 %v6212_v1  ;;  %5963 = vmatprep.mubr.msk.f32.mxu1 %vm6213_vm0, %v6212_v1 }
 0xabc   : > { %5933 = vmatpush3.msra.mxu0 %v5320_v49 }
 0xabd   : > { %5934 = vmatprep.subr.mxu0 %v6212_v1 }
 0xabe   : > { %5935 = vmatpush3.msra.mxu0 %v5319_v50 }
 0xabf   : > { %5937 = vmatmul.mubr.msk.f32.vlgmr.msra.gmra.mxu0 %vm671_vm1, %v6907_v14  ;;  %5950 = vmatprep.subr.mxu0 %v6212_v1 }
 0xac0   : > { %5951 = vmatpush3.msra.mxu0 %v5330_v51  ;;  %5958 = vmatprep.mubr.msk.f32.mxu0 %vm6213_vm0, %v6212_v1 }
 0xac1   : > { %5952 = vmatprep.subr.mxu0 %v6212_v1 }
 0xac2   : > { %5953 = vmatpush3.msra.mxu0 %v5329_v52 }
 0xac3   : > { %5954 = vmatprep.subr.mxu0 %v6212_v1 }
 0xac4   : > { %5955 = vmatpush3.msra.mxu0 %v5328_v53 }
 0xac5   : > { %5956 = vmatprep.subr.mxu0 %v6212_v1 }
 0xac6   : > { %5957 = vmatpush3.msra.mxu0 %v5327_v54 }
 0xac7   : > { %5959 = vmatmul.mubr.msk.f32.vlgmr.msra.gmra.mxu0 %vm671_vm1, %v6907_v14  ;;  %5971 = vmatprep.subr.mxu0 %v6212_v1 }
 0xac8   : > { %5973 = vmatprep.mubr.msk.f32.mxu0 %vm6213_vm0, %v6212_v1 }
 0xb50   : > { %v3062_v55 = vpop.f32.mrf.mxu0  ;;  %v3202_v56 = vpop.f32.mrf.mxu1 }
 0xb51   : > { %v3063_v4 = vadd.f32 %v5279_v63, %v3062_v55  ;;  %v3203_v12 = vadd.f32 %v5281_v8, %v3202_v56 }
 0xb52   : > { %v5839_v57 = vpop.f32.mrf.mxu0  ;;  %v5861_v59 = vpop.f32.mrf.mxu1 }
 0xb59   : > { %v3132_v61 = vpop.f32.mrf.mxu0 }
 0xb5a   : > { %v3388_v62 = vpop.f32.mrf.mxu1  ;;  %v3133_v23 = vadd.f32 %v5280_v17, %v3132_v61 }
 0xb5b   : > { %v3389_v0 = vadd.f32 %v5307_v60, %v3388_v62  ;;  %v5850_v2 = vpop.f32.mrf.mxu0 }
 0xb5c   : > { %v5883_v3 = vpop.f32.mrf.mxu1 }
 0xb5d   : > { %5962 = vmatpush3.xpose.msk.msra.mxu1 %vm1755_vm2, %v3389_v0 }
 0xb5e   : > { %5966 = vmatprep.subr.mxu1 %v6212_v1 }
 0xb60   : > { %5964 = vmatmul.mubr.msk.f32.vlgmr.msra.gmra.mxu1 %vm1755_vm2, %v3063_v4 }
 0xb61   : > { %5968 = vmatprep.mubr.msk.f32.mxu1 %vm6213_vm0, %v6212_v1 }
 0xb63   : > { %v3272_v6 = vpop.f32.mrf.mxu0 }
 0xb64   : > { %v3528_v7 = vpop.f32.mrf.mxu1  ;;  %v3273_v30 = vadd.f32 %v5282_v25, %v3272_v6 }
 0xb65   : > { %v3529_v9 = vadd.f32 %v5309_v5, %v3528_v7  ;;  %v5872_v10 = vpop.f32.mrf.mxu0 }
 0xb66   : > { %v5905_v11 = vpop.f32.mrf.mxu1 }
 0xb67   : > { %5972 = vmatpush3.xpose.msk.msra.mxu0 %vm1755_vm2, %v3529_v9 }
 0xb68   : > { %5981 = vmatprep.subr.mxu0 %v6212_v1 }
 0xb6a   : > { %5974 = vmatmul.mubr.msk.f32.vlgmr.msra.gmra.mxu0 %vm1755_vm2, %v3203_v12 }
 0xb6b   : > { %5983 = vmatprep.mubr.msk.f32.mxu0 %vm6213_vm0, %v6212_v1 }
 0xb6d   : > { %v3458_v16 = vpop.f32.mrf.mxu0 }
 0xb6e   : > { %v3459_v18 = vadd.f32 %v5308_v13, %v3458_v16  ;;  %v3714_v19 = vpop.f32.mrf.mxu1  ;;  %v5337_v13 = vld [vmem:[%s7363_s11 + $0x6] ss:$0 sm:$0xff] }
 0xb6f   : > { %v3715_v20 = vadd.f32 %v5335_v15, %v3714_v19  ;;  %v5894_v21 = vpop.f32.mrf.mxu0 }
 0xb70   : > { %v5927_v22 = vpop.f32.mrf.mxu1  ;;  %5967 = vmatpush3.xpose.msk.msra.mxu1 %vm1755_vm2, %v3459_v18 }
 0xb71   : > { %5982 = vmatpush3.msra.mxu0 %v3715_v20  ;;  %5976 = vmatprep.subr.mxu1 %v6212_v1  ;;  %v5338_v22 = vld [vmem:[%s7363_s11 + $0x7] ss:$0 sm:$0xff] }
 0xb72   : > { %5991 = vmatprep.subr.mxu0 %v6212_v1 }
 0xb73   : > { %5969 = vmatmul.mubr.msk.f32.vlgmr.msra.gmra.mxu1 %vm1755_vm2, %v3133_v23 }
 0xb74   : > { %5978 = vmatprep.mubr.msk.f32.mxu1 %vm6213_vm0, %v6212_v1 }
 0xb77   : > { %v3598_v32 = vpop.f32.mrf.mxu0 }
 0xb78   : > { %v3599_v26 = vadd.f32 %v5310_v24, %v3598_v32  ;;  %v7160_v27 = vpop.f32.mrf.mxu1 }
 0xb79   : > { %v5916_v28 = vpop.f32.mrf.mxu0  ;;  %v3855_v17 = vadd.f32 %v5337_v13, %v7160_v27  ;;  %v5355_v27 = vld [vmem:[%s7364_s12 + $0x20] sm:$0xff] }
 0xb7a   : > { %v5949_v29 = vpop.f32.mrf.mxu1  ;;  %5977 = vmatpush3.xpose.msk.msra.mxu1 %vm1755_vm2, %v3599_v26  ;;  %v5356_v28 = vld [vmem:[%s7364_s12 + $0x28] sm:$0xff]  ;;  %v5367_v13 = vld [vmem:[%s7366_s14 + $0x1] ss:$0 sm:$0xff] }
 0xb7b   : > { %5986 = vmatprep.subr.mxu1 %v6212_v1  ;;  %v5357_v29 = vld [vmem:[%s7364_s12 + $0x30] sm:$0xff] }
 0xb7d   : > { %5979 = vmatmul.mubr.msk.f32.vlgmr.msra.gmra.mxu1 %vm1755_vm2, %v3273_v30 }
 0xb7e   : > { %5988 = vmatprep.mubr.msk.f32.mxu1 %vm6213_vm0, %v6212_v1 }
 0xb7f   : > { %v3784_v33 = vpop.f32.mrf.mxu0 }
 0xb80   : > { %v3785_v34 = vadd.f32 %v5336_v31, %v3784_v33 }
 0xb81   : > { %v5938_v35 = vpop.f32.mrf.mxu0 }
 0xb82   : > { %5987 = vmatpush3.msra.mxu1 %v3785_v34  ;;  %v5358_v35 = vld [vmem:[%s7364_s12 + $0x38] sm:$0xff] }
 0xb83   : > { %5996 = vmatprep.subr.mxu1 %v6212_v1 }
 0xb87   : > { %v7171_v36 = vpop.f32.mrf.mxu0 }
 0xb88   : > { %v3925_v32 = vadd.f32 %v5338_v22, %v7171_v36  ;;  %v5374_v22 = vld [vmem:[%s7369_s17 + $0x1] ss:$0 sm:$0xff] }
 0xb89   : > { %v5960_v37 = vpop.f32.mrf.mxu0 }
 0xc20   : > { %v4000_v38 = vpop.f32.mrf.mxu1 }
 0xc21   : > { %v4232_v39 = vsel %vm6721_vm3, %v4000_v38, -1e+30 }
 0xc22   : > { %v5965_v40 = vpop.f32.mrf.mxu1  ;;  %v4236_v41 = vsel %vm1755_vm2, %v4232_v39, -inf }
 0xc23   : > { %4237 = vmax.xlane.f32.xlu0 %v4236_v41 }
 0xc2a   : > { %v4152_v42 = vpop.f32.mrf.mxu0 }
 0xc2b   : > { %v4234_v43 = vsel %vm6721_vm3, %v4152_v42, -1e+30 }
 0xc2c   : > { %v5975_v44 = vpop.f32.mrf.mxu0  ;;  %v4242_v45 = vsel %vm1755_vm2, %v4234_v43, -inf }
 0xc2d   : > { %4243 = vmax.xlane.f32.xlu0 %v4242_v45 }
 0xc33   : > { %v4076_v46 = vpop.f32.mrf.mxu1 }
 0xc34   : > { %v4233_v47 = vsel %vm6721_vm3, %v4076_v46, -1e+30 }
 0xc35   : > { %v5970_v48 = vpop.f32.mrf.mxu1  ;;  %v4239_v49 = vsel %vm1755_vm2, %v4233_v47, -inf }
 0xc36   : > { %4240 = vmax.xlane.f32.xlu1 %v4239_v49 }
 0xc3d   : > { %v4228_v50 = vpop.f32.mrf.mxu1 }
 0xc3e   : > { %v4235_v51 = vsel %vm6721_vm3, %v4228_v50, -1e+30 }
 0xc3f   : > { %v5980_v52 = vpop.f32.mrf.mxu1  ;;  %v4245_v53 = vsel %vm1755_vm2, %v4235_v51, -inf }
 0xc40   : > { %4246 = vmax.xlane.f32.xlu1 %v4245_v53  ;;  %v5364_v53 = vld [vmem:[%s7365_s13 + $0x1] ss:$0 sm:$0xff] }
 0xcac   : > { %v4238_v54 = vpop.xlane.xlu0 %4237 }
 0xcad   : > { %v4248_v55 = vsub.f32 %v4232_v39, %v4238_v54 }
 0xcaf   : > { %v4252_v56 = vmul.f32 1.442695, %v4248_v55 }
 0xcb1   : > { %6115 = vpow2.f32 %v4252_v56 }
 0xcb6   : > { %v4244_v57 = vpop.xlane.xlu0 %4243 }
 0xcb7   : > { %v4250_v59 = vsub.f32 %v4234_v43, %v4244_v57 }
 0xcb9   : > { %v4256_v60 = vmul.f32 1.442695, %v4250_v59 }
 0xcbb   : > { %6117 = vpow2.f32 %v4256_v60 }
 0xcbe   : > { %v6116_v61 = vpop.eup %6115 }
 0xcbf   : > { %v4241_v62 = vpop.xlane.xlu1 %4240  ;;  %v4260_v63 = vsel %vm1755_vm2, %v6116_v61, 0.0 }
 0xcc0   : > { %v4249_v0 = vsub.f32 %v4233_v47, %v4241_v62  ;;  %4261 = vadd.xlane.f32.xlu0 %v4260_v63 }
 0xcc2   : > { %v4254_v58 = vmul.f32 1.442695, %v4249_v0 }
 0xcc4   : > { %6119 = vpow2.f32 %v4254_v58  ;;  %v5372_v58 = vld [vmem:[%s7368_s16 + $0x38] sm:$0xff] }
 0xcc8   : > { %v6118_v2 = vpop.eup %6117 }
 0xcc9   : > { %v4247_v3 = vpop.xlane.xlu1 %4246  ;;  %v4266_v4 = vsel %vm1755_vm2, %v6118_v2, 0.0 }
 0xcca   : > { %v4251_v5 = vsub.f32 %v4235_v51, %v4247_v3  ;;  %4267 = vadd.xlane.f32.xlu0 %v4266_v4  ;;  %v5369_v3 = vld [vmem:[%s7368_s16 + $0x20] sm:$0xff]  ;;  %v5383_v4 = vld [vmem:[%s7370_s18 + $0x78] sm:$0xff] }
 0xccc   : > { %v4258_v6 = vmul.f32 1.442695, %v4251_v5  ;;  %v5382_v5 = vld [vmem:[%s7370_s18 + $0x70] sm:$0xff] }
 0xcce   : > { %6121 = vpow2.f32 %v4258_v6  ;;  %v5381_v6 = vld [vmem:[%s7370_s18 + $0x68] sm:$0xff] }
 0xcd1   : > { %v6120_v7 = vpop.eup %6119 }
 0xcd2   : > { %v4263_v8 = vsel %vm1755_vm2, %v6120_v7, 0.0 }
 0xcd3   : > { %4264 = vadd.xlane.f32.xlu1 %v4263_v8  ;;  %v5379_v8 = vld [vmem:[%s7370_s18 + $0x58] sm:$0xff] }
 0xcdb   : > { %v6122_v9 = vpop.eup %6121 }
 0xcdc   : > { %v4269_v10 = vsel %vm1755_vm2, %v6122_v9, 0.0 }
 0xcdd   : > { %4270 = vadd.xlane.f32.xlu1 %v4269_v10 }
 0xd49   : > { %v4262_v11 = vpop.xlane.xlu0 %4261 }
 0xd4a   : > { %6123 = vrcp.f32 %v4262_v11 }
 0xd53   : > { %v4268_v12 = vpop.xlane.xlu0 %4267 }
 0xd54   : > { %6125 = vrcp.f32 %v4268_v12 }
 0xd57   : > { %v6124_v15 = vpop.eup %6123 }
 0xd58   : > { %v4276_v16 = vmul.f32 %v6124_v15, %v6116_v61 }
 0xd5a   : > { %5984 = vmatmul.mubr.msk.f32.vlgmr.msra.gmra.mxu0 %vm1755_vm2, %v4276_v16  ;;  %v5368_v16 = vld [vmem:[%s7412_s6 + $0x1] ss:$0 sm:$0xff] }
 0xd5b   : > { %5992 = vmatpush3.msra.mxu0 %v3855_v17  ;;  %5993 = vmatprep.mubr.msk.f32.mxu0 %vm6213_vm0, %v6212_v1 }
 0xd5c   : > { %v4265_v18 = vpop.xlane.xlu1 %4264  ;;  %6001 = vmatprep.subr.mxu0 %v6212_v1 }
 0xd5d   : > { %6127 = vrcp.f32 %v4265_v18 }
 0xd61   : > { %v6126_v19 = vpop.eup %6125 }
 0xd62   : > { %v4278_v20 = vmul.f32 %v6126_v19, %v6118_v2  ;;  %v5371_v2 = vld [vmem:[%s7368_s16 + $0x30] sm:$0xff] }
 0xd63   : > { %v5378_v19 = vld [vmem:[%s7370_s18 + $0x50] sm:$0xff] }
 0xd64   : > { %5994 = vmatmul.mubr.msk.f32.vlgmr.msra.gmra.mxu0 %vm1755_vm2, %v4278_v20  ;;  %v5377_v20 = vld [vmem:[%s7370_s18 + $0x48] sm:$0xff] }
 0xd65   : > { %6003 = vmatprep.mubr.msk.f32.mxu0 %vm6213_vm0, %v6212_v1  ;;  %6002 = vmatpush3.msra.mxu0 %v5355_v27 }
 0xd66   : > { %v4271_v21 = vpop.xlane.xlu1 %4270  ;;  %6011 = vmatprep.subr.mxu0 %v6212_v1 }
 0xd67   : > { %6129 = vrcp.f32 %v4271_v21  ;;  %v5376_v21 = vld [vmem:[%s7370_s18 + $0x40] sm:$0xff] }
 0xd6a   : > { %v6128_v23 = vpop.eup %6127 }
 0xd6b   : > { %v4277_v24 = vmul.f32 %v6128_v23, %v6120_v7  ;;  %v5380_v7 = vld [vmem:[%s7370_s18 + $0x60] sm:$0xff] }
 0xd6d   : > { %5989 = vmatmul.mubr.msk.f32.vlgmr.msra.gmra.mxu1 %vm1755_vm2, %v4277_v24 }
 0xd6e   : > { %5997 = vmatpush3.msra.mxu1 %v3925_v32  ;;  %5998 = vmatprep.mubr.msk.f32.mxu1 %vm6213_vm0, %v6212_v1 }
 0xd6f   : > { %6006 = vmatprep.subr.mxu1 %v6212_v1 }
 0xd74   : > { %v6130_v25 = vpop.eup %6129 }
 0xd75   : > { %v4279_v26 = vmul.f32 %v6130_v25, %v6122_v9 }
 0xd77   : > { %5999 = vmatmul.mubr.msk.f32.vlgmr.msra.gmra.mxu1 %vm1755_vm2, %v4279_v26  ;;  %v5385_v26 = vld [vmem:[%s7371_s19 + $0x1] ss:$0 sm:$0xff] }
 0xd78   : > { %6008 = vmatprep.mubr.msk.f32.mxu1 %vm6213_vm0, %v6212_v1  ;;  %6007 = vmatpush3.msra.mxu1 %v5356_v28 }
 0xd79   : > { %6016 = vmatprep.subr.mxu1 %v6212_v1 }
 0xe1a   : > { %v4349_v30 = vpop.f32.mrf.mxu0 }
 0xe1b   : > { %6004 = vmatmul.mubr.msk.f32.vlgmr.msra.gmra.mxu0 %vm1755_vm2, %v4349_v30 }
 0xe1c   : > { %v5985_v31 = vpop.f32.mrf.mxu0  ;;  %6012 = vmatpush3.msra.mxu0 %v5357_v29  ;;  %6013 = vmatprep.mubr.msk.f32.mxu0 %vm6213_vm0, %v6212_v1 }
 0xe1d   : > { %6021 = vmatprep.subr.mxu0 %v6212_v1 }
 0xe24   : > { %v4495_v33 = vpop.f32.mrf.mxu0 }
 0xe25   : > { %6014 = vmatmul.mubr.msk.f32.vlgmr.msra.gmra.mxu0 %vm1755_vm2, %v4495_v33 }
 0xe26   : > { %v5995_v34 = vpop.f32.mrf.mxu0  ;;  %6029 = vmatprep.mubr.msk.f32.mxu0 %vm6213_vm0, %v6212_v1  ;;  %6022 = vmatpush3.msra.mxu0 %v5372_v58 }
 0xe27   : > { %6023 = vmatprep.subr.mxu0 %v6212_v1 }
 0xe28   : > { %6024 = vmatpush3.msra.mxu0 %v5371_v2 }
 0xe29   : > { %6025 = vmatprep.subr.mxu0 %v6212_v1 }
 0xe2d   : > { %v4422_v36 = vpop.f32.mrf.mxu1 }
 0xe2e   : > { %6009 = vmatmul.mubr.msk.f32.vlgmr.msra.gmra.mxu1 %vm1755_vm2, %v4422_v36 }
 0xe2f   : > { %v5990_v37 = vpop.f32.mrf.mxu1  ;;  %6017 = vmatpush3.msra.mxu1 %v5358_v35  ;;  %6018 = vmatprep.mubr.msk.f32.mxu1 %vm6213_vm0, %v6212_v1 }
 0xe30   : > { %6032 = vmatprep.subr.mxu1 %v6212_v1 }
 0xe37   : > { %v4568_v38 = vpop.f32.mrf.mxu1 }
 0xe38   : > { %6019 = vmatmul.mubr.msk.f32.vlgmr.msra.gmra.mxu1 %vm1755_vm2, %v4568_v38 }
 0xe39   : > { %v6000_v39 = vpop.f32.mrf.mxu1  ;;  %6048 = vmatprep.mubr.msk.f32.mxu1 %vm6213_vm0, %v6212_v1  ;;  %6033 = vmatpush3.msra.mxu1 %v5383_v4 }
 0xe3a   : > { %6034 = vmatprep.subr.mxu1 %v6212_v1 }
 0xe3b   : > { %6035 = vmatpush3.msra.mxu1 %v5382_v5 }
 0xe3c   : > { %6036 = vmatprep.subr.mxu1 %v6212_v1 }
 0xe3d   : > { %6037 = vmatpush3.msra.mxu1 %v5381_v6 }
 0xe3e   : > { %6038 = vmatprep.subr.mxu1 %v6212_v1 }
 0xe3f   : > { %6039 = vmatpush3.msra.mxu1 %v5380_v7 }
 0xe40   : > { %6040 = vmatprep.subr.mxu1 %v6212_v1 }
 0xe41   : > { %6041 = vmatpush3.msra.mxu1 %v5379_v8 }
 0xe42   : > { %6042 = vmatprep.subr.mxu1 %v6212_v1 }
 0xe43   : > { %6043 = vmatpush3.msra.mxu1 %v5378_v19 }
 0xe44   : > { %6044 = vmatprep.subr.mxu1 %v6212_v1 }
 0xe45   : > { %6045 = vmatpush3.msra.mxu1 %v5377_v20 }
 0xe46   : > { %6046 = vmatprep.subr.mxu1 %v6212_v1 }
 0xe47   : > { %6047 = vmatpush3.msra.mxu1 %v5376_v21 }
 0xedb   : > { %v4646_v40 = vpop.f32.mrf.mxu0 }
 0xedc   : > { %v4869_v47 = vsel %vm671_vm1, %v4646_v40, 0.0 }
 0xedd   : > { %v6005_v41 = vpop.f32.mrf.mxu0 }
 0xede   : > { %v5389_v41 = vld [vmem:[%s7372_s20 + $0x1] ss:$0 sm:$0xff] }
 0xee5   : > { %v4792_v42 = vpop.f32.mrf.mxu0 }
 0xee6   : > { %v4872_v49 = vsel %vm671_vm1, %v4792_v42, 0.0 }
 0xee7   : > { %v6015_v43 = vpop.f32.mrf.mxu0 }
 0xee8   : > { %v5390_v43 = vld [vmem:[%s7373_s21 + $0x1] ss:$0 sm:$0xff] }
 0xeee   : > { %v4719_v44 = vpop.f32.mrf.mxu1 }
 0xeef   : > { %v4870_v46 = vsel %vm671_vm1, %v4719_v44, 0.0 }
 0xef0   : > { %v6010_v45 = vpop.f32.mrf.mxu1  ;;  %v4871_v48 = vadd.f32 %v4870_v46, %v4869_v47 }
 0xef2   : > { %v4873_v51 = vadd.f32 %v4872_v49, %v4871_v48 }
 0xef8   : > { %v4865_v50 = vpop.f32.mrf.mxu1 }
 0xef9   : > { %v4874_v52 = vsel %vm671_vm1, %v4865_v50, 0.0 }
 0xefa   : > { %v4875_v54 = vadd.f32 %v4874_v52, %v4873_v51  ;;  %v6020_v55 = vpop.f32.mrf.mxu1 }
 0xefc   : > { %v4884_v56 = vadd.f32 %v5364_v53, %v4875_v54 }
 0xefe   : > { %v4885_v57 = vadd.f32 %v4884_v56, %v6907_v14  ;;  %v5370_v14 = vld [vmem:[%s7368_s16 + $0x28] sm:$0xff] }
 0xeff   : > { %6026 = vmatpush3.msra.mxu0 %v5370_v14 }
 0xf00   : > { %v4890_v59 = vsel %vm671_vm1, %v4885_v57, 0.0  ;;  %6027 = vmatprep.subr.mxu0 %v6212_v1 }
 0xf01   : > { %4891 = vadd.xlane.f32.xlu0 %v4890_v59  ;;  %6028 = vmatpush3.msra.mxu0 %v5369_v3 }
 0xf8a   : > { %v4892_v60 = vpop.xlane.xlu0 %4891 }
 0xf8b   : > { %v4893_v61 = vmul.f32 0.03125, %v4892_v60 }
 0xf8d   : > { %v4894_v62 = vsub.f32 %v4885_v57, %v4893_v61 }
 0xf8f   : > { %v4895_v63 = vmul.f32 %v4894_v62, %v4894_v62 }
 0xf91   : > { %v4896_v0 = vsel %vm671_vm1, %v4895_v63, 0.0 }
 0xf92   : > { %4897 = vadd.xlane.f32.xlu1 %v4896_v0 }
0x101b   : > { %v4898_v9 = vpop.xlane.xlu1 %4897 }
0x101c   : > { %v4899_v10 = vmul.f32 0.03125, %v4898_v9 }
0x101e   : > { %v4900_v11 = vadd.f32 1e-05, %v4899_v10 }
0x1020   : > { %6131 = vrsqrt.f32 %v4900_v11 }
0x102d   : > { %v6132_v12 = vpop.eup %6131 }
0x102e   : > { %v4902_v15 = vmul.f32 %v6132_v12, %v4894_v62 }
0x1030   : > { %v4909_v17 = vmul.f32 %v5367_v13, %v4902_v15 }
0x1032   : > { %v4916_v18 = vadd.f32 %v5368_v16, %v4909_v17 }
0x1034   : > { %6030 = vmatmul.mubr.msk.f32.vlgmr.msra.gmra.mxu0 %vm671_vm1, %v4916_v18 }
0x10f4   : > { %v4999_v23 = vpop.f32.mrf.mxu0 }
0x10f5   : > { %v5000_v24 = vadd.f32 %v5374_v22, %v4999_v23 }
0x10f6   : > { %v6031_v32 = vpop.f32.mrf.mxu0 }
0x10f7   : > { %v5003_v25 = vmax.f32 %v5000_v24, 0.0 }
0x10f9   : > { %6049 = vmatmul.mubr.msk.f32.vlgmr.msra.gmra.mxu1 %vm2843_vm4, %v5003_v25 }
0x11b9   : > { %v5090_v27 = vpop.f32.mrf.mxu1 }
0x11ba   : > { %v5091_v28 = vadd.f32 %v5385_v26, %v5090_v27 }
0x11bb   : > { %v6050_v29 = vpop.f32.mrf.mxu1 }
0x11bc   : > { %v5094_v1 = vadd.f32 %v5091_v28, %v4916_v18 }
0x11be   : > { %v5099_v30 = vsel %vm671_vm1, %v5094_v1, 0.0 }
0x11bf   : > { %5100 = vadd.xlane.f32.xlu0 %v5099_v30 }
0x1248   : > { %v5101_v31 = vpop.xlane.xlu0 %5100 }
0x1249   : > { %v5102_v33 = vmul.f32 0.03125, %v5101_v31 }
0x124b   : > { %v5103_v34 = vsub.f32 %v5094_v1, %v5102_v33 }
0x124d   : > { %v5104_v35 = vmul.f32 %v5103_v34, %v5103_v34 }
0x124f   : > { %v5105_v36 = vsel %vm671_vm1, %v5104_v35, 0.0 }
0x1250   : > { %5106 = vadd.xlane.f32.xlu1 %v5105_v36 }
0x12d9   : > { %v5107_v37 = vpop.xlane.xlu1 %5106 }
0x12da   : > { %v5108_v38 = vmul.f32 0.03125, %v5107_v37 }
0x12dc   : > { %v5109_v39 = vadd.f32 1e-05, %v5108_v38 }
0x12de   : > { %6133 = vrsqrt.f32 %v5109_v39 }
0x12eb   : > { %v6134_v40 = vpop.eup %6133 }
0x12ec   : > { %v5111_v42 = vmul.f32 %v6134_v40, %v5103_v34 }
0x12ee   : > { %v5118_v44 = vmul.f32 %v5389_v41, %v5111_v42 }
0x12f0   : > { %v5125_v45 = vadd.f32 %v5390_v43, %v5118_v44 }
0x12f2   : > { %5126 = vst.msk [vmem:[%s654_s4] sm:$0xff] %vm671_vm1, %v5125_v45 }
0x12f3   : > { %6160 = shalt.err (!%p6157_p8)
}
0x12f4   : > { %s6161_s2 = scalar_lea.hbm %s5139_s7, 128  ;;  %s6165_s26 = scalar_lea.hbm %s7374_s22, 256 }
0x12f5   : > { %p6162_p9 = scmp.ne.s32.totalorder %s5139_s7, %s6161_s2  ;;  %p6166_p0 = scmp.lt.s32.totalorder %s5139_s7, %s7374_s22 }
0x12f6   : > { %p6167_p1 = scmp.lt.s32.totalorder %s6165_s26, %s6161_s2 }
0x12f7   : > { %p6163_p12 = pnand %p6162_p9, %p6371_p10 }
0x12f8   : > { %p6168_p2 = por %p6167_p1, %p6166_p0 }
0x12f9   : > { %p6164_p13 = pneg %p6163_p12 }
0x12fb   : > { %p6169_p3 = pnand %p6168_p2, %p6164_p13 }
0x12fd   : > { %6172 = shalt.err (!%p6169_p3)
}
0x12fe   : > { %6051 = dma.vmem_to_hbm [thread:$0]  (%p6371_p10), %s5142_s24, 128, %s5139_s7, %s5128_s8  }
0x12ff PF: > { %p6057_p4 = scmp.ge.s32.totalorder %s6209_s5, 2  ;;  %s5153_s28 = sand.u32 1, %s6197_s0  }
0x1300   : > { %s5154_s1 = scalar_lea.sflag [#allocation5], %s5153_s28 }
0x1301   : > { %p6054_p5 = pnand %p6057_p4, %p6375_p11 }
0x1303   : > { %p6055_p6 = pneg %p6054_p5 }
0x1305   : > { %6192 = dma.done.wait (%p6055_p6), %s5154_s1, 128  }
0x1306   : > { %6194 = vsyncadd (%p6055_p6), %s5154_s1, 4294967168  ;;  %s7414_s5 = sld [smem:[#allocation9_spill]]  ;;  %s7417_s0 = smov %s6201_s23 }
0x1307   : > { %s7415_s30 = sld [smem:[#allocation8_spill]] }
0x1308   : > { %s7416_s1 = sld [smem:[#allocation10_spill]] }
0x130c   : > { %p38_p7 = scmp.ge.s32.totalorder %s7414_s5, 4  }
0x130d   : > { %s7418_s23 = smov %s7415_s30 }
0x130e   :  { %40 = sbr.rel (!%p38_p7) target bundleno = 34 (0x22), region = 155 }
0x1313   :  { %5159 = vsyncpa [#allocation5], 1 }
0x1314   :  { %5161 = vsyncpa [#allocation5 + $0x1], 1 }

// kernel: tpu_custom_call.1
= control target key start
LH: loop header
LB: loop body
LE: loop exit
PB: predicated region body
PF: predicated region fallthrough
CT: control target
= control target key end

     0   :  { %s7352_s0 = inlined_call_operand.vmem [shape: s32[2], index: 0, kind: input, shape index: {}]   ;;  %s7353_s1 = inlined_call_operand.vmem [shape: f32[2,8,32], index: 1, kind: input, shape index: {}]   ;;  %s7354_s2 = inlined_call_operand.vmem [shape: f32[32,32], index: 2, kind: input, shape index: {}]   ;;  %s7355_s3 = inlined_call_operand.vmem [shape: f32[1,32], index: 3, kind: input, shape index: {}]   ;;  %s7356_s4 = inlined_call_operand.vmem [shape: f32[1,32], index: 4, kind: input, shape index: {}]   ;;  %s7357_s5 = inlined_call_operand.vmem [shape: f32[1,32], index: 5, kind: input, shape index: {}]   ;;  %s7358_s6 = inlined_call_operand.vmem [shape: f32[2,4,32,8], index: 6, kind: input, shape index: {}]   ;;  %s7359_s7 = inlined_call_operand.vmem [shape: f32[2,4,32,8], index: 7, kind: input, shape index: {}]   ;;  %s7360_s8 = inlined_call_operand.vmem [shape: f32[2,4,32,8], index: 8, kind: input, shape index: {}]   ;;  %s7361_s9 = inlined_call_operand.vmem [shape: f32[2,4,1,8], index: 9, kind: input, shape index: {}]   ;;  %s7362_s10 = inlined_call_operand.vmem [shape: f32[2,4,1,8], index: 10, kind: input, shape index: {}]   ;;  %s7363_s11 = inlined_call_operand.vmem [shape: f32[2,4,1,8], index: 11, kind: input, shape index: {}]   ;;  %s7364_s12 = inlined_call_operand.vmem [shape: f32[2,4,8,32], index: 12, kind: input, shape index: {}]   ;;  %s7365_s13 = inlined_call_operand.vmem [shape: f32[2,1,32], index: 13, kind: input, shape index: {}]   ;;  %s7366_s14 = inlined_call_operand.vmem [shape: f32[2,1,32], index: 14, kind: input, shape index: {}]   ;;  %s7367_s15 = inlined_call_operand.vmem [shape: f32[2,1,32], index: 15, kind: input, shape index: {}]   ;;  %s7368_s16 = inlined_call_operand.vmem [shape: f32[2,32,64], index: 16, kind: input, shape index: {}]   ;;  %s7369_s17 = inlined_call_operand.vmem [shape: f32[2,1,64], index: 17, kind: input, shape index: {}]   ;;  %s7370_s18 = inlined_call_operand.vmem [shape: f32[2,64,32], index: 18, kind: input, shape index: {}]   ;;  %s7371_s19 = inlined_call_operand.vmem [shape: f32[2,1,32], index: 19, kind: input, shape index: {}]   ;;  %s7372_s20 = inlined_call_operand.vmem [shape: f32[2,1,32], index: 20, kind: input, shape index: {}]   ;;  %s7373_s21 = inlined_call_operand.vmem [shape: f32[2,1,32], index: 21, kind: input, shape index: {}]   ;;  %s7374_s22 = inlined_call_operand.hbm [shape: f32[2,8,32], index: 22, kind: output, shape index: {}]  }
   0x1   :  { %7385 = sst [smem:[#allocation12_spill]] %s7352_s0 }
   0x2   :  { %7386 = sst [smem:[#allocation13_spill]] %s7353_s1 }
   0x3   :  { %7387 = sst [smem:[#allocation14_spill]] %s7354_s2 }
   0x4   :  { %7388 = sst [smem:[#allocation15_spill]] %s7355_s3 }
   0x5   :  { %7389 = sst [smem:[#allocation16_spill]] %s7356_s4 }
   0x6   :  { %7390 = sst [smem:[#allocation17_spill]] %s7357_s5 }
   0x7   :  { %7391 = sst [smem:[#allocation18_spill]] %s7358_s6 }
   0x8   :  { %7392 = sst [smem:[#allocation19_spill]] %s7359_s7 }
   0x9   :  { %7393 = sst [smem:[#allocation20_spill]] %s7360_s8 }
   0xa   :  { %7394 = sst [smem:[#allocation21_spill]] %s7367_s15 }
   0xb   :  { %s7395_s29 = sld [smem:[#allocation12_spill]] }
  0x11   :  { %s27_s15 = sshll.u32 %s7395_s29, 4  ;;  %s28_s15 = int_to_ptr.vmem [resolvable:$true] %s27_s15 }
  0x12   :  { %s6135_s30 = scalar_lea.vmem %s28_s15, 16  ;;  %p6140_p1 = scmp.lt.s32.totalorder %s28_s15, %s28_s15 }
  0x13   :  { %p6136_p0 = scmp.ne.s32.totalorder %s28_s15, %s6135_s30  ;;  %p6141_p2 = scmp.lt.s32.totalorder %s6135_s30, %s6135_s30 }
  0x15   :  { %p6142_p3 = por %p6141_p2, %p6140_p1 }
  0x17   :  { %p6143_p4 = pnand %p6142_p3, %p6136_p0 }
  0x19   :  { %6146 = shalt.err (!%p6143_p4)  }
  0x1a   :  { %s6211_s4 = smov [#allocation3]  }
  0x1b   :  { %30 = dma.vmem_to_smem %s28_s15, 16, %s6211_s4, [#allocation2] }
  0x1c   :  { %6189 = dma.done.wait [#allocation2], 16 }
  0x1d   :  { %6190 = vsyncadd [#allocation2], 4294967280 }
  0x1e   :  { %32 = sfence }
  0x1f   :  { %33 = vsyncpa [#allocation5], 0 }
  0x20   :  { %35 = vsyncpa [#allocation5 + $0x1], 0  ;;  %s6333_s0 = smov 0   ;;  %s6335_s23 = smov 0  }
  0x21   :  { %s6337_s1 = smov 0   ;;  %s6339_s5 = smov 0  }
  0x22 LB: > { %7396 = sst [smem:[#allocation8_spill]] %s6205_s1  ;;  %s6354_s15 = sadd.s32 4294967295, %s6209_s5   ;;  %s6209_s5 = sphi %s6339_s5, %s7414_s5   ;;  %s6205_s1 = sphi %s6337_s1, %s7416_s1   ;;  %s6201_s23 = sphi %s6335_s23, %s7418_s23   ;;  %s6197_s0 = sphi %s6333_s0, %s7417_s0  }
  0x23   : > { %s5200_s24 = sadd.s32 4294967294, %s6209_s5   ;;  %s6358_s6 = sadd.s32 1, %s6209_s5  }
  0x24   : > { %7397 = sst [smem:[#allocation9_spill]] %s6358_s6  ;;  %s494_s25 = sadd.s32 1, %s6205_s1 }
  0x25   : > { %s491_s26 = ssub.s32 %s6209_s5, %s6358_s6  ;;  %p504_p5 = scmp.ne.s32.totalorder %s6205_s1, %s6201_s23 }
  0x26   : > { %p492_p6 = scmp.eq.s32.totalorder %s491_s26, 0  ;;  %p505_p7 = scmp.eq.s32.totalorder %s6354_s15, 1 }
  0x27   : > { %p510_p8 = scmp.ne.s32.totalorder %s6201_s23, %s6197_s0  ;;  %p511_p9 = scmp.eq.s32.totalorder %s5200_s24, 1 }
  0x28   : > { %s6369_s2 = scalar_select %p492_p6, %s6205_s1, %s494_s25  }
  0x29   : > { %p6371_p10 = por %p505_p7, %p504_p5  ;;  %p6375_p11 = por %p511_p9, %p510_p8 }
  0x2a   : > { %7398 = sst [smem:[#allocation10_spill]] %s6369_s2  ;;  %p5203_p12 = scmp.ge.s32.totalorder %s6209_s5, 1 }
  0x2b   : > { %s7400_s3 = scalar_select %p6375_p11, 1, 0 }
  0x2c   : > { %p596_p13 = scmp.lt.s32.totalorder %s6209_s5, 3 }
  0x2d   : > { %7401 = sst [smem:[#allocation11_spill]] %s7400_s3 }
  0x2e   : > { %p597_p0 = pnand %p5203_p12, %p596_p13 }
  0x2f   : > { %s7402_s30 = sld [smem:[#allocation14_spill]] (!%p597_p0)  ;;  %p655_p1 = scmp.lt.s32.totalorder (!%p597_p0), %s6354_s15, 1 }
  0x30   : > { %600 = sbr.rel (%p597_p0) target bundleno = 4863 (0x12ff), region = 104  ;;  %s7403_s6 = sld [smem:[#allocation13_spill]] (!%p597_p0) }
  0x31   : > { %s7404_s28 = sld [smem:[#allocation15_spill]] (!%p597_p0) }
  0x32   : > { %s7405_s2 = sld [smem:[#allocation18_spill]] (!%p597_p0) }
  0x33   : > { %s7406_s1 = sld [smem:[#allocation16_spill]] (!%p597_p0) }
  0x34   : > { %s7408_s7 = sld [smem:[#allocation19_spill]] (!%p597_p0) }
  0x35   : > { %v663_v0 = vld [vmem:[%s7402_s30 + $0x18] sm:$0xff]  ;;  %v6212_v1 = vmov 0.0   ;;  %v662_v2 = vld [vmem:[%s7402_s30 + $0x10] sm:$0xff]  ;;  %vm6213_vm0 = vmmov 0   ;;  %s656_s25 = scalar_select %p655_p1, %s6354_s15, 1  ;;  %v661_v3 = vld [vmem:[%s7402_s30 + $0x8] sm:$0xff] }
  0x36   : > { %5596 = vmatprep.subr.mxu0 %v6212_v1  ;;  %5604 = vmatprep.mubr.msk.f32.mxu0 %vm6213_vm0, %v6212_v1  ;;  %v660_v4 = vld [vmem:[%s7402_s30] sm:$0xff]  ;;  %vm671_vm1 = vcmask 261120   ;;  %s7409_s8 = sld [smem:[#allocation20_spill]]  ;;  %vm1755_vm2 = vcmask 64512   ;;  %vm2843_vm4 = vcmask 523264  }
  0x37   : > { %5597 = vmatpush3.msra.mxu0 %v663_v0  ;;  %5607 = vmatprep.subr.mxu1 %v6212_v1  ;;  %s5205_s29 = sshll.u32 %s656_s25, 3  ;;  %v5206_v6 = vld [vmem:[%s7404_s28] ss:$0 sm:$0xff]  ;;  %s652_s25 = sand.u32 1, %s6201_s23  }
  0x38   : > { %5598 = vmatprep.subr.mxu0 %v6212_v1  ;;  %5615 = vmatprep.mubr.msk.f32.mxu1 %vm6213_vm0, %v6212_v1  ;;  %s658_s3 = scalar_lea.vmem %s7403_s6, %s5205_s29  ;;  %v783_v16 = vld [vmem:[%s7405_s2 + $0x18] sm:$0xff]  ;;  %v782_v18 = vld [vmem:[%s7405_s2 + $0x10] sm:$0xff]  ;;  %v781_v20 = vld [vmem:[%s7405_s2 + $0x8] sm:$0xff]  ;;  %s7407_s29 = sld [smem:[#allocation17_spill]] }
  0x39   : > { %5599 = vmatpush3.msra.mxu0 %v662_v2  ;;  %v659_v5 = vld [vmem:[%s658_s3] sm:$0xff]  ;;  %v787_v17 = vld [vmem:[%s7405_s2 + $0x38] sm:$0xff]  ;;  %5608 = vmatpush3.msra.mxu1 %v783_v16  ;;  %v786_v19 = vld [vmem:[%s7405_s2 + $0x30] sm:$0xff]  ;;  %s7412_s6 = sld [smem:[#allocation21_spill]]  ;;  %s5204_s26 = sshll.u32 %s652_s25, 3 }
  0x3a   : > { %5600 = vmatprep.subr.mxu0 %v6212_v1  ;;  %5609 = vmatprep.subr.mxu1 %v6212_v1  ;;  %v785_v21 = vld [vmem:[%s7405_s2 + $0x28] sm:$0xff]  ;;  %v780_v22 = vld [vmem:[%s7405_s2] sm:$0xff]  ;;  %v791_v33 = vld [vmem:[%s7405_s2 + $0x58] sm:$0xff]  ;;  %s654_s4 = scalar_lea.vmem [#allocation4], %s5204_s26 }
  0x3b   : > { %5601 = vmatpush3.msra.mxu0 %v661_v3  ;;  %5610 = vmatpush3.msra.mxu1 %v782_v18  ;;  %v784_v23 = vld [vmem:[%s7405_s2 + $0x20] sm:$0xff]  ;;  %v795_v34 = vld [vmem:[%s7405_s2 + $0x78] sm:$0xff]  ;;  %v790_v35 = vld [vmem:[%s7405_s2 + $0x50] sm:$0xff]  ;;  %s5141_s24 = sshll.u32 %s654_s4, 4  ;;  %s5142_s24 = int_to_ptr.vmem [resolvable:$true] %s5141_s24 }
  0x3c   : > { %5602 = vmatprep.subr.mxu0 %v6212_v1  ;;  %5611 = vmatprep.subr.mxu1 %v6212_v1  ;;  %v5208_v28 = vld [vmem:[%s7406_s1] ss:$0 sm:$0xff]  ;;  %v794_v36 = vld [vmem:[%s7405_s2 + $0x70] sm:$0xff]  ;;  %v789_v37 = vld [vmem:[%s7405_s2 + $0x48] sm:$0xff]  ;;  %s6147_s28 = scalar_lea.vmem %s5142_s24, 128  ;;  %s6214_s1 = smov [#allocation4]  }
  0x3d   : > { %5603 = vmatpush3.msra.mxu0 %v660_v4  ;;  %5612 = vmatpush3.msra.mxu1 %v781_v20  ;;  %v793_v38 = vld [vmem:[%s7405_s2 + $0x68] sm:$0xff]  ;;  %v788_v39 = vld [vmem:[%s7405_s2 + $0x40] sm:$0xff]  ;;  %v1110_v41 = vld [vmem:[%s7408_s7 + $0x18] sm:$0xff]  ;;  %p6148_p2 = scmp.ne.s32.totalorder %s5142_s24, %s6147_s28  ;;  %s6151_s30 = sshll.u32 %s6214_s1, 4  ;;  %s6152_s30 = int_to_ptr.vmem [resolvable:$false] %s6151_s30 }
  0x3e   : > { %5605 = vmatmul.mubr.msk.f32.vlgmr.msra.gmra.mxu0 %vm671_vm1, %v659_v5  ;;  %5618 = vmatprep.subr.mxu0 %v6212_v1  ;;  %v5209_v30 = vld [vmem:[%s7407_s29] ss:$0 sm:$0xff]  ;;  %v1114_v42 = vld [vmem:[%s7408_s7 + $0x38] sm:$0xff]  ;;  %v1109_v43 = vld [vmem:[%s7408_s7 + $0x10] sm:$0xff]  ;;  %s777_s29 = sld [smem:[#allocation3 + %s6354_s15]]  ;;  %p6154_p5 = scmp.lt.s32.totalorder %s5142_s24, %s6152_s30 }
  0x3f   : > { %5626 = vmatprep.mubr.msk.f32.mxu0 %vm6213_vm0, %v6212_v1  ;;  %5619 = vmatpush3.msra.mxu0 %v787_v17  ;;  %v792_v40 = vld [vmem:[%s7405_s2 + $0x60] sm:$0xff]  ;;  %v1113_v44 = vld [vmem:[%s7408_s7 + $0x30] sm:$0xff]  ;;  %v1108_v45 = vld [vmem:[%s7408_s7 + $0x8] sm:$0xff]  ;;  %p6149_p3 = pnand %p6148_p2, %p6371_p10 }
  0x40   : > { %5620 = vmatprep.subr.mxu0 %v6212_v1  ;;  %5613 = vmatprep.subr.mxu1 %v6212_v1  ;;  %v1112_v46 = vld [vmem:[%s7408_s7 + $0x28] sm:$0xff]  ;;  %v1107_v47 = vld [vmem:[%s7408_s7] sm:$0xff]  ;;  %v1118_v49 = vld [vmem:[%s7408_s7 + $0x58] sm:$0xff] }
  0x41   : > { %5621 = vmatpush3.msra.mxu0 %v786_v19  ;;  %5614 = vmatpush3.msra.mxu1 %v780_v22  ;;  %v1111_v48 = vld [vmem:[%s7408_s7 + $0x20] sm:$0xff]  ;;  %v1122_v50 = vld [vmem:[%s7408_s7 + $0x78] sm:$0xff]  ;;  %v1117_v51 = vld [vmem:[%s7408_s7 + $0x50] sm:$0xff]  ;;  %p6150_p4 = pneg %p6149_p3 }
  0x42   : > { %5622 = vmatprep.subr.mxu0 %v6212_v1  ;;  %5629 = vmatprep.subr.mxu1 %v6212_v1  ;;  %v1121_v52 = vld [vmem:[%s7408_s7 + $0x70] sm:$0xff]  ;;  %v1116_v53 = vld [vmem:[%s7408_s7 + $0x48] sm:$0xff]  ;;  %v1115_v55 = vld [vmem:[%s7408_s7 + $0x40] sm:$0xff] }
  0x43   : > { %5623 = vmatpush3.msra.mxu0 %v785_v21  ;;  %v1120_v54 = vld [vmem:[%s7408_s7 + $0x68] sm:$0xff]  ;;  %v1119_v56 = vld [vmem:[%s7408_s7 + $0x60] sm:$0xff]  ;;  %v1434_v57 = vld [vmem:[%s7409_s8 + $0x18] sm:$0xff] }
  0x44   : > { %5624 = vmatprep.subr.mxu0 %v6212_v1  ;;  %v1438_v58 = vld [vmem:[%s7409_s8 + $0x38] sm:$0xff]  ;;  %v1433_v59 = vld [vmem:[%s7409_s8 + $0x10] sm:$0xff]  ;;  %v1432_v61 = vld [vmem:[%s7409_s8 + $0x8] sm:$0xff] }
  0x45   : > { %5625 = vmatpush3.msra.mxu0 %v784_v23  ;;  %v1437_v60 = vld [vmem:[%s7409_s8 + $0x30] sm:$0xff]  ;;  %v1436_v62 = vld [vmem:[%s7409_s8 + $0x28] sm:$0xff]  ;;  %v1431_v63 = vld [vmem:[%s7409_s8] sm:$0xff] }
  0x46   : > { %5640 = vmatprep.subr.mxu0 %v6212_v1  ;;  %v1435_v0 = vld [vmem:[%s7409_s8 + $0x20] sm:$0xff]  ;;  %v1442_v2 = vld [vmem:[%s7409_s8 + $0x58] sm:$0xff]  ;;  %v1441_v4 = vld [vmem:[%s7409_s8 + $0x50] sm:$0xff] }
  0x47   : > { %v1446_v3 = vld [vmem:[%s7409_s8 + $0x78] sm:$0xff]  ;;  %v1445_v5 = vld [vmem:[%s7409_s8 + $0x70] sm:$0xff]  ;;  %v5218_v18 = vld [vmem:[%s7362_s10] ss:$0 sm:$0xff] }
  0x48   : > { %v5219_v19 = vld [vmem:[%s7362_s10 + $0x1] ss:$0 sm:$0xff]  ;;  %v5210_v22 = vld [vmem:[%s7361_s9] ss:$0 sm:$0xff] }
  0x49   : > { %v5211_v23 = vld [vmem:[%s7361_s9 + $0x1] ss:$0 sm:$0xff] }
  0xfe   : > { %v741_v7 = vpop.f32.mrf.mxu0 }
  0xff   : > { %v742_v8 = vadd.f32 %v5206_v6, %v741_v7  ;;  %v1440_v6 = vld [vmem:[%s7409_s8 + $0x48] sm:$0xff] }
 0x100   : > { %v5606_v9 = vpop.f32.mrf.mxu0  ;;  %v1444_v7 = vld [vmem:[%s7409_s8 + $0x68] sm:$0xff] }
 0x101   : > { %v747_v10 = vsel %vm671_vm1, %v742_v8, 0.0  ;;  %v1443_v9 = vld [vmem:[%s7409_s8 + $0x60] sm:$0xff] }
 0x102   : > { %748 = vadd.xlane.f32.xlu0 %v747_v10 }
 0x18b   : > { %v749_v11 = vpop.xlane.xlu0 %748 }
 0x18c   : > { %v751_v12 = vmul.f32 0.03125, %v749_v11 }
 0x18e   : > { %v752_v13 = vsub.f32 %v742_v8, %v751_v12  ;;  %v1439_v8 = vld [vmem:[%s7409_s8 + $0x40] sm:$0xff] }
 0x190   : > { %v753_v14 = vmul.f32 %v752_v13, %v752_v13 }
 0x192   : > { %v754_v15 = vsel %vm671_vm1, %v753_v14, 0.0 }
 0x193   : > { %755 = vadd.xlane.f32.xlu0 %v754_v15 }
 0x21c   : > { %v756_v24 = vpop.xlane.xlu0 %755 }
 0x21d   : > { %v757_v25 = vmul.f32 0.03125, %v756_v24 }
 0x21f   : > { %v758_v26 = vadd.f32 1e-05, %v757_v25 }
 0x221   : > { %6093 = vrsqrt.f32 %v758_v26 }
 0x22e   : > { %v6094_v27 = vpop.eup %6093 }
 0x22f   : > { %v760_v29 = vmul.f32 %v6094_v27, %v752_v13 }
 0x231   : > { %v767_v31 = vmul.f32 %v5208_v28, %v760_v29 }
 0x233   : > { %v6454_v32 = vadd.f32 %v5209_v30, %v767_v31  ;;  %v5220_v30 = vld [vmem:[%s7362_s10 + $0x2] ss:$0 sm:$0xff]  ;;  %v5221_v31 = vld [vmem:[%s7362_s10 + $0x3] ss:$0 sm:$0xff] }
 0x235   : > { %5616 = vmatmul.mubr.msk.f32.vlgmr.msra.gmra.mxu1 %vm671_vm1, %v6454_v32  ;;  %5627 = vmatmul.mubr.msk.f32.vlgmr.msra.gmra.mxu0 %vm671_vm1, %v6454_v32 }
 0x236   : > { %5630 = vmatpush3.msra.mxu1 %v791_v33  ;;  %5641 = vmatpush3.msra.mxu0 %v795_v34 }
 0x237   : > { %5631 = vmatprep.subr.mxu1 %v6212_v1  ;;  %5642 = vmatprep.subr.mxu0 %v6212_v1 }
 0x238   : > { %5632 = vmatpush3.msra.mxu1 %v790_v35  ;;  %5643 = vmatpush3.msra.mxu0 %v794_v36  ;;  %v5212_v35 = vld [vmem:[%s7361_s9 + $0x2] ss:$0 sm:$0xff]  ;;  %v5213_v36 = vld [vmem:[%s7361_s9 + $0x3] ss:$0 sm:$0xff] }
 0x239   : > { %5633 = vmatprep.subr.mxu1 %v6212_v1  ;;  %5644 = vmatprep.subr.mxu0 %v6212_v1 }
 0x23a   : > { %5634 = vmatpush3.msra.mxu1 %v789_v37  ;;  %5645 = vmatpush3.msra.mxu0 %v793_v38 }
 0x23b   : > { %5635 = vmatprep.subr.mxu1 %v6212_v1  ;;  %5646 = vmatprep.subr.mxu0 %v6212_v1 }
 0x23c   : > { %5636 = vmatpush3.msra.mxu1 %v788_v39  ;;  %5637 = vmatprep.mubr.msk.f32.mxu1 %vm6213_vm0, %v6212_v1 }
 0x23d   : > { %5647 = vmatpush3.msra.mxu0 %v792_v40  ;;  %5648 = vmatprep.mubr.msk.f32.mxu0 %vm6213_vm0, %v6212_v1 }
 0x23e   : > { %5638 = vmatmul.mubr.msk.f32.vlgmr.msra.gmra.mxu1 %vm671_vm1, %v6454_v32  ;;  %5649 = vmatmul.mubr.msk.f32.vlgmr.msra.gmra.mxu0 %vm671_vm1, %v6454_v32 }
 0x23f   : > { %5651 = vmatprep.subr.mxu1 %v6212_v1  ;;  %5662 = vmatprep.subr.mxu0 %v6212_v1 }
 0x240   : > { %5652 = vmatpush3.msra.mxu1 %v1110_v41  ;;  %5663 = vmatpush3.msra.mxu0 %v1114_v42 }
 0x241   : > { %5653 = vmatprep.subr.mxu1 %v6212_v1  ;;  %5664 = vmatprep.subr.mxu0 %v6212_v1 }
 0x242   : > { %5654 = vmatpush3.msra.mxu1 %v1109_v43  ;;  %5665 = vmatpush3.msra.mxu0 %v1113_v44  ;;  %v5226_v43 = vld [vmem:[%s7363_s11] ss:$0 sm:$0xff]  ;;  %v5227_v44 = vld [vmem:[%s7363_s11 + $0x1] ss:$0 sm:$0xff] }
 0x243   : > { %5655 = vmatprep.subr.mxu1 %v6212_v1  ;;  %5666 = vmatprep.subr.mxu0 %v6212_v1 }
 0x244   : > { %5656 = vmatpush3.msra.mxu1 %v1108_v45  ;;  %5667 = vmatpush3.msra.mxu0 %v1112_v46 }
 0x245   : > { %5657 = vmatprep.subr.mxu1 %v6212_v1  ;;  %5668 = vmatprep.subr.mxu0 %v6212_v1 }
 0x246   : > { %5658 = vmatpush3.msra.mxu1 %v1107_v47  ;;  %5659 = vmatprep.mubr.msk.f32.mxu1 %vm6213_vm0, %v6212_v1 }
 0x247   : > { %5669 = vmatpush3.msra.mxu0 %v1111_v48  ;;  %5670 = vmatprep.mubr.msk.f32.mxu0 %vm6213_vm0, %v6212_v1 }
 0x248   : > { %5660 = vmatmul.mubr.msk.f32.vlgmr.msra.gmra.mxu1 %vm671_vm1, %v6454_v32  ;;  %5671 = vmatmul.mubr.msk.f32.vlgmr.msra.gmra.mxu0 %vm671_vm1, %v6454_v32 }
 0x249   : > { %5673 = vmatprep.subr.mxu1 %v6212_v1  ;;  %5684 = vmatprep.subr.mxu0 %v6212_v1 }
 0x24a   : > { %5674 = vmatpush3.msra.mxu1 %v1118_v49  ;;  %5685 = vmatpush3.msra.mxu0 %v1122_v50 }
 0x24b   : > { %5675 = vmatprep.subr.mxu1 %v6212_v1  ;;  %5686 = vmatprep.subr.mxu0 %v6212_v1 }
 0x24c   : > { %5676 = vmatpush3.msra.mxu1 %v1117_v51  ;;  %5687 = vmatpush3.msra.mxu0 %v1121_v52 }
 0x24d   : > { %5677 = vmatprep.subr.mxu1 %v6212_v1  ;;  %5688 = vmatprep.subr.mxu0 %v6212_v1 }
 0x24e   : > { %5678 = vmatpush3.msra.mxu1 %v1116_v53  ;;  %5689 = vmatpush3.msra.mxu0 %v1120_v54 }
 0x24f   : > { %5679 = vmatprep.subr.mxu1 %v6212_v1  ;;  %5690 = vmatprep.subr.mxu0 %v6212_v1 }
 0x250   : > { %5680 = vmatpush3.msra.mxu1 %v1115_v55  ;;  %5681 = vmatprep.mubr.msk.f32.mxu1 %vm6213_vm0, %v6212_v1  ;;  %v775_v55 = vlaneseq }
 0x251   : > { %5691 = vmatpush3.msra.mxu0 %v1119_v56  ;;  %5692 = vmatprep.mubr.msk.f32.mxu0 %vm6213_vm0, %v6212_v1 }
 0x252   : > { %5682 = vmatmul.mubr.msk.f32.vlgmr.msra.gmra.mxu1 %vm671_vm1, %v6454_v32  ;;  %5693 = vmatmul.mubr.msk.f32.vlgmr.msra.gmra.mxu0 %vm671_vm1, %v6454_v32  ;;  %v776_v56 = vand.u32 127, %v775_v55 }
 0x253   : > { %5695 = vmatprep.subr.mxu1 %v6212_v1  ;;  %5706 = vmatprep.subr.mxu0 %v6212_v1 }
 0x254   : > { %5696 = vmatpush3.msra.mxu1 %v1434_v57  ;;  %5707 = vmatpush3.msra.mxu0 %v1438_v58  ;;  %v778_v57 = vstv %s777_s29  ;;  %s5392_s29 = sshll.u32 %s6354_s15, 7  ;;  %s6153_s15 = scalar_lea.vmem %s6152_s30, 256 }
 0x255   : > { %5697 = vmatprep.subr.mxu1 %v6212_v1  ;;  %5708 = vmatprep.subr.mxu0 %v6212_v1  ;;  %vm6721_vm3 = vcmp.lt.s32.totalorder %v776_v56, %v778_v57  ;;  %p6155_p6 = scmp.lt.s32.totalorder %s6153_s15, %s6147_s28 }
 0x256   : > { %5698 = vmatpush3.msra.mxu1 %v1433_v59  ;;  %5709 = vmatpush3.msra.mxu0 %v1437_v60 }
 0x257   : > { %5699 = vmatprep.subr.mxu1 %v6212_v1  ;;  %5710 = vmatprep.subr.mxu0 %v6212_v1  ;;  %p6156_p7 = por %p6155_p6, %p6154_p5 }
 0x258   : > { %5700 = vmatpush3.msra.mxu1 %v1432_v61  ;;  %5711 = vmatpush3.msra.mxu0 %v1436_v62 }
 0x259   : > { %5701 = vmatprep.subr.mxu1 %v6212_v1  ;;  %5712 = vmatprep.subr.mxu0 %v6212_v1  ;;  %p6157_p8 = pnand %p6156_p7, %p6150_p4 }
 0x25a   : > { %5702 = vmatpush3.msra.mxu1 %v1431_v63  ;;  %5703 = vmatprep.mubr.msk.f32.mxu1 %vm6213_vm0, %v6212_v1 }
 0x25b   : > { %5713 = vmatpush3.msra.mxu0 %v1435_v0  ;;  %5714 = vmatprep.mubr.msk.f32.mxu0 %vm6213_vm0, %v6212_v1 }
 0x25c   : > { %5704 = vmatmul.mubr.msk.f32.vlgmr.msra.gmra.mxu1 %vm671_vm1, %v6454_v32  ;;  %5715 = vmatmul.mubr.msk.f32.vlgmr.msra.gmra.mxu0 %vm671_vm1, %v6454_v32 }
 0x25d   : > { %5717 = vmatprep.subr.mxu1 %v6212_v1  ;;  %5728 = vmatprep.subr.mxu0 %v6212_v1 }
 0x25e   : > { %5718 = vmatpush3.msra.mxu1 %v1442_v2  ;;  %5729 = vmatpush3.msra.mxu0 %v1446_v3 }
 0x25f   : > { %5719 = vmatprep.subr.mxu1 %v6212_v1  ;;  %5730 = vmatprep.subr.mxu0 %v6212_v1 }
 0x260   : > { %5720 = vmatpush3.msra.mxu1 %v1441_v4  ;;  %5731 = vmatpush3.msra.mxu0 %v1445_v5 }
 0x261   : > { %5721 = vmatprep.subr.mxu1 %v6212_v1  ;;  %5732 = vmatprep.subr.mxu0 %v6212_v1 }
 0x262   : > { %5722 = vmatpush3.msra.mxu1 %v1440_v6  ;;  %5733 = vmatpush3.msra.mxu0 %v1444_v7 }
 0x263   : > { %5723 = vmatprep.subr.mxu1 %v6212_v1  ;;  %5734 = vmatprep.subr.mxu0 %v6212_v1 }
 0x264   : > { %5724 = vmatpush3.msra.mxu1 %v1439_v8  ;;  %5725 = vmatprep.mubr.msk.f32.mxu1 %vm6213_vm0, %v6212_v1 }
 0x265   : > { %5735 = vmatpush3.msra.mxu0 %v1443_v9  ;;  %5736 = vmatprep.mubr.msk.f32.mxu0 %vm6213_vm0, %v6212_v1 }
 0x266   : > { %5726 = vmatmul.mubr.msk.f32.vlgmr.msra.gmra.mxu1 %vm671_vm1, %v6454_v32  ;;  %5737 = vmatmul.mubr.msk.f32.vlgmr.msra.gmra.mxu0 %vm671_vm1, %v6454_v32 }
 0x267   : > { %5739 = vmatprep.subr.mxu0 %v6212_v1  ;;  %5744 = vmatprep.subr.mxu1 %v6212_v1 }
 0x268   : > { %5741 = vmatprep.mubr.msk.f32.mxu0 %vm6213_vm0, %v6212_v1  ;;  %5746 = vmatprep.mubr.msk.f32.mxu1 %vm6213_vm0, %v6212_v1 }
 0x2f5   : > { %v893_v10 = vpop.f32.mrf.mxu1  ;;  %v963_v11 = vpop.f32.mrf.mxu0 }
 0x2f6   : > { %v894_v28 = vadd.f32 %v5210_v22, %v893_v10  ;;  %v964_v29 = vadd.f32 %v5211_v23, %v963_v11 }
 0x2f7   : > { %v5617_v12 = vpop.f32.mrf.mxu1  ;;  %v5628_v13 = vpop.f32.mrf.mxu0 }
 0x2fe   : > { %v1033_v14 = vpop.f32.mrf.mxu1  ;;  %v1103_v15 = vpop.f32.mrf.mxu0 }
 0x2ff   : > { %v1034_v41 = vadd.f32 %v5212_v35, %v1033_v14  ;;  %v1104_v42 = vadd.f32 %v5213_v36, %v1103_v15 }
 0x300   : > { %v5639_v16 = vpop.f32.mrf.mxu1  ;;  %v5650_v17 = vpop.f32.mrf.mxu0 }
 0x308   : > { %v1217_v20 = vpop.f32.mrf.mxu1  ;;  %v1287_v21 = vpop.f32.mrf.mxu0 }
 0x309   : > { %v1218_v24 = vadd.f32 %v5218_v18, %v1217_v20  ;;  %v1288_v25 = vadd.f32 %v5219_v19, %v1287_v21 }
 0x30a   : > { %v5661_v26 = vpop.f32.mrf.mxu1  ;;  %v5672_v27 = vpop.f32.mrf.mxu0 }
 0x30b   : > { %5740 = vmatpush3.xpose.msk.msra.mxu0 %vm1755_vm2, %v1218_v24  ;;  %5745 = vmatpush3.xpose.msk.msra.mxu1 %vm1755_vm2, %v1288_v25 }
 0x30c   : > { %5749 = vmatprep.subr.mxu0 %v6212_v1  ;;  %5754 = vmatprep.subr.mxu1 %v6212_v1 }
 0x30e   : > { %5742 = vmatmul.mubr.msk.f32.vlgmr.msra.gmra.mxu0 %vm1755_vm2, %v894_v28  ;;  %5747 = vmatmul.mubr.msk.f32.vlgmr.msra.gmra.mxu1 %vm1755_vm2, %v964_v29 }
 0x30f   : > { %5751 = vmatprep.mubr.msk.f32.mxu0 %vm6213_vm0, %v6212_v1  ;;  %5756 = vmatprep.mubr.msk.f32.mxu1 %vm6213_vm0, %v6212_v1 }
 0x312   : > { %v1357_v33 = vpop.f32.mrf.mxu1  ;;  %v1427_v34 = vpop.f32.mrf.mxu0 }
 0x313   : > { %v1358_v37 = vadd.f32 %v5220_v30, %v1357_v33  ;;  %v1428_v38 = vadd.f32 %v5221_v31, %v1427_v34 }
 0x314   : > { %v5683_v39 = vpop.f32.mrf.mxu1  ;;  %v5694_v40 = vpop.f32.mrf.mxu0 }
 0x315   : > { %5750 = vmatpush3.xpose.msk.msra.mxu0 %vm1755_vm2, %v1358_v37  ;;  %5755 = vmatpush3.xpose.msk.msra.mxu1 %vm1755_vm2, %v1428_v38  ;;  %v5228_v37 = vld [vmem:[%s7363_s11 + $0x2] ss:$0 sm:$0xff] }
 0x316   : > { %5759 = vmatprep.subr.mxu0 %v6212_v1  ;;  %5764 = vmatprep.subr.mxu1 %v6212_v1 }
 0x318   : > { %5752 = vmatmul.mubr.msk.f32.vlgmr.msra.gmra.mxu0 %vm1755_vm2, %v1034_v41  ;;  %5757 = vmatmul.mubr.msk.f32.vlgmr.msra.gmra.mxu1 %vm1755_vm2, %v1104_v42  ;;  %v5229_v41 = vld [vmem:[%s7363_s11 + $0x3] ss:$0 sm:$0xff] }
 0x319   : > { %5761 = vmatprep.mubr.msk.f32.mxu0 %vm6213_vm0, %v6212_v1  ;;  %5766 = vmatprep.mubr.msk.f32.mxu1 %vm6213_vm0, %v6212_v1 }
 0x31c   : > { %v1541_v45 = vpop.f32.mrf.mxu1  ;;  %v1611_v46 = vpop.f32.mrf.mxu0 }
 0x31d   : > { %v1542_v47 = vadd.f32 %v5226_v43, %v1541_v45  ;;  %v1612_v48 = vadd.f32 %v5227_v44, %v1611_v46 }
 0x31e   : > { %v5705_v49 = vpop.f32.mrf.mxu1  ;;  %v5716_v50 = vpop.f32.mrf.mxu0 }
 0x31f   : > { %5760 = vmatpush3.msra.mxu0 %v1542_v47  ;;  %5765 = vmatpush3.msra.mxu1 %v1612_v48  ;;  %v2402_v49 = vld [vmem:[%s7364_s12] sm:$0xff]  ;;  %v2403_v50 = vld [vmem:[%s7364_s12 + $0x8] sm:$0xff] }
 0x320   : > { %5769 = vmatprep.subr.mxu0 %v6212_v1  ;;  %5774 = vmatprep.subr.mxu1 %v6212_v1 }
 0x326   : > { %v6716_v51 = vpop.f32.mrf.mxu1  ;;  %v6718_v52 = vpop.f32.mrf.mxu0 }
 0x327   : > { %v1682_v40 = vadd.f32 %v5228_v37, %v6716_v51  ;;  %v1752_v44 = vadd.f32 %v5229_v41, %v6718_v52  ;;  %v2404_v51 = vld [vmem:[%s7364_s12 + $0x10] sm:$0xff] }
 0x328   : > { %v5727_v53 = vpop.f32.mrf.mxu1  ;;  %v5738_v54 = vpop.f32.mrf.mxu0  ;;  %v2830_v41 = vld [vmem:[%s7370_s18 + $0x10] sm:$0xff] }
 0x329   : > { %v2405_v54 = vld [vmem:[%s7364_s12 + $0x18] sm:$0xff] }
 0x3ce   : > { %v1828_v59 = vpop.f32.mrf.mxu0  ;;  %v1904_v60 = vpop.f32.mrf.mxu1 }
 0x3cf   : > { %v2062_v61 = vsel %vm6721_vm3, %v1828_v59, -1e+30  ;;  %v2063_v2 = vsel %vm6721_vm3, %v1904_v60, -1e+30 }
 0x3d0   : > { %v5743_v62 = vpop.f32.mrf.mxu0  ;;  %v5748_v63 = vpop.f32.mrf.mxu1  ;;  %v2066_v0 = vsel %vm1755_vm2, %v2062_v61, -inf  ;;  %v2069_v3 = vsel %vm1755_vm2, %v2063_v2, -inf }
 0x3d1   : > { %2067 = vmax.xlane.f32.xlu1 %v2066_v0 }
 0x3d5   : > { %2070 = vmax.xlane.f32.xlu1 %v2069_v3 }
 0x3d8   : > { %v1980_v4 = vpop.f32.mrf.mxu0  ;;  %v2056_v5 = vpop.f32.mrf.mxu1 }
 0x3d9   : > { %v2064_v6 = vsel %vm6721_vm3, %v1980_v4, -1e+30  ;;  %v2065_v7 = vsel %vm6721_vm3, %v2056_v5, -1e+30 }
 0x3da   : > { %v5753_v8 = vpop.f32.mrf.mxu0  ;;  %v5758_v9 = vpop.f32.mrf.mxu1  ;;  %v2075_v10 = vsel %vm1755_vm2, %v2065_v7, -inf  ;;  %v2072_v11 = vsel %vm1755_vm2, %v2064_v6, -inf }
 0x3db   : > { %2076 = vmax.xlane.f32.xlu1 %v2075_v10  ;;  %2073 = vmax.xlane.f32.xlu0 %v2072_v11 }
 0x45a   : > { %v2068_v12 = vpop.xlane.xlu1 %2067 }
 0x45b   : > { %v2078_v13 = vsub.f32 %v2062_v61, %v2068_v12 }
 0x45d   : > { %v2082_v14 = vmul.f32 1.442695, %v2078_v13  ;;  %v5250_v13 = vld [vmem:[%s7365_s13] ss:$0 sm:$0xff] }
 0x45e   : > { %v2071_v15 = vpop.xlane.xlu1 %2070 }
 0x45f   : > { %6095 = vpow2.f32 %v2082_v14  ;;  %v2079_v16 = vsub.f32 %v2063_v2, %v2071_v15 }
 0x461   : > { %v2084_v17 = vmul.f32 1.442695, %v2079_v16 }
 0x463   : > { %6097 = vpow2.f32 %v2084_v17 }
 0x464   : > { %v2077_v18 = vpop.xlane.xlu1 %2076  ;;  %v2074_v19 = vpop.xlane.xlu0 %2073 }
 0x465   : > { %v2081_v20 = vsub.f32 %v2065_v7, %v2077_v18  ;;  %v2080_v21 = vsub.f32 %v2064_v6, %v2074_v19 }
 0x467   : > { %v2088_v22 = vmul.f32 1.442695, %v2081_v20  ;;  %v2086_v23 = vmul.f32 1.442695, %v2080_v21 }
 0x469   : > { %6099 = vpow2.f32 %v2088_v22 }
 0x46a   : > { %6101 = vpow2.f32 %v2086_v23  ;;  %v2746_v23 = vld [vmem:[%s7368_s16 + $0x18] sm:$0xff] }
 0x46c   : > { %v6096_v24 = vpop.eup %6095 }
 0x46d   : > { %v2090_v25 = vsel %vm1755_vm2, %v6096_v24, 0.0 }
 0x46e   : > { %2091 = vadd.xlane.f32.xlu0 %v2090_v25  ;;  %v2743_v25 = vld [vmem:[%s7368_s16] sm:$0xff] }
 0x470   : > { %v6098_v26 = vpop.eup %6097 }
 0x471   : > { %v2093_v27 = vsel %vm1755_vm2, %v6098_v26, 0.0 }
 0x472   : > { %2094 = vadd.xlane.f32.xlu1 %v2093_v27  ;;  %v2834_v27 = vld [vmem:[%s7370_s18 + $0x30] sm:$0xff] }
 0x476   : > { %v6100_v28 = vpop.eup %6099 }
 0x477   : > { %v6102_v29 = vpop.eup %6101  ;;  %v2099_v30 = vsel %vm1755_vm2, %v6100_v28, 0.0 }
 0x478   : > { %2100 = vadd.xlane.f32.xlu1 %v2099_v30  ;;  %v2096_v31 = vsel %vm1755_vm2, %v6102_v29, 0.0  ;;  %v2831_v30 = vld [vmem:[%s7370_s18 + $0x18] sm:$0xff] }
 0x479   : > { %2097 = vadd.xlane.f32.xlu0 %v2096_v31 }
 0x4f7   : > { %v2092_v33 = vpop.xlane.xlu0 %2091 }
 0x4f8   : > { %6103 = vrcp.f32 %v2092_v33 }
 0x4fb   : > { %v2095_v34 = vpop.xlane.xlu1 %2094 }
 0x4fc   : > { %6105 = vrcp.f32 %v2095_v34 }
 0x501   : > { %v2101_v35 = vpop.xlane.xlu1 %2100 }
 0x502   : > { %6107 = vrcp.f32 %v2101_v35  ;;  %v2098_v36 = vpop.xlane.xlu0 %2097 }
 0x503   : > { %6109 = vrcp.f32 %v2098_v36  ;;  %v5251_v36 = vld [vmem:[%s7366_s14] ss:$0 sm:$0xff] }
 0x505   : > { %v6104_v38 = vpop.eup %6103 }
 0x506   : > { %v2106_v39 = vmul.f32 %v6104_v38, %v6096_v24  ;;  %v2745_v24 = vld [vmem:[%s7368_s16 + $0x10] sm:$0xff]  ;;  %v5252_v38 = vld [vmem:[%s7412_s6] ss:$0 sm:$0xff] }
 0x508   : > { %5762 = vmatmul.mubr.msk.f32.vlgmr.msra.gmra.mxu0 %vm1755_vm2, %v2106_v39 }
 0x509   : > { %v6106_v42 = vpop.eup %6105  ;;  %5770 = vmatpush3.msra.mxu0 %v1682_v40  ;;  %5771 = vmatprep.mubr.msk.f32.mxu0 %vm6213_vm0, %v6212_v1 }
 0x50a   : > { %v2107_v43 = vmul.f32 %v6106_v42, %v6098_v26  ;;  %5779 = vmatprep.subr.mxu0 %v6212_v1  ;;  %v2835_v26 = vld [vmem:[%s7370_s18 + $0x38] sm:$0xff]  ;;  %v2829_v42 = vld [vmem:[%s7370_s18 + $0x8] sm:$0xff] }
 0x50c   : > { %5767 = vmatmul.mubr.msk.f32.vlgmr.msra.gmra.mxu1 %vm1755_vm2, %v2107_v43  ;;  %v2828_v43 = vld [vmem:[%s7370_s18] sm:$0xff] }
 0x50d   : > { %5775 = vmatpush3.msra.mxu1 %v1752_v44  ;;  %5776 = vmatprep.mubr.msk.f32.mxu1 %vm6213_vm0, %v6212_v1  ;;  %v5253_v44 = vld [vmem:[%s7369_s17] ss:$0 sm:$0xff] }
 0x50e   : > { %5784 = vmatprep.subr.mxu1 %v6212_v1 }
 0x50f   : > { %v6108_v45 = vpop.eup %6107 }
 0x510   : > { %v6110_v46 = vpop.eup %6109  ;;  %v2109_v47 = vmul.f32 %v6108_v45, %v6100_v28  ;;  %v2833_v28 = vld [vmem:[%s7370_s18 + $0x28] sm:$0xff] }
 0x511   : > { %v2108_v48 = vmul.f32 %v6110_v46, %v6102_v29  ;;  %v2832_v29 = vld [vmem:[%s7370_s18 + $0x20] sm:$0xff] }
 0x512   : > { %5777 = vmatmul.mubr.msk.f32.vlgmr.msra.gmra.mxu1 %vm1755_vm2, %v2109_v47 }
 0x513   : > { %5772 = vmatmul.mubr.msk.f32.vlgmr.msra.gmra.mxu0 %vm1755_vm2, %v2108_v48  ;;  %5786 = vmatprep.mubr.msk.f32.mxu1 %vm6213_vm0, %v6212_v1 }
 0x514   : > { %5781 = vmatprep.mubr.msk.f32.mxu0 %vm6213_vm0, %v6212_v1  ;;  %5780 = vmatpush3.msra.mxu0 %v2402_v49  ;;  %v5255_v49 = vld [vmem:[%s7371_s19] ss:$0 sm:$0xff] }
 0x515   : > { %5789 = vmatprep.subr.mxu0 %v6212_v1  ;;  %5785 = vmatpush3.msra.mxu1 %v2403_v50 }
 0x516   : > { %5794 = vmatprep.subr.mxu1 %v6212_v1 }
 0x5c8   : > { %v2179_v52 = vpop.f32.mrf.mxu0 }
 0x5c9   : > { %5782 = vmatmul.mubr.msk.f32.vlgmr.msra.gmra.mxu0 %vm1755_vm2, %v2179_v52 }
 0x5ca   : > { %v5763_v53 = vpop.f32.mrf.mxu0  ;;  %5790 = vmatpush3.msra.mxu0 %v2404_v51  ;;  %5791 = vmatprep.mubr.msk.f32.mxu0 %vm6213_vm0, %v6212_v1 }
 0x5cb   : > { %5799 = vmatprep.subr.mxu0 %v6212_v1 }
 0x5cc   : > { %v2252_v55 = vpop.f32.mrf.mxu1 }
 0x5cd   : > { %5787 = vmatmul.mubr.msk.f32.vlgmr.msra.gmra.mxu1 %vm1755_vm2, %v2252_v55 }
 0x5ce   : > { %v5768_v56 = vpop.f32.mrf.mxu1  ;;  %5795 = vmatpush3.msra.mxu1 %v2405_v54  ;;  %5796 = vmatprep.mubr.msk.f32.mxu1 %vm6213_vm0, %v6212_v1 }
 0x5cf   : > { %5810 = vmatprep.subr.mxu1 %v6212_v1 }
 0x5d2   : > { %v2398_v57 = vpop.f32.mrf.mxu1 }
 0x5d3   : > { %v2325_v59 = vpop.f32.mrf.mxu0  ;;  %5797 = vmatmul.mubr.msk.f32.vlgmr.msra.gmra.mxu1 %vm1755_vm2, %v2398_v57 }
 0x5d4   : > { %5792 = vmatmul.mubr.msk.f32.vlgmr.msra.gmra.mxu0 %vm1755_vm2, %v2325_v59  ;;  %v5778_v60 = vpop.f32.mrf.mxu1  ;;  %5826 = vmatprep.mubr.msk.f32.mxu1 %vm6213_vm0, %v6212_v1 }
 0x5d5   : > { %v5773_v61 = vpop.f32.mrf.mxu0  ;;  %5807 = vmatprep.mubr.msk.f32.mxu0 %vm6213_vm0, %v6212_v1  ;;  %5800 = vmatpush3.msra.mxu0 %v2746_v23  ;;  %v5274_v23 = vld [vmem:[%s7405_s2 + $0xf8] sm:$0xff] }
 0x5d6   : > { %5801 = vmatprep.subr.mxu0 %v6212_v1  ;;  %5811 = vmatpush3.msra.mxu1 %v2835_v26  ;;  %v5262_v61 = vld [vmem:[%s7405_s2 + $0x98] sm:$0xff]  ;;  %v5272_v26 = vld [vmem:[%s7405_s2 + $0xe8] sm:$0xff] }
 0x5d7   : > { %5802 = vmatpush3.msra.mxu0 %v2745_v24  ;;  %5812 = vmatprep.subr.mxu1 %v6212_v1  ;;  %v5298_v24 = vld [vmem:[%s7408_s7 + $0xd8] sm:$0xff] }
 0x5d8   : > { %5803 = vmatprep.subr.mxu0 %v6212_v1  ;;  %5813 = vmatpush3.msra.mxu1 %v2834_v27  ;;  %v5296_v27 = vld [vmem:[%s7408_s7 + $0xc8] sm:$0xff] }
 0x5d9   : > { %5814 = vmatprep.subr.mxu1 %v6212_v1 }
 0x5da   : > { %5815 = vmatpush3.msra.mxu1 %v2833_v28  ;;  %v5271_v28 = vld [vmem:[%s7405_s2 + $0xe0] sm:$0xff] }
 0x5db   : > { %5816 = vmatprep.subr.mxu1 %v6212_v1 }
 0x5dc   : > { %5817 = vmatpush3.msra.mxu1 %v2832_v29  ;;  %v5295_v29 = vld [vmem:[%s7408_s7 + $0xc0] sm:$0xff] }
 0x5dd   : > { %5818 = vmatprep.subr.mxu1 %v6212_v1 }
 0x5de   : > { %5819 = vmatpush3.msra.mxu1 %v2831_v30  ;;  %v5294_v30 = vld [vmem:[%s7408_s7 + $0xb8] sm:$0xff] }
 0x5df   : > { %5820 = vmatprep.subr.mxu1 %v6212_v1 }
 0x5e0   : > { %5821 = vmatpush3.msra.mxu1 %v2830_v41  ;;  %v5301_v41 = vld [vmem:[%s7408_s7 + $0xf0] sm:$0xff] }
 0x5e1   : > { %5822 = vmatprep.subr.mxu1 %v6212_v1 }
 0x5e2   : > { %5823 = vmatpush3.msra.mxu1 %v2829_v42  ;;  %v5325_v42 = vld [vmem:[%s7409_s8 + $0xd0] sm:$0xff] }
 0x5e3   : > { %5824 = vmatprep.subr.mxu1 %v6212_v1 }
 0x5e4   : > { %5825 = vmatpush3.msra.mxu1 %v2828_v43  ;;  %v5300_v43 = vld [vmem:[%s7408_s7 + $0xe8] sm:$0xff] }
 0x5e5   : > { %5851 = vmatprep.subr.mxu1 %v6212_v1 }
 0x689   : > { %v2475_v62 = vpop.f32.mrf.mxu0 }
 0x68a   : > { %v2698_v4 = vsel %vm671_vm1, %v2475_v62, 0.0  ;;  %v5270_v62 = vld [vmem:[%s7405_s2 + $0xd8] sm:$0xff] }
 0x68b   : > { %v5783_v63 = vpop.f32.mrf.mxu0 }
 0x68c   : > { %v5261_v63 = vld [vmem:[%s7405_s2 + $0x90] sm:$0xff] }
 0x68d   : > { %v2548_v0 = vpop.f32.mrf.mxu1 }
 0x68e   : > { %v2699_v3 = vsel %vm671_vm1, %v2548_v0, 0.0  ;;  %v5269_v0 = vld [vmem:[%s7405_s2 + $0xd0] sm:$0xff] }
 0x68f   : > { %v5788_v2 = vpop.f32.mrf.mxu1  ;;  %v2700_v6 = vadd.f32 %v2699_v3, %v2698_v4  ;;  %v5268_v3 = vld [vmem:[%s7405_s2 + $0xc8] sm:$0xff]  ;;  %v5259_v4 = vld [vmem:[%s7405_s2 + $0x80] sm:$0xff] }
 0x690   : > { %v5260_v2 = vld [vmem:[%s7405_s2 + $0x88] sm:$0xff] }
 0x693   : > { %v2694_v5 = vpop.f32.mrf.mxu1 }
 0x694   : > { %v2621_v7 = vpop.f32.mrf.mxu0  ;;  %v2703_v12 = vsel %vm671_vm1, %v2694_v5, 0.0  ;;  %v5267_v5 = vld [vmem:[%s7405_s2 + $0xc0] sm:$0xff] }
 0x695   : > { %v2701_v8 = vsel %vm671_vm1, %v2621_v7, 0.0  ;;  %v5798_v9 = vpop.f32.mrf.mxu1 }
 0x696   : > { %v2702_v10 = vadd.f32 %v2701_v8, %v2700_v6  ;;  %v5793_v11 = vpop.f32.mrf.mxu0 }
 0x698   : > { %v2704_v14 = vadd.f32 %v2703_v12, %v2702_v10  ;;  %v5257_v10 = vld [vmem:[%s7372_s20] ss:$0 sm:$0xff] }
 0x699   : > { %v5258_v12 = vld [vmem:[%s7373_s21] ss:$0 sm:$0xff] }
 0x69a   : > { %v2712_v15 = vadd.f32 %v5250_v13, %v2704_v14 }
 0x69c   : > { %v2713_v16 = vadd.f32 %v2712_v15, %v6454_v32  ;;  %v2744_v32 = vld [vmem:[%s7368_s16 + $0x8] sm:$0xff]  ;;  %v5266_v15 = vld [vmem:[%s7405_s2 + $0xb8] sm:$0xff] }
 0x69d   : > { %5804 = vmatpush3.msra.mxu0 %v2744_v32  ;;  %v5273_v32 = vld [vmem:[%s7405_s2 + $0xf0] sm:$0xff] }
 0x69e   : > { %v2716_v17 = vsel %vm671_vm1, %v2713_v16, 0.0  ;;  %5805 = vmatprep.subr.mxu0 %v6212_v1 }
 0x69f   : > { %2717 = vadd.xlane.f32.xlu0 %v2716_v17  ;;  %5806 = vmatpush3.msra.mxu0 %v2743_v25  ;;  %v5265_v17 = vld [vmem:[%s7405_s2 + $0xb0] sm:$0xff] }
 0x6a0   : > { %5829 = vmatprep.subr.mxu0 %v6212_v1  ;;  %v5297_v25 = vld [vmem:[%s7408_s7 + $0xd0] sm:$0xff] }
 0x728   : > { %v2718_v18 = vpop.xlane.xlu0 %2717 }
 0x729   : > { %v2719_v19 = vmul.f32 0.03125, %v2718_v18  ;;  %v5289_v18 = vld [vmem:[%s7408_s7 + $0x90] sm:$0xff] }
 0x72b   : > { %v2720_v20 = vsub.f32 %v2713_v16, %v2719_v19  ;;  %v5290_v16 = vld [vmem:[%s7408_s7 + $0x98] sm:$0xff]  ;;  %v5264_v19 = vld [vmem:[%s7405_s2 + $0xa8] sm:$0xff] }
 0x72d   : > { %v2721_v21 = vmul.f32 %v2720_v20, %v2720_v20 }
 0x72f   : > { %v2722_v22 = vsel %vm671_vm1, %v2721_v21, 0.0  ;;  %v5263_v21 = vld [vmem:[%s7405_s2 + $0xa0] sm:$0xff] }
 0x730   : > { %2723 = vadd.xlane.f32.xlu1 %v2722_v22  ;;  %v5287_v22 = vld [vmem:[%s7408_s7 + $0x80] sm:$0xff] }
 0x7b9   : > { %v2724_v31 = vpop.xlane.xlu1 %2723 }
 0x7ba   : > { %v2725_v33 = vmul.f32 0.03125, %v2724_v31  ;;  %v5318_v31 = vld [vmem:[%s7409_s8 + $0x98] sm:$0xff] }
 0x7bc   : > { %v2726_v34 = vadd.f32 1e-05, %v2725_v33  ;;  %v5293_v33 = vld [vmem:[%s7408_s7 + $0xb0] sm:$0xff] }
 0x7be   : > { %6111 = vrsqrt.f32 %v2726_v34  ;;  %v5317_v34 = vld [vmem:[%s7409_s8 + $0x90] sm:$0xff] }
 0x7cb   : > { %v6112_v35 = vpop.eup %6111 }
 0x7cc   : > { %v2728_v37 = vmul.f32 %v6112_v35, %v2720_v20  ;;  %v5288_v20 = vld [vmem:[%s7408_s7 + $0x88] sm:$0xff] }
 0x7cd   : > { %v5292_v35 = vld [vmem:[%s7408_s7 + $0xa8] sm:$0xff] }
 0x7ce   : > { %v2735_v39 = vmul.f32 %v5251_v36, %v2728_v37  ;;  %v5316_v36 = vld [vmem:[%s7409_s8 + $0x88] sm:$0xff]  ;;  %v5291_v37 = vld [vmem:[%s7408_s7 + $0xa0] sm:$0xff] }
 0x7d0   : > { %v2742_v40 = vadd.f32 %v5252_v38, %v2735_v39  ;;  %v5315_v38 = vld [vmem:[%s7409_s8 + $0x80] sm:$0xff]  ;;  %v5302_v39 = vld [vmem:[%s7408_s7 + $0xf8] sm:$0xff] }
 0x7d2   : > { %5808 = vmatmul.mubr.msk.f32.vlgmr.msra.gmra.mxu0 %vm671_vm1, %v2742_v40 }
 0x7d3   : > { %5837 = vmatprep.mubr.msk.f32.mxu0 %vm6213_vm0, %v6212_v1  ;;  %5830 = vmatpush3.msra.mxu0 %v5262_v61 }
 0x7d4   : > { %5831 = vmatprep.subr.mxu0 %v6212_v1 }
 0x7d5   : > { %5832 = vmatpush3.msra.mxu0 %v5261_v63  ;;  %v5279_v63 = vld [vmem:[%s7361_s9 + $0x4] ss:$0 sm:$0xff] }
 0x7d6   : > { %5833 = vmatprep.subr.mxu0 %v6212_v1 }
 0x7d7   : > { %5834 = vmatpush3.msra.mxu0 %v5260_v2 }
 0x7d8   : > { %5835 = vmatprep.subr.mxu0 %v6212_v1 }
 0x7d9   : > { %5836 = vmatpush3.msra.mxu0 %v5259_v4 }
 0x7da   : > { %5840 = vmatprep.subr.mxu0 %v6212_v1 }
 0x892   : > { %v2823_v45 = vpop.f32.mrf.mxu0 }
 0x893   : > { %v2824_v46 = vadd.f32 %v5253_v44, %v2823_v45  ;;  %v5324_v44 = vld [vmem:[%s7409_s8 + $0xc8] sm:$0xff]  ;;  %v5299_v45 = vld [vmem:[%s7408_s7 + $0xe0] sm:$0xff]  ;;  %s5139_s7 = scalar_lea.hbm %s7374_s22, %s5392_s29 }
 0x894   : > { %v5809_v47 = vpop.f32.mrf.mxu0 }
 0x895   : > { %v2827_v48 = vmax.f32 %v2824_v46, 0.0  ;;  %v5323_v46 = vld [vmem:[%s7409_s8 + $0xc0] sm:$0xff]  ;;  %v5322_v47 = vld [vmem:[%s7409_s8 + $0xb8] sm:$0xff] }
 0x897   : > { %5827 = vmatmul.mubr.msk.f32.vlgmr.msra.gmra.mxu1 %vm2843_vm4, %v2827_v48  ;;  %v5321_v48 = vld [vmem:[%s7409_s8 + $0xb0] sm:$0xff] }
 0x898   : > { %5859 = vmatprep.mubr.msk.f32.mxu1 %vm6213_vm0, %v6212_v1  ;;  %5852 = vmatpush3.msra.mxu1 %v5270_v62 }
 0x899   : > { %5853 = vmatprep.subr.mxu1 %v6212_v1 }
 0x89a   : > { %5854 = vmatpush3.msra.mxu1 %v5269_v0 }
 0x89b   : > { %5855 = vmatprep.subr.mxu1 %v6212_v1 }
 0x89c   : > { %5856 = vmatpush3.msra.mxu1 %v5268_v3 }
 0x89d   : > { %5857 = vmatprep.subr.mxu1 %v6212_v1 }
 0x89e   : > { %5858 = vmatpush3.msra.mxu1 %v5267_v5  ;;  %v5309_v5 = vld [vmem:[%s7362_s10 + $0x6] ss:$0 sm:$0xff] }
 0x89f   : > { %5873 = vmatprep.subr.mxu1 %v6212_v1 }
 0x957   : > { %v2913_v50 = vpop.f32.mrf.mxu1 }
 0x958   : > { %v2914_v51 = vadd.f32 %v5255_v49, %v2913_v50  ;;  %v5320_v49 = vld [vmem:[%s7409_s8 + $0xa8] sm:$0xff]  ;;  %v5319_v50 = vld [vmem:[%s7409_s8 + $0xa0] sm:$0xff] }
 0x959   : > { %v5828_v52 = vpop.f32.mrf.mxu1 }
 0x95a   : > { %v2917_v53 = vadd.f32 %v2914_v51, %v2742_v40  ;;  %v5326_v40 = vld [vmem:[%s7409_s8 + $0xd8] sm:$0xff]  ;;  %v5329_v52 = vld [vmem:[%s7409_s8 + $0xf0] sm:$0xff] }
 0x95b   : > { %v5330_v51 = vld [vmem:[%s7409_s8 + $0xf8] sm:$0xff] }
 0x95c   : > { %v2920_v54 = vsel %vm671_vm1, %v2917_v53, 0.0 }
 0x95d   : > { %2921 = vadd.xlane.f32.xlu0 %v2920_v54  ;;  %v5327_v54 = vld [vmem:[%s7409_s8 + $0xe0] sm:$0xff] }
 0x9e6   : > { %v2922_v55 = vpop.xlane.xlu0 %2921 }
 0x9e7   : > { %v2923_v56 = vmul.f32 0.03125, %v2922_v55 }
 0x9e9   : > { %v2924_v57 = vsub.f32 %v2917_v53, %v2923_v56  ;;  %v5328_v53 = vld [vmem:[%s7409_s8 + $0xe8] sm:$0xff]  ;;  %s5128_s8 = scalar_lea.sflag [#allocation5], %s652_s25 }
 0x9eb   : > { %v2925_v59 = vmul.f32 %v2924_v57, %v2924_v57 }
 0x9ed   : > { %v2926_v60 = vsel %vm671_vm1, %v2925_v59, 0.0 }
 0x9ee   : > { %2927 = vadd.xlane.f32.xlu1 %v2926_v60  ;;  %v5307_v60 = vld [vmem:[%s7362_s10 + $0x4] ss:$0 sm:$0xff] }
 0xa77   : > { %v2928_v6 = vpop.xlane.xlu1 %2927 }
 0xa78   : > { %v2929_v7 = vmul.f32 0.03125, %v2928_v6 }
 0xa7a   : > { %v2930_v8 = vadd.f32 1e-05, %v2929_v7 }
 0xa7c   : > { %6113 = vrsqrt.f32 %v2930_v8  ;;  %v5281_v8 = vld [vmem:[%s7361_s9 + $0x6] ss:$0 sm:$0xff] }
 0xa89   : > { %v6114_v9 = vpop.eup %6113 }
 0xa8a   : > { %v2932_v11 = vmul.f32 %v6114_v9, %v2924_v57 }
 0xa8c   : > { %v2939_v13 = vmul.f32 %v5257_v10, %v2932_v11 }
 0xa8e   : > { %v6907_v14 = vadd.f32 %v5258_v12, %v2939_v13  ;;  %v5308_v13 = vld [vmem:[%s7362_s10 + $0x5] ss:$0 sm:$0xff] }
 0xa90   : > { %5838 = vmatmul.mubr.msk.f32.vlgmr.msra.gmra.mxu0 %vm671_vm1, %v6907_v14  ;;  %5860 = vmatmul.mubr.msk.f32.vlgmr.msra.gmra.mxu1 %vm671_vm1, %v6907_v14 }
 0xa91   : > { %5841 = vmatpush3.msra.mxu0 %v5266_v15  ;;  %5874 = vmatpush3.msra.mxu1 %v5290_v16  ;;  %v5335_v15 = vld [vmem:[%s7363_s11 + $0x4] ss:$0 sm:$0xff] }
 0xa92   : > { %5842 = vmatprep.subr.mxu0 %v6212_v1  ;;  %5875 = vmatprep.subr.mxu1 %v6212_v1 }
 0xa93   : > { %5843 = vmatpush3.msra.mxu0 %v5265_v17  ;;  %5876 = vmatpush3.msra.mxu1 %v5289_v18  ;;  %v5280_v17 = vld [vmem:[%s7361_s9 + $0x5] ss:$0 sm:$0xff] }
 0xa94   : > { %5844 = vmatprep.subr.mxu0 %v6212_v1  ;;  %5877 = vmatprep.subr.mxu1 %v6212_v1 }
 0xa95   : > { %5845 = vmatpush3.msra.mxu0 %v5264_v19  ;;  %5878 = vmatpush3.msra.mxu1 %v5288_v20 }
 0xa96   : > { %5846 = vmatprep.subr.mxu0 %v6212_v1  ;;  %5879 = vmatprep.subr.mxu1 %v6212_v1 }
 0xa97   : > { %5847 = vmatpush3.msra.mxu0 %v5263_v21  ;;  %5848 = vmatprep.mubr.msk.f32.mxu0 %vm6213_vm0, %v6212_v1 }
 0xa98   : > { %5880 = vmatpush3.msra.mxu1 %v5287_v22  ;;  %5881 = vmatprep.mubr.msk.f32.mxu1 %vm6213_vm0, %v6212_v1 }
 0xa99   : > { %5849 = vmatmul.mubr.msk.f32.vlgmr.msra.gmra.mxu0 %vm671_vm1, %v6907_v14  ;;  %5862 = vmatprep.subr.mxu0 %v6212_v1 }
 0xa9a   : > { %5882 = vmatmul.mubr.msk.f32.vlgmr.msra.gmra.mxu1 %vm671_vm1, %v6907_v14  ;;  %5895 = vmatprep.subr.mxu1 %v6212_v1 }
 0xa9b   : > { %5863 = vmatpush3.msra.mxu0 %v5274_v23  ;;  %5896 = vmatpush3.msra.mxu1 %v5298_v24  ;;  %v5310_v24 = vld [vmem:[%s7362_s10 + $0x7] ss:$0 sm:$0xff] }
 0xa9c   : > { %5864 = vmatprep.subr.mxu0 %v6212_v1  ;;  %5897 = vmatprep.subr.mxu1 %v6212_v1 }
 0xa9d   : > { %5865 = vmatpush3.msra.mxu0 %v5273_v32  ;;  %5898 = vmatpush3.msra.mxu1 %v5297_v25  ;;  %v5282_v25 = vld [vmem:[%s7361_s9 + $0x7] ss:$0 sm:$0xff] }
 0xa9e   : > { %5866 = vmatprep.subr.mxu0 %v6212_v1  ;;  %5899 = vmatprep.subr.mxu1 %v6212_v1 }
 0xa9f   : > { %5867 = vmatpush3.msra.mxu0 %v5272_v26  ;;  %5900 = vmatpush3.msra.mxu1 %v5296_v27 }
 0xaa0   : > { %5868 = vmatprep.subr.mxu0 %v6212_v1  ;;  %5901 = vmatprep.subr.mxu1 %v6212_v1 }
 0xaa1   : > { %5869 = vmatpush3.msra.mxu0 %v5271_v28  ;;  %5870 = vmatprep.mubr.msk.f32.mxu0 %vm6213_vm0, %v6212_v1 }
 0xaa2   : > { %5902 = vmatpush3.msra.mxu1 %v5295_v29  ;;  %5903 = vmatprep.mubr.msk.f32.mxu1 %vm6213_vm0, %v6212_v1 }
 0xaa3   : > { %5871 = vmatmul.mubr.msk.f32.vlgmr.msra.gmra.mxu0 %vm671_vm1, %v6907_v14  ;;  %5884 = vmatprep.subr.mxu0 %v6212_v1 }
 0xaa4   : > { %5904 = vmatmul.mubr.msk.f32.vlgmr.msra.gmra.mxu1 %vm671_vm1, %v6907_v14  ;;  %5917 = vmatprep.subr.mxu1 %v6212_v1 }
 0xaa5   : > { %5885 = vmatpush3.msra.mxu0 %v5294_v30  ;;  %5918 = vmatpush3.msra.mxu1 %v5318_v31  ;;  %v5336_v31 = vld [vmem:[%s7363_s11 + $0x5] ss:$0 sm:$0xff] }
 0xaa6   : > { %5886 = vmatprep.subr.mxu0 %v6212_v1  ;;  %5919 = vmatprep.subr.mxu1 %v6212_v1 }
 0xaa7   : > { %5887 = vmatpush3.msra.mxu0 %v5293_v33  ;;  %5920 = vmatpush3.msra.mxu1 %v5317_v34 }
 0xaa8   : > { %5888 = vmatprep.subr.mxu0 %v6212_v1  ;;  %5921 = vmatprep.subr.mxu1 %v6212_v1 }
 0xaa9   : > { %5889 = vmatpush3.msra.mxu0 %v5292_v35  ;;  %5922 = vmatpush3.msra.mxu1 %v5316_v36 }
 0xaaa   : > { %5890 = vmatprep.subr.mxu0 %v6212_v1  ;;  %5923 = vmatprep.subr.mxu1 %v6212_v1 }
 0xaab   : > { %5891 = vmatpush3.msra.mxu0 %v5291_v37  ;;  %5892 = vmatprep.mubr.msk.f32.mxu0 %vm6213_vm0, %v6212_v1 }
 0xaac   : > { %5924 = vmatpush3.msra.mxu1 %v5315_v38  ;;  %5925 = vmatprep.mubr.msk.f32.mxu1 %vm6213_vm0, %v6212_v1 }
 0xaad   : > { %5893 = vmatmul.mubr.msk.f32.vlgmr.msra.gmra.mxu0 %vm671_vm1, %v6907_v14  ;;  %5906 = vmatprep.subr.mxu0 %v6212_v1 }
 0xaae   : > { %5926 = vmatmul.mubr.msk.f32.vlgmr.msra.gmra.mxu1 %vm671_vm1, %v6907_v14  ;;  %5939 = vmatprep.subr.mxu1 %v6212_v1 }
 0xaaf   : > { %5907 = vmatpush3.msra.mxu0 %v5302_v39  ;;  %5940 = vmatpush3.msra.mxu1 %v5326_v40 }
 0xab0   : > { %5908 = vmatprep.subr.mxu0 %v6212_v1  ;;  %5941 = vmatprep.subr.mxu1 %v6212_v1 }
 0xab1   : > { %5909 = vmatpush3.msra.mxu0 %v5301_v41  ;;  %5942 = vmatpush3.msra.mxu1 %v5325_v42 }
 0xab2   : > { %5910 = vmatprep.subr.mxu0 %v6212_v1  ;;  %5943 = vmatprep.subr.mxu1 %v6212_v1 }
 0xab3   : > { %5911 = vmatpush3.msra.mxu0 %v5300_v43  ;;  %5944 = vmatpush3.msra.mxu1 %v5324_v44 }
 0xab4   : > { %5912 = vmatprep.subr.mxu0 %v6212_v1  ;;  %5945 = vmatprep.subr.mxu1 %v6212_v1 }
 0xab5   : > { %5913 = vmatpush3.msra.mxu0 %v5299_v45  ;;  %5914 = vmatprep.mubr.msk.f32.mxu0 %vm6213_vm0, %v6212_v1 }
 0xab6   : > { %5946 = vmatpush3.msra.mxu1 %v5323_v46  ;;  %5947 = vmatprep.mubr.msk.f32.mxu1 %vm6213_vm0, %v6212_v1 }
 0xab7   : > { %5915 = vmatmul.mubr.msk.f32.vlgmr.msra.gmra.mxu0 %vm671_vm1, %v6907_v14  ;;  %5928 = vmatprep.subr.mxu0 %v6212_v1 }
 0xab8   : > { %5948 = vmatmul.mubr.msk.f32.vlgmr.msra.gmra.mxu1 %vm671_vm1, %v6907_v14  ;;  %5929 = vmatpush3.msra.mxu0 %v5322_v47 }
 0xab9   : > { %5930 = vmatprep.subr.mxu0 %v6212_v1  ;;  %5936 = vmatprep.mubr.msk.f32.mxu0 %vm6213_vm0, %v6212_v1 }
 0xaba   : > { %5931 = vmatpush3.msra.mxu0 %v5321_v48  ;;  %5961 = vmatprep.subr.mxu1 %v6212_v1 }
 0xabb   : > { %5932 = vmatprep.subr.mxu0 %v6212_v1  ;;  %5963 = vmatprep.mubr.msk.f32.mxu1 %vm6213_vm0, %v6212_v1 }
 0xabc   : > { %5933 = vmatpush3.msra.mxu0 %v5320_v49 }
 0xabd   : > { %5934 = vmatprep.subr.mxu0 %v6212_v1 }
 0xabe   : > { %5935 = vmatpush3.msra.mxu0 %v5319_v50 }
 0xabf   : > { %5937 = vmatmul.mubr.msk.f32.vlgmr.msra.gmra.mxu0 %vm671_vm1, %v6907_v14  ;;  %5950 = vmatprep.subr.mxu0 %v6212_v1 }
 0xac0   : > { %5951 = vmatpush3.msra.mxu0 %v5330_v51  ;;  %5958 = vmatprep.mubr.msk.f32.mxu0 %vm6213_vm0, %v6212_v1 }
 0xac1   : > { %5952 = vmatprep.subr.mxu0 %v6212_v1 }
 0xac2   : > { %5953 = vmatpush3.msra.mxu0 %v5329_v52 }
 0xac3   : > { %5954 = vmatprep.subr.mxu0 %v6212_v1 }
 0xac4   : > { %5955 = vmatpush3.msra.mxu0 %v5328_v53 }
 0xac5   : > { %5956 = vmatprep.subr.mxu0 %v6212_v1 }
 0xac6   : > { %5957 = vmatpush3.msra.mxu0 %v5327_v54 }
 0xac7   : > { %5959 = vmatmul.mubr.msk.f32.vlgmr.msra.gmra.mxu0 %vm671_vm1, %v6907_v14  ;;  %5971 = vmatprep.subr.mxu0 %v6212_v1 }
 0xac8   : > { %5973 = vmatprep.mubr.msk.f32.mxu0 %vm6213_vm0, %v6212_v1 }
 0xb50   : > { %v3062_v55 = vpop.f32.mrf.mxu0  ;;  %v3202_v56 = vpop.f32.mrf.mxu1 }
 0xb51   : > { %v3063_v4 = vadd.f32 %v5279_v63, %v3062_v55  ;;  %v3203_v12 = vadd.f32 %v5281_v8, %v3202_v56 }
 0xb52   : > { %v5839_v57 = vpop.f32.mrf.mxu0  ;;  %v5861_v59 = vpop.f32.mrf.mxu1 }
 0xb59   : > { %v3132_v61 = vpop.f32.mrf.mxu0 }
 0xb5a   : > { %v3388_v62 = vpop.f32.mrf.mxu1  ;;  %v3133_v23 = vadd.f32 %v5280_v17, %v3132_v61 }
 0xb5b   : > { %v3389_v0 = vadd.f32 %v5307_v60, %v3388_v62  ;;  %v5850_v2 = vpop.f32.mrf.mxu0 }
 0xb5c   : > { %v5883_v3 = vpop.f32.mrf.mxu1 }
 0xb5d   : > { %5962 = vmatpush3.xpose.msk.msra.mxu1 %vm1755_vm2, %v3389_v0 }
 0xb5e   : > { %5966 = vmatprep.subr.mxu1 %v6212_v1 }
 0xb60   : > { %5964 = vmatmul.mubr.msk.f32.vlgmr.msra.gmra.mxu1 %vm1755_vm2, %v3063_v4 }
 0xb61   : > { %5968 = vmatprep.mubr.msk.f32.mxu1 %vm6213_vm0, %v6212_v1 }
 0xb63   : > { %v3272_v6 = vpop.f32.mrf.mxu0 }
 0xb64   : > { %v3528_v7 = vpop.f32.mrf.mxu1  ;;  %v3273_v30 = vadd.f32 %v5282_v25, %v3272_v6 }
 0xb65   : > { %v3529_v9 = vadd.f32 %v5309_v5, %v3528_v7  ;;  %v5872_v10 = vpop.f32.mrf.mxu0 }
 0xb66   : > { %v5905_v11 = vpop.f32.mrf.mxu1 }
 0xb67   : > { %5972 = vmatpush3.xpose.msk.msra.mxu0 %vm1755_vm2, %v3529_v9 }
 0xb68   : > { %5981 = vmatprep.subr.mxu0 %v6212_v1 }
 0xb6a   : > { %5974 = vmatmul.mubr.msk.f32.vlgmr.msra.gmra.mxu0 %vm1755_vm2, %v3203_v12 }
 0xb6b   : > { %5983 = vmatprep.mubr.msk.f32.mxu0 %vm6213_vm0, %v6212_v1 }
 0xb6d   : > { %v3458_v16 = vpop.f32.mrf.mxu0 }
 0xb6e   : > { %v3459_v18 = vadd.f32 %v5308_v13, %v3458_v16  ;;  %v3714_v19 = vpop.f32.mrf.mxu1  ;;  %v5337_v13 = vld [vmem:[%s7363_s11 + $0x6] ss:$0 sm:$0xff] }
 0xb6f   : > { %v3715_v20 = vadd.f32 %v5335_v15, %v3714_v19  ;;  %v5894_v21 = vpop.f32.mrf.mxu0 }
 0xb70   : > { %v5927_v22 = vpop.f32.mrf.mxu1  ;;  %5967 = vmatpush3.xpose.msk.msra.mxu1 %vm1755_vm2, %v3459_v18 }
 0xb71   : > { %5982 = vmatpush3.msra.mxu0 %v3715_v20  ;;  %5976 = vmatprep.subr.mxu1 %v6212_v1  ;;  %v5338_v22 = vld [vmem:[%s7363_s11 + $0x7] ss:$0 sm:$0xff] }
 0xb72   : > { %5991 = vmatprep.subr.mxu0 %v6212_v1 }
 0xb73   : > { %5969 = vmatmul.mubr.msk.f32.vlgmr.msra.gmra.mxu1 %vm1755_vm2, %v3133_v23 }
 0xb74   : > { %5978 = vmatprep.mubr.msk.f32.mxu1 %vm6213_vm0, %v6212_v1 }
 0xb77   : > { %v3598_v32 = vpop.f32.mrf.mxu0 }
 0xb78   : > { %v3599_v26 = vadd.f32 %v5310_v24, %v3598_v32  ;;  %v7160_v27 = vpop.f32.mrf.mxu1 }
 0xb79   : > { %v5916_v28 = vpop.f32.mrf.mxu0  ;;  %v3855_v17 = vadd.f32 %v5337_v13, %v7160_v27  ;;  %v5355_v27 = vld [vmem:[%s7364_s12 + $0x20] sm:$0xff] }
 0xb7a   : > { %v5949_v29 = vpop.f32.mrf.mxu1  ;;  %5977 = vmatpush3.xpose.msk.msra.mxu1 %vm1755_vm2, %v3599_v26  ;;  %v5356_v28 = vld [vmem:[%s7364_s12 + $0x28] sm:$0xff]  ;;  %v5367_v13 = vld [vmem:[%s7366_s14 + $0x1] ss:$0 sm:$0xff] }
 0xb7b   : > { %5986 = vmatprep.subr.mxu1 %v6212_v1  ;;  %v5357_v29 = vld [vmem:[%s7364_s12 + $0x30] sm:$0xff] }
 0xb7d   : > { %5979 = vmatmul.mubr.msk.f32.vlgmr.msra.gmra.mxu1 %vm1755_vm2, %v3273_v30 }
 0xb7e   : > { %5988 = vmatprep.mubr.msk.f32.mxu1 %vm6213_vm0, %v6212_v1 }
 0xb7f   : > { %v3784_v33 = vpop.f32.mrf.mxu0 }
 0xb80   : > { %v3785_v34 = vadd.f32 %v5336_v31, %v3784_v33 }
 0xb81   : > { %v5938_v35 = vpop.f32.mrf.mxu0 }
 0xb82   : > { %5987 = vmatpush3.msra.mxu1 %v3785_v34  ;;  %v5358_v35 = vld [vmem:[%s7364_s12 + $0x38] sm:$0xff] }
 0xb83   : > { %5996 = vmatprep.subr.mxu1 %v6212_v1 }
 0xb87   : > { %v7171_v36 = vpop.f32.mrf.mxu0 }
 0xb88   : > { %v3925_v32 = vadd.f32 %v5338_v22, %v7171_v36  ;;  %v5374_v22 = vld [vmem:[%s7369_s17 + $0x1] ss:$0 sm:$0xff] }
 0xb89   : > { %v5960_v37 = vpop.f32.mrf.mxu0 }
 0xc20   : > { %v4000_v38 = vpop.f32.mrf.mxu1 }
 0xc21   : > { %v4232_v39 = vsel %vm6721_vm3, %v4000_v38, -1e+30 }
 0xc22   : > { %v5965_v40 = vpop.f32.mrf.mxu1  ;;  %v4236_v41 = vsel %vm1755_vm2, %v4232_v39, -inf }
 0xc23   : > { %4237 = vmax.xlane.f32.xlu0 %v4236_v41 }
 0xc2a   : > { %v4152_v42 = vpop.f32.mrf.mxu0 }
 0xc2b   : > { %v4234_v43 = vsel %vm6721_vm3, %v4152_v42, -1e+30 }
 0xc2c   : > { %v5975_v44 = vpop.f32.mrf.mxu0  ;;  %v4242_v45 = vsel %vm1755_vm2, %v4234_v43, -inf }
 0xc2d   : > { %4243 = vmax.xlane.f32.xlu0 %v4242_v45 }
 0xc33   : > { %v4076_v46 = vpop.f32.mrf.mxu1 }
 0xc34   : > { %v4233_v47 = vsel %vm6721_vm3, %v4076_v46, -1e+30 }
 0xc35   : > { %v5970_v48 = vpop.f32.mrf.mxu1  ;;  %v4239_v49 = vsel %vm1755_vm2, %v4233_v47, -inf }
 0xc36   : > { %4240 = vmax.xlane.f32.xlu1 %v4239_v49 }
 0xc3d   : > { %v4228_v50 = vpop.f32.mrf.mxu1 }
 0xc3e   : > { %v4235_v51 = vsel %vm6721_vm3, %v4228_v50, -1e+30 }
 0xc3f   : > { %v5980_v52 = vpop.f32.mrf.mxu1  ;;  %v4245_v53 = vsel %vm1755_vm2, %v4235_v51, -inf }
 0xc40   : > { %4246 = vmax.xlane.f32.xlu1 %v4245_v53  ;;  %v5364_v53 = vld [vmem:[%s7365_s13 + $0x1] ss:$0 sm:$0xff] }
 0xcac   : > { %v4238_v54 = vpop.xlane.xlu0 %4237 }
 0xcad   : > { %v4248_v55 = vsub.f32 %v4232_v39, %v4238_v54 }
 0xcaf   : > { %v4252_v56 = vmul.f32 1.442695, %v4248_v55 }
 0xcb1   : > { %6115 = vpow2.f32 %v4252_v56 }
 0xcb6   : > { %v4244_v57 = vpop.xlane.xlu0 %4243 }
 0xcb7   : > { %v4250_v59 = vsub.f32 %v4234_v43, %v4244_v57 }
 0xcb9   : > { %v4256_v60 = vmul.f32 1.442695, %v4250_v59 }
 0xcbb   : > { %6117 = vpow2.f32 %v4256_v60 }
 0xcbe   : > { %v6116_v61 = vpop.eup %6115 }
 0xcbf   : > { %v4241_v62 = vpop.xlane.xlu1 %4240  ;;  %v4260_v63 = vsel %vm1755_vm2, %v6116_v61, 0.0 }
 0xcc0   : > { %v4249_v0 = vsub.f32 %v4233_v47, %v4241_v62  ;;  %4261 = vadd.xlane.f32.xlu0 %v4260_v63 }
 0xcc2   : > { %v4254_v58 = vmul.f32 1.442695, %v4249_v0 }
 0xcc4   : > { %6119 = vpow2.f32 %v4254_v58  ;;  %v5372_v58 = vld [vmem:[%s7368_s16 + $0x38] sm:$0xff] }
 0xcc8   : > { %v6118_v2 = vpop.eup %6117 }
 0xcc9   : > { %v4247_v3 = vpop.xlane.xlu1 %4246  ;;  %v4266_v4 = vsel %vm1755_vm2, %v6118_v2, 0.0 }
 0xcca   : > { %v4251_v5 = vsub.f32 %v4235_v51, %v4247_v3  ;;  %4267 = vadd.xlane.f32.xlu0 %v4266_v4  ;;  %v5369_v3 = vld [vmem:[%s7368_s16 + $0x20] sm:$0xff]  ;;  %v5383_v4 = vld [vmem:[%s7370_s18 + $0x78] sm:$0xff] }
 0xccc   : > { %v4258_v6 = vmul.f32 1.442695, %v4251_v5  ;;  %v5382_v5 = vld [vmem:[%s7370_s18 + $0x70] sm:$0xff] }
 0xcce   : > { %6121 = vpow2.f32 %v4258_v6  ;;  %v5381_v6 = vld [vmem:[%s7370_s18 + $0x68] sm:$0xff] }
 0xcd1   : > { %v6120_v7 = vpop.eup %6119 }
 0xcd2   : > { %v4263_v8 = vsel %vm1755_vm2, %v6120_v7, 0.0 }
 0xcd3   : > { %4264 = vadd.xlane.f32.xlu1 %v4263_v8  ;;  %v5379_v8 = vld [vmem:[%s7370_s18 + $0x58] sm:$0xff] }
 0xcdb   : > { %v6122_v9 = vpop.eup %6121 }
 0xcdc   : > { %v4269_v10 = vsel %vm1755_vm2, %v6122_v9, 0.0 }
 0xcdd   : > { %4270 = vadd.xlane.f32.xlu1 %v4269_v10 }
 0xd49   : > { %v4262_v11 = vpop.xlane.xlu0 %4261 }
 0xd4a   : > { %6123 = vrcp.f32 %v4262_v11 }
 0xd53   : > { %v4268_v12 = vpop.xlane.xlu0 %4267 }
 0xd54   : > { %6125 = vrcp.f32 %v4268_v12 }
 0xd57   : > { %v6124_v15 = vpop.eup %6123 }
 0xd58   : > { %v4276_v16 = vmul.f32 %v6124_v15, %v6116_v61 }
 0xd5a   : > { %5984 = vmatmul.mubr.msk.f32.vlgmr.msra.gmra.mxu0 %vm1755_vm2, %v4276_v16  ;;  %v5368_v16 = vld [vmem:[%s7412_s6 + $0x1] ss:$0 sm:$0xff] }
 0xd5b   : > { %5992 = vmatpush3.msra.mxu0 %v3855_v17  ;;  %5993 = vmatprep.mubr.msk.f32.mxu0 %vm6213_vm0, %v6212_v1 }
 0xd5c   : > { %v4265_v18 = vpop.xlane.xlu1 %4264  ;;  %6001 = vmatprep.subr.mxu0 %v6212_v1 }
 0xd5d   : > { %6127 = vrcp.f32 %v4265_v18 }
 0xd61   : > { %v6126_v19 = vpop.eup %6125 }
 0xd62   : > { %v4278_v20 = vmul.f32 %v6126_v19, %v6118_v2  ;;  %v5371_v2 = vld [vmem:[%s7368_s16 + $0x30] sm:$0xff] }
 0xd63   : > { %v5378_v19 = vld [vmem:[%s7370_s18 + $0x50] sm:$0xff] }
 0xd64   : > { %5994 = vmatmul.mubr.msk.f32.vlgmr.msra.gmra.mxu0 %vm1755_vm2, %v4278_v20  ;;  %v5377_v20 = vld [vmem:[%s7370_s18 + $0x48] sm:$0xff] }
 0xd65   : > { %6003 = vmatprep.mubr.msk.f32.mxu0 %vm6213_vm0, %v6212_v1  ;;  %6002 = vmatpush3.msra.mxu0 %v5355_v27 }
 0xd66   : > { %v4271_v21 = vpop.xlane.xlu1 %4270  ;;  %6011 = vmatprep.subr.mxu0 %v6212_v1 }
 0xd67   : > { %6129 = vrcp.f32 %v4271_v21  ;;  %v5376_v21 = vld [vmem:[%s7370_s18 + $0x40] sm:$0xff] }
 0xd6a   : > { %v6128_v23 = vpop.eup %6127 }
 0xd6b   : > { %v4277_v24 = vmul.f32 %v6128_v23, %v6120_v7  ;;  %v5380_v7 = vld [vmem:[%s7370_s18 + $0x60] sm:$0xff] }
 0xd6d   : > { %5989 = vmatmul.mubr.msk.f32.vlgmr.msra.gmra.mxu1 %vm1755_vm2, %v4277_v24 }
 0xd6e   : > { %5997 = vmatpush3.msra.mxu1 %v3925_v32  ;;  %5998 = vmatprep.mubr.msk.f32.mxu1 %vm6213_vm0, %v6212_v1 }
 0xd6f   : > { %6006 = vmatprep.subr.mxu1 %v6212_v1 }
 0xd74   : > { %v6130_v25 = vpop.eup %6129 }
 0xd75   : > { %v4279_v26 = vmul.f32 %v6130_v25, %v6122_v9 }
 0xd77   : > { %5999 = vmatmul.mubr.msk.f32.vlgmr.msra.gmra.mxu1 %vm1755_vm2, %v4279_v26  ;;  %v5385_v26 = vld [vmem:[%s7371_s19 + $0x1] ss:$0 sm:$0xff] }
 0xd78   : > { %6008 = vmatprep.mubr.msk.f32.mxu1 %vm6213_vm0, %v6212_v1  ;;  %6007 = vmatpush3.msra.mxu1 %v5356_v28 }
 0xd79   : > { %6016 = vmatprep.subr.mxu1 %v6212_v1 }
 0xe1a   : > { %v4349_v30 = vpop.f32.mrf.mxu0 }
 0xe1b   : > { %6004 = vmatmul.mubr.msk.f32.vlgmr.msra.gmra.mxu0 %vm1755_vm2, %v4349_v30 }
 0xe1c   : > { %v5985_v31 = vpop.f32.mrf.mxu0  ;;  %6012 = vmatpush3.msra.mxu0 %v5357_v29  ;;  %6013 = vmatprep.mubr.msk.f32.mxu0 %vm6213_vm0, %v6212_v1 }
 0xe1d   : > { %6021 = vmatprep.subr.mxu0 %v6212_v1 }
 0xe24   : > { %v4495_v33 = vpop.f32.mrf.mxu0 }
 0xe25   : > { %6014 = vmatmul.mubr.msk.f32.vlgmr.msra.gmra.mxu0 %vm1755_vm2, %v4495_v33 }
 0xe26   : > { %v5995_v34 = vpop.f32.mrf.mxu0  ;;  %6029 = vmatprep.mubr.msk.f32.mxu0 %vm6213_vm0, %v6212_v1  ;;  %6022 = vmatpush3.msra.mxu0 %v5372_v58 }
 0xe27   : > { %6023 = vmatprep.subr.mxu0 %v6212_v1 }
 0xe28   : > { %6024 = vmatpush3.msra.mxu0 %v5371_v2 }
 0xe29   : > { %6025 = vmatprep.subr.mxu0 %v6212_v1 }
 0xe2d   : > { %v4422_v36 = vpop.f32.mrf.mxu1 }
 0xe2e   : > { %6009 = vmatmul.mubr.msk.f32.vlgmr.msra.gmra.mxu1 %vm1755_vm2, %v4422_v36 }
 0xe2f   : > { %v5990_v37 = vpop.f32.mrf.mxu1  ;;  %6017 = vmatpush3.msra.mxu1 %v5358_v35  ;;  %6018 = vmatprep.mubr.msk.f32.mxu1 %vm6213_vm0, %v6212_v1 }
 0xe30   : > { %6032 = vmatprep.subr.mxu1 %v6212_v1 }
 0xe37   : > { %v4568_v38 = vpop.f32.mrf.mxu1 }
 0xe38   : > { %6019 = vmatmul.mubr.msk.f32.vlgmr.msra.gmra.mxu1 %vm1755_vm2, %v4568_v38 }
 0xe39   : > { %v6000_v39 = vpop.f32.mrf.mxu1  ;;  %6048 = vmatprep.mubr.msk.f32.mxu1 %vm6213_vm0, %v6212_v1  ;;  %6033 = vmatpush3.msra.mxu1 %v5383_v4 }
 0xe3a   : > { %6034 = vmatprep.subr.mxu1 %v6212_v1 }
 0xe3b   : > { %6035 = vmatpush3.msra.mxu1 %v5382_v5 }
 0xe3c   : > { %6036 = vmatprep.subr.mxu1 %v6212_v1 }
 0xe3d   : > { %6037 = vmatpush3.msra.mxu1 %v5381_v6 }
 0xe3e   : > { %6038 = vmatprep.subr.mxu1 %v6212_v1 }
 0xe3f   : > { %6039 = vmatpush3.msra.mxu1 %v5380_v7 }
 0xe40   : > { %6040 = vmatprep.subr.mxu1 %v6212_v1 }
 0xe41   : > { %6041 = vmatpush3.msra.mxu1 %v5379_v8 }
 0xe42   : > { %6042 = vmatprep.subr.mxu1 %v6212_v1 }
 0xe43   : > { %6043 = vmatpush3.msra.mxu1 %v5378_v19 }
 0xe44   : > { %6044 = vmatprep.subr.mxu1 %v6212_v1 }
 0xe45   : > { %6045 = vmatpush3.msra.mxu1 %v5377_v20 }
 0xe46   : > { %6046 = vmatprep.subr.mxu1 %v6212_v1 }
 0xe47   : > { %6047 = vmatpush3.msra.mxu1 %v5376_v21 }
 0xedb   : > { %v4646_v40 = vpop.f32.mrf.mxu0 }
 0xedc   : > { %v4869_v47 = vsel %vm671_vm1, %v4646_v40, 0.0 }
 0xedd   : > { %v6005_v41 = vpop.f32.mrf.mxu0 }
 0xede   : > { %v5389_v41 = vld [vmem:[%s7372_s20 + $0x1] ss:$0 sm:$0xff] }
 0xee5   : > { %v4792_v42 = vpop.f32.mrf.mxu0 }
 0xee6   : > { %v4872_v49 = vsel %vm671_vm1, %v4792_v42, 0.0 }
 0xee7   : > { %v6015_v43 = vpop.f32.mrf.mxu0 }
 0xee8   : > { %v5390_v43 = vld [vmem:[%s7373_s21 + $0x1] ss:$0 sm:$0xff] }
 0xeee   : > { %v4719_v44 = vpop.f32.mrf.mxu1 }
 0xeef   : > { %v4870_v46 = vsel %vm671_vm1, %v4719_v44, 0.0 }
 0xef0   : > { %v6010_v45 = vpop.f32.mrf.mxu1  ;;  %v4871_v48 = vadd.f32 %v4870_v46, %v4869_v47 }
 0xef2   : > { %v4873_v51 = vadd.f32 %v4872_v49, %v4871_v48 }
 0xef8   : > { %v4865_v50 = vpop.f32.mrf.mxu1 }
 0xef9   : > { %v4874_v52 = vsel %vm671_vm1, %v4865_v50, 0.0 }
 0xefa   : > { %v4875_v54 = vadd.f32 %v4874_v52, %v4873_v51  ;;  %v6020_v55 = vpop.f32.mrf.mxu1 }
 0xefc   : > { %v4884_v56 = vadd.f32 %v5364_v53, %v4875_v54 }
 0xefe   : > { %v4885_v57 = vadd.f32 %v4884_v56, %v6907_v14  ;;  %v5370_v14 = vld [vmem:[%s7368_s16 + $0x28] sm:$0xff] }
 0xeff   : > { %6026 = vmatpush3.msra.mxu0 %v5370_v14 }
 0xf00   : > { %v4890_v59 = vsel %vm671_vm1, %v4885_v57, 0.0  ;;  %6027 = vmatprep.subr.mxu0 %v6212_v1 }
 0xf01   : > { %4891 = vadd.xlane.f32.xlu0 %v4890_v59  ;;  %6028 = vmatpush3.msra.mxu0 %v5369_v3 }
 0xf8a   : > { %v4892_v60 = vpop.xlane.xlu0 %4891 }
 0xf8b   : > { %v4893_v61 = vmul.f32 0.03125, %v4892_v60 }
 0xf8d   : > { %v4894_v62 = vsub.f32 %v4885_v57, %v4893_v61 }
 0xf8f   : > { %v4895_v63 = vmul.f32 %v4894_v62, %v4894_v62 }
 0xf91   : > { %v4896_v0 = vsel %vm671_vm1, %v4895_v63, 0.0 }
 0xf92   : > { %4897 = vadd.xlane.f32.xlu1 %v4896_v0 }
0x101b   : > { %v4898_v9 = vpop.xlane.xlu1 %4897 }
0x101c   : > { %v4899_v10 = vmul.f32 0.03125, %v4898_v9 }
0x101e   : > { %v4900_v11 = vadd.f32 1e-05, %v4899_v10 }
0x1020   : > { %6131 = vrsqrt.f32 %v4900_v11 }
0x102d   : > { %v6132_v12 = vpop.eup %6131 }
0x102e   : > { %v4902_v15 = vmul.f32 %v6132_v12, %v4894_v62 }
0x1030   : > { %v4909_v17 = vmul.f32 %v5367_v13, %v4902_v15 }
0x1032   : > { %v4916_v18 = vadd.f32 %v5368_v16, %v4909_v17 }
0x1034   : > { %6030 = vmatmul.mubr.msk.f32.vlgmr.msra.gmra.mxu0 %vm671_vm1, %v4916_v18 }
0x10f4   : > { %v4999_v23 = vpop.f32.mrf.mxu0 }
0x10f5   : > { %v5000_v24 = vadd.f32 %v5374_v22, %v4999_v23 }
0x10f6   : > { %v6031_v32 = vpop.f32.mrf.mxu0 }
0x10f7   : > { %v5003_v25 = vmax.f32 %v5000_v24, 0.0 }
0x10f9   : > { %6049 = vmatmul.mubr.msk.f32.vlgmr.msra.gmra.mxu1 %vm2843_vm4, %v5003_v25 }
0x11b9   : > { %v5090_v27 = vpop.f32.mrf.mxu1 }
0x11ba   : > { %v5091_v28 = vadd.f32 %v5385_v26, %v5090_v27 }
0x11bb   : > { %v6050_v29 = vpop.f32.mrf.mxu1 }
0x11bc   : > { %v5094_v1 = vadd.f32 %v5091_v28, %v4916_v18 }
0x11be   : > { %v5099_v30 = vsel %vm671_vm1, %v5094_v1, 0.0 }
0x11bf   : > { %5100 = vadd.xlane.f32.xlu0 %v5099_v30 }
0x1248   : > { %v5101_v31 = vpop.xlane.xlu0 %5100 }
0x1249   : > { %v5102_v33 = vmul.f32 0.03125, %v5101_v31 }
0x124b   : > { %v5103_v34 = vsub.f32 %v5094_v1, %v5102_v33 }
0x124d   : > { %v5104_v35 = vmul.f32 %v5103_v34, %v5103_v34 }
0x124f   : > { %v5105_v36 = vsel %vm671_vm1, %v5104_v35, 0.0 }
0x1250   : > { %5106 = vadd.xlane.f32.xlu1 %v5105_v36 }
0x12d9   : > { %v5107_v37 = vpop.xlane.xlu1 %5106 }
0x12da   : > { %v5108_v38 = vmul.f32 0.03125, %v5107_v37 }
0x12dc   : > { %v5109_v39 = vadd.f32 1e-05, %v5108_v38 }
0x12de   : > { %6133 = vrsqrt.f32 %v5109_v39 }
0x12eb   : > { %v6134_v40 = vpop.eup %6133 }
0x12ec   : > { %v5111_v42 = vmul.f32 %v6134_v40, %v5103_v34 }
0x12ee   : > { %v5118_v44 = vmul.f32 %v5389_v41, %v5111_v42 }
0x12f0   : > { %v5125_v45 = vadd.f32 %v5390_v43, %v5118_v44 }
0x12f2   : > { %5126 = vst.msk [vmem:[%s654_s4] sm:$0xff] %vm671_vm1, %v5125_v45 }
0x12f3   : > { %6160 = shalt.err (!%p6157_p8)
}
0x12f4   : > { %s6161_s2 = scalar_lea.hbm %s5139_s7, 128  ;;  %s6165_s26 = scalar_lea.hbm %s7374_s22, 256 }
0x12f5   : > { %p6162_p9 = scmp.ne.s32.totalorder %s5139_s7, %s6161_s2  ;;  %p6166_p0 = scmp.lt.s32.totalorder %s5139_s7, %s7374_s22 }
0x12f6   : > { %p6167_p1 = scmp.lt.s32.totalorder %s6165_s26, %s6161_s2 }
0x12f7   : > { %p6163_p12 = pnand %p6162_p9, %p6371_p10 }
0x12f8   : > { %p6168_p2 = por %p6167_p1, %p6166_p0 }
0x12f9   : > { %p6164_p13 = pneg %p6163_p12 }
0x12fb   : > { %p6169_p3 = pnand %p6168_p2, %p6164_p13 }
0x12fd   : > { %6172 = shalt.err (!%p6169_p3)
}
0x12fe   : > { %6051 = dma.vmem_to_hbm [thread:$0]  (%p6371_p10), %s5142_s24, 128, %s5139_s7, %s5128_s8  }
0x12ff PF: > { %p6057_p4 = scmp.ge.s32.totalorder %s6209_s5, 2  ;;  %s5153_s28 = sand.u32 1, %s6197_s0  }
0x1300   : > { %s5154_s1 = scalar_lea.sflag [#allocation5], %s5153_s28 }
0x1301   : > { %p6054_p5 = pnand %p6057_p4, %p6375_p11 }
0x1303   : > { %p6055_p6 = pneg %p6054_p5 }
0x1305   : > { %6192 = dma.done.wait (%p6055_p6), %s5154_s1, 128  }
0x1306   : > { %6194 = vsyncadd (%p6055_p6), %s5154_s1, 4294967168  ;;  %s7414_s5 = sld [smem:[#allocation9_spill]]  ;;  %s7417_s0 = smov %s6201_s23 }
0x1307   : > { %s7415_s30 = sld [smem:[#allocation8_spill]] }
0x1308   : > { %s7416_s1 = sld [smem:[#allocation10_spill]] }
0x130c   : > { %p38_p7 = scmp.ge.s32.totalorder %s7414_s5, 4  }
0x130d   : > { %s7418_s23 = smov %s7415_s30 }
0x130e   :  { %40 = sbr.rel (!%p38_p7) target bundleno = 34 (0x22), region = 155 }
0x1313   :  { %5159 = vsyncpa [#allocation5], 1 }
0x1314   :  { %5161 = vsyncpa [#allocation5 + $0x1], 1 }

</bundles_post_ra>
